<compile_context>
chip_gen: v5e
topology: v5e:2x2
jax: 0.10.0
libtpu: 0.0.40
codegen_flags: <defaults>
</compile_context>

<pallas_src>
import math
from functools import partial

import jax
import jax.numpy as jnp
from jax.experimental import pallas as pl
from jax.experimental.pallas import tpu as pltpu


# Approximate reciprocal (EUP vrcp) in the softmax denominator: ~1e-3 relative error
# vs exact division. Set False when running tight parity tests vs a PyTorch reference.
_APPROX_SOFTMAX_RECIP = True


# ----------------------------------------------------------------------------
# Small helpers
# ----------------------------------------------------------------------------

def _vmem_budget_bytes():
    # Generation-aware budget: v7x has 64 MiB/TC, v5e/v6e have 128 MiB.
    try:
        cap = pltpu.get_tpu_info().vmem_capacity_bytes
    except Exception:
        cap = 64 << 20          # conservative default (v7x)
    return int(cap * 0.45)      # headroom for double buffers / compiler scratch


def _mosaic_params(est_bytes, semantics):
    # Raise the scoped-VMEM limit past the 16/32 MiB defaults (v5e/v6e) while
    # staying <= v7x's 64 MiB physical VMEM.
    limit = int(min(max(2 * est_bytes, 32 << 20), 64 << 20))
    return pltpu.CompilerParams(dimension_semantics=semantics,
                                vmem_limit_bytes=limit)


def _const_spec(shape):
    """Grid-invariant operand: constant index_map + single buffering (no 2x VMEM)."""
    zero_map = lambda *_: (0,) * len(shape)
    try:
        return pl.BlockSpec(shape, zero_map, pipeline_mode=pl.Buffered(1))
    except Exception:                         # older jax without pipeline_mode
        return pl.BlockSpec(shape, zero_map)


def _ff_tile(dff):
    # Dff tile (trailing 'arbitrary' axis); bounds the live (tn, tff) f32 hidden
    # plus the W1/W2 tiles at production Dff.
    for t in (2048, 1024, 512, 256, 128):
        if dff % t == 0:
            return t
    return dff


def _row_tile(n, d, tff, budget):
    # Biggest row tile (multiple of 8 sublanes, divides n) whose per-row VMEM
    # (f32 hidden + f32 acc + bf16 in + out) fits the remaining budget.
    per_row = tff * 4 + d * 4 + 2 * (2 * d) + 2 * (d * 4)
    cap = max(8, budget // max(per_row, 1))
    for t in (1024, 512, 256, 128, 64, 32, 16, 8):
        if t <= cap and n % t == 0:
            return t
    return n


# ----------------------------------------------------------------------------
# In-kernel math (f32)
# ----------------------------------------------------------------------------

def _add_layernorm(x, y, g, b, eps):
    # LayerNorm(x + y); PyTorch LN: biased variance, eps=1e-5
    h = x + y
    mu = jnp.mean(h, axis=-1, keepdims=True)
    var = jnp.mean(jnp.square(h - mu), axis=-1, keepdims=True)
    return (h - mu) * jax.lax.rsqrt(var + eps) * g + b


def _mha_into(ctx_ref, q, k, v, keep_mask, num_heads):
    # q: (Sq, D) f32, k/v: (Sk, D) f32. Per-head attention; each head's context is
    # written straight into its lane slice of the (Sq, D) f32 VMEM scratch (no
    # lane-axis concatenate / relayout).  Softmax scale is pre-folded into Wq.
    Sq, D = q.shape
    Dh = D // num_heads
    for h in range(num_heads):                         # static, unrolled
        lo = h * Dh
        qh = q[:, lo:lo + Dh].astype(jnp.bfloat16)
        kh = k[:, lo:lo + Dh].astype(jnp.bfloat16)
        vh = v[:, lo:lo + Dh].astype(jnp.bfloat16)
        s = jax.lax.dot_general(qh, kh, (((1,), (1,)), ((), ())),
                                preferred_element_type=jnp.float32)
        if keep_mask is not None:
            s = jnp.where(keep_mask, s, jnp.float32(-1e9))   # == masked_fill(-1e9)
        m = jnp.max(s, axis=-1, keepdims=True)
        p = jnp.exp(s - m)
        p = p * pl.reciprocal(jnp.sum(p, axis=-1, keepdims=True),
                              approx=_APPROX_SOFTMAX_RECIP)
        ctx_ref[:, lo:lo + Dh] = jnp.dot(p.astype(jnp.bfloat16), vh,
                                         preferred_element_type=jnp.float32)


# ----------------------------------------------------------------------------
# Pallas kernels
# ----------------------------------------------------------------------------

def _self_attn_layer_kernel(x_ref, wqkv_ref, bqkv_ref, wo_ref, vecs_ref,
                            o_ref, ctx_ref, *, num_heads, eps):
    x = x_ref[0]                                            # (S, D) bf16
    S, D = x.shape
    qkv = jnp.dot(x, wqkv_ref[...],                         # fused QKV projection
                  preferred_element_type=jnp.float32) + bqkv_ref[...]
    q, k, v = qkv[:, :D], qkv[:, D:2 * D], qkv[:, 2 * D:]
    # Causal keep-mask generated in-kernel: no (S,S) f32 mask DMA / VMEM buffer.
    row = jax.lax.broadcasted_iota(jnp.int32, (S, S), 0)
    col = jax.lax.broadcasted_iota(jnp.int32, (S, S), 1)
    keep = col <= row
    _mha_into(ctx_ref, q, k, v, keep, num_heads)
    vecs = vecs_ref[...]                                    # [bo; ln_g; ln_b]
    out = jnp.dot(ctx_ref[...].astype(jnp.bfloat16), wo_ref[...],
                  preferred_element_type=jnp.float32) + vecs[0:1]
    o_ref[0] = _add_layernorm(x.astype(jnp.float32), out,
                              vecs[1:2], vecs[2:3], eps).astype(o_ref.dtype)


def _cross_attn_layer_kernel(x_ref, enc_ref, wq_ref, wkv_ref, bkv_ref, wo_ref,
                             vecs_ref, o_ref, ctx_ref, *, num_heads, eps):
    x = x_ref[0]                                            # (S,  D) bf16
    enc = enc_ref[0]                                        # (Se, D) bf16
    D = x.shape[-1]
    vecs = vecs_ref[...]                                    # [bq; bo; ln_g; ln_b]
    q = jnp.dot(x, wq_ref[...],
                preferred_element_type=jnp.float32) + vecs[0:1]
    kv = jnp.dot(enc, wkv_ref[...],                         # fused K/V projection
                 preferred_element_type=jnp.float32) + bkv_ref[...]
    k, v = kv[:, :D], kv[:, D:]
    _mha_into(ctx_ref, q, k, v, None, num_heads)            # no mask in cross-attn
    out = jnp.dot(ctx_ref[...].astype(jnp.bfloat16), wo_ref[...],
                  preferred_element_type=jnp.float32) + vecs[1:2]
    o_ref[0] = _add_layernorm(x.astype(jnp.float32), out,
                              vecs[2:3], vecs[3:4], eps).astype(o_ref.dtype)


def _ffn_ln_kernel(x_ref, w1_ref, b1_ref, w2_ref, vecs_ref, o_ref, acc_ref, *, eps):
    kf = pl.program_id(1)

    @pl.when(kf == 0)
    def _():
        acc_ref[...] = jnp.zeros_like(acc_ref)

    x = x_ref[...]                                          # (tn, D) bf16
    h = jnp.dot(x, w1_ref[...],                             # (tn, tff) f32
                preferred_element_type=jnp.float32) + b1_ref[...]
    h = jnp.maximum(h, 0.0)                                 # ReLU per Dff tile
    acc_ref[...] += jnp.dot(h.astype(jnp.bfloat16), w2_ref[...],
                            preferred_element_type=jnp.float32)

    @pl.when(kf == pl.num_programs(1) - 1)
    def _():
        vecs = vecs_ref[...]                                # [b2; ln_g; ln_b]
        y = acc_ref[...] + vecs[0:1]
        o_ref[...] = _add_layernorm(x.astype(jnp.float32), y,
                                    vecs[1:2], vecs[2:3], eps).astype(o_ref.dtype)


# ----------------------------------------------------------------------------
# pallas_call wrappers
# ----------------------------------------------------------------------------

def self_attn_block(x, p, num_heads, eps=1e-5):
    B, S, D = x.shape
    est = ((D * 3 * D + D * D) * 2 + 6 * D * 4              # bf16 weights + f32 vecs
           + 2 * 2 * S * D * 2                              # x/out blocks (bf16, 2-buf)
           + S * 3 * D * 4 + S * D * 4 + 2 * S * S * 4)     # qkv, ctx scratch, scores
    return pl.pallas_call(
        partial(_self_attn_layer_kernel, num_heads=num_heads, eps=eps),
        out_shape=jax.ShapeDtypeStruct((B, S, D), jnp.bfloat16),
        grid=(B,),
        in_specs=[
            pl.BlockSpec((1, S, D), lambda b: (b, 0, 0)),   # x (also the residual)
            _const_spec((D, 3 * D)),                        # Wqkv (bf16), single-buffered
            _const_spec((1, 3 * D)),                        # bqkv
            _const_spec((D, D)),                            # Wo (bf16)
            _const_spec((3, D)),                            # [bo, ln1_g, ln1_b]
        ],
        out_specs=pl.BlockSpec((1, S, D), lambda b: (b, 0, 0)),
        scratch_shapes=[pltpu.VMEM((S, D), jnp.float32)],   # merged-head context slab
        compiler_params=_mosaic_params(est, ("parallel",)),
    )(x, p["wqkv"], p["bqkv"], p["wo"], p["vecs"])


def cross_attn_block(x, enc, p, num_heads, eps=1e-5):
    B, S, D = x.shape
    Se = enc.shape[1]
    est = ((D * D + D * 2 * D + D * D) * 2 + (2 * D + 4 * D) * 4
           + 2 * 2 * (S + Se) * D * 2
           + (S * D + Se * 2 * D) * 4 + S * D * 4 + 2 * S * Se * 4)
    return pl.pallas_call(
        partial(_cross_attn_layer_kernel, num_heads=num_heads, eps=eps),
        out_shape=jax.ShapeDtypeStruct((B, S, D), jnp.bfloat16),
        grid=(B,),
        in_specs=[
            pl.BlockSpec((1, S, D), lambda b: (b, 0, 0)),   # x (also the residual)
            pl.BlockSpec((1, Se, D), lambda b: (b, 0, 0)),  # encoder output (bf16)
            _const_spec((D, D)),                            # Wq
            _const_spec((D, 2 * D)),                        # Wkv (fused K/V)
            _const_spec((1, 2 * D)),                        # bkv
            _const_spec((D, D)),                            # Wo
            _const_spec((4, D)),                            # [bq, bo, ln2_g, ln2_b]
        ],
        out_specs=pl.BlockSpec((1, S, D), lambda b: (b, 0, 0)),
        scratch_shapes=[pltpu.VMEM((S, D), jnp.float32)],
        compiler_params=_mosaic_params(est, ("parallel",)),
    )(x, enc, p["wq"], p["wkv"], p["bkv"], p["wo"], p["vecs"])


def ffn_ln_block(x2d, p, out_dtype=jnp.bfloat16, eps=1e-5):
    N, D = x2d.shape
    Dff = p["w1"].shape[1]
    tff = _ff_tile(Dff)
    budget = _vmem_budget_bytes()
    weight_bytes = 2 * (D * tff + tff * D) * 2 + 2 * tff * 4 + 3 * D * 4
    tn = _row_tile(N, D, tff, max(budget - weight_bytes, 1 << 20))
    est = weight_bytes + tn * (tff * 4 + D * 4 + 2 * (2 * D) + 2 * (D * 4))
    return pl.pallas_call(
        partial(_ffn_ln_kernel, eps=eps),
        out_shape=jax.ShapeDtypeStruct((N, D), out_dtype),
        grid=(N // tn, Dff // tff),                          # rows parallel, Dff reduce
        in_specs=[
            pl.BlockSpec((tn, D), lambda i, k: (i, 0)),      # token-row tile (bf16)
            pl.BlockSpec((D, tff), lambda i, k: (0, k)),     # W1 column tile (bf16)
            pl.BlockSpec((1, tff), lambda i, k: (0, k)),     # b1 tile
            pl.BlockSpec((tff, D), lambda i, k: (k, 0)),     # W2 row tile (bf16)
            _const_spec((3, D)),                             # [b2, ln3_g, ln3_b]
        ],
        out_specs=pl.BlockSpec((tn, D), lambda i, k: (i, 0)),
        scratch_shapes=[pltpu.VMEM((tn, D), jnp.float32)],   # y accumulator
        compiler_params=_mosaic_params(est, ("parallel", "arbitrary")),
    )(x2d, p["w1"], p["b1"], p["w2"], p["vecs"])


# ----------------------------------------------------------------------------
# Model glue
# ----------------------------------------------------------------------------

def transformer_decoder(tokens, encoder_output, tgt_mask, params, num_heads):
    B, S = tokens.shape
    # TODO(synk): embedding row-gather stays in plain XLA (no rectangular BlockSpec
    # for a vocab gather); sqrt(d_model) is folded into the table at init.
    x = params["embedding"][tokens] + params["pe"][None, :S, :]
    x = x.astype(jnp.bfloat16)                     # bf16 inter-kernel activations
    enc = encoder_output.astype(jnp.bfloat16)
    # tgt_mask is the standard causal (lower-triangular) mask; it is regenerated
    # in-kernel from iota to avoid DMA'ing an (S,S) f32 tensor per grid step.
    # TODO(synk): support arbitrary (non-causal) tgt_mask via an additive-mask block.
    del tgt_mask
    n_layers = len(params["layers"])
    for li, p in enumerate(params["layers"]):
        x = self_attn_block(x, p["self"], num_heads)
        x = cross_attn_block(x, enc, p["cross"], num_heads)
        D = x.shape[-1]
        out_dt = jnp.float32 if li == n_layers - 1 else jnp.bfloat16
        x = ffn_ln_block(x.reshape(B * S, D), p["ffn"],
                         out_dtype=out_dt).reshape(B, S, D)
    return x


# ----------------------------------------------------------------------------
# Deterministic parameter construction
# ----------------------------------------------------------------------------

def make_pe_table(max_len, d_model):
    pos = jnp.arange(max_len, dtype=jnp.float32)[:, None]
    div = jnp.exp(jnp.arange(0, d_model, 2, dtype=jnp.float32)
                  * (-math.log(10000.0) / d_model))
    pe = jnp.zeros((max_len, d_model), jnp.float32)
    pe = pe.at[:, 0::2].set(jnp.sin(pos * div))
    pe = pe.at[:, 1::2].set(jnp.cos(pos * div))
    return pe


def init_params(key, vocab_size, d_model, num_layers, num_heads, d_ff, max_seq_len):
    dh = d_model // num_heads
    q_scale = 1.0 / math.sqrt(dh)

    def dense(k, din, dout):
        w = 0.02 * jax.random.normal(k, (din, dout), jnp.float32)
        return w, jnp.zeros((1, dout), jnp.float32)

    keys = jax.random.split(key, 1 + num_layers)
    params = {
        # sqrt(d_model) embedding scale folded into the table at init
        "embedding": (0.02 * math.sqrt(d_model))
                     * jax.random.normal(keys[0], (vocab_size, d_model), jnp.float32),
        "pe": make_pe_table(max_seq_len, d_model),
        "layers": [],
    }
    ones = jnp.ones((1, d_model), jnp.float32)
    zeros = jnp.zeros((1, d_model), jnp.float32)
    for li in range(num_layers):
        lk = jax.random.split(keys[1 + li], 7)
        wqkv, bqkv = dense(lk[0], d_model, 3 * d_model)
        # fold softmax scale 1/sqrt(Dh) into the Q projection (weights AND bias)
        wqkv = wqkv.at[:, :d_model].multiply(q_scale)
        bqkv = bqkv.at[:, :d_model].multiply(q_scale)
        wo_s, bo_s = dense(lk[1], d_model, d_model)
        wq_c, bq_c = dense(lk[2], d_model, d_model)
        wq_c, bq_c = wq_c * q_scale, bq_c * q_scale
        wkv_c, bkv_c = dense(lk[3], d_model, 2 * d_model)
        wo_c, bo_c = dense(lk[4], d_model, d_model)
        w1, b1 = dense(lk[5], d_model, d_ff)
        w2, b2 = dense(lk[6], d_ff, d_model)
        params["layers"].append({
            "self": {
                "wqkv": wqkv.astype(jnp.bfloat16), "bqkv": bqkv,
                "wo": wo_s.astype(jnp.bfloat16),
                "vecs": jnp.concatenate([bo_s, ones, zeros], axis=0),       # (3, D)
            },
            "cross": {
                "wq": wq_c.astype(jnp.bfloat16),
                "wkv": wkv_c.astype(jnp.bfloat16), "bkv": bkv_c,
                "wo": wo_c.astype(jnp.bfloat16),
                "vecs": jnp.concatenate([bq_c, bo_c, ones, zeros], axis=0), # (4, D)
            },
            "ffn": {
                "w1": w1.astype(jnp.bfloat16), "b1": b1,
                "w2": w2.astype(jnp.bfloat16),
                "vecs": jnp.concatenate([b2, ones, zeros], axis=0),         # (3, D)
            },
        })
    return params


# ----------------------------------------------------------------------------
# Demo
# ----------------------------------------------------------------------------

if __name__ == "__main__":
    # d_model / d_ff chosen as multiples of 128 so every kernel store is lane-dense.
    vocab_size, d_model, num_layers, num_heads = 50, 128, 2, 4
    d_ff, max_seq_len = 256, 16
    B, S = 2, 8

    key = jax.random.PRNGKey(0)
    k_par, k_tok, k_enc = jax.random.split(key, 3)

    params = init_params(k_par, vocab_size, d_model, num_layers, num_heads,
                         d_ff, max_seq_len)
    tokens = jax.random.randint(k_tok, (B, S), 0, vocab_size)               # x
    encoder_output = jax.random.normal(k_enc, (B, S, d_model), jnp.float32)
    tgt_mask = jnp.tril(jnp.ones((S, S), jnp.float32))                      # causal mask

    fwd = jax.jit(partial(transformer_decoder, num_heads=num_heads))
    out = fwd(tokens, encoder_output, tgt_mask, params)
    jax.block_until_ready(out)

    assert out.shape == (B, S, d_model) and out.dtype == jnp.float32
    assert bool(jnp.all(jnp.isfinite(out)))
    print("KERNEL_OK")
</pallas_src>

<mosaic_0001>
module attributes {stable_mosaic.version = 11 : i64} {
  func.func @_cross_attn_layer_kernel(%arg0: i32, %arg1: memref<1x8x128xbf16, #tpu.memory_space<vmem>>, %arg2: memref<1x8x128xbf16, #tpu.memory_space<vmem>>, %arg3: memref<128x128xbf16, #tpu.memory_space<vmem>>, %arg4: memref<128x256xbf16, #tpu.memory_space<vmem>>, %arg5: memref<1x256xf32, #tpu.memory_space<vmem>>, %arg6: memref<128x128xbf16, #tpu.memory_space<vmem>>, %arg7: memref<4x128xf32, #tpu.memory_space<vmem>>, %arg8: memref<1x8x128xbf16, #tpu.memory_space<vmem>>, %arg9: memref<8x128xf32, #tpu.memory_space<vmem>>) attributes {dimension_semantics = [#tpu.dimension_semantics<parallel>], iteration_bounds = array<i64: 2>, scalar_prefetch = 0 : i64, scratch_operands = 1 : i64, tpu.core_type = #tpu.core_type<tc>, window_params = [{transform_indices = @transform_0, window_bounds = array<i64: 1, 8, 128>}, {transform_indices = @transform_1, window_bounds = array<i64: 1, 8, 128>}, {pipeline_mode = #tpu.pipeline_mode<synchronous>, transform_indices = @transform_2, window_bounds = array<i64: 128, 128>}, {pipeline_mode = #tpu.pipeline_mode<synchronous>, transform_indices = @transform_3, window_bounds = array<i64: 128, 256>}, {pipeline_mode = #tpu.pipeline_mode<synchronous>, transform_indices = @transform_4, window_bounds = array<i64: 1, 256>}, {pipeline_mode = #tpu.pipeline_mode<synchronous>, transform_indices = @transform_5, window_bounds = array<i64: 128, 128>}, {pipeline_mode = #tpu.pipeline_mode<synchronous>, transform_indices = @transform_6, window_bounds = array<i64: 4, 128>}, {transform_indices = @transform_7, window_bounds = array<i64: 1, 8, 128>}]} {
    %c0 = arith.constant 0 : index
    %c0_0 = arith.constant 0 : index
    %c0_1 = arith.constant 0 : index
    %0 = vector.load %arg1[%c0, %c0_0, %c0_1] : memref<1x8x128xbf16, #tpu.memory_space<vmem>>, vector<1x8x128xbf16>
    %1 = vector.shape_cast %0 : vector<1x8x128xbf16> to vector<8x128xbf16>
    %c0_2 = arith.constant 0 : index
    %c0_3 = arith.constant 0 : index
    %c0_4 = arith.constant 0 : index
    %2 = vector.load %arg2[%c0_2, %c0_3, %c0_4] : memref<1x8x128xbf16, #tpu.memory_space<vmem>>, vector<1x8x128xbf16>
    %3 = vector.shape_cast %2 : vector<1x8x128xbf16> to vector<8x128xbf16>
    %c0_5 = arith.constant 0 : index
    %c0_6 = arith.constant 0 : index
    %4 = vector.load %arg7[%c0_5, %c0_6] : memref<4x128xf32, #tpu.memory_space<vmem>>, vector<4x128xf32>
    %c0_7 = arith.constant 0 : index
    %c0_8 = arith.constant 0 : index
    %5 = vector.load %arg3[%c0_7, %c0_8] : memref<128x128xbf16, #tpu.memory_space<vmem>>, vector<128x128xbf16>
    %cst = arith.constant dense<0.000000e+00> : vector<8x128xf32>
    %6 = tpu.matmul %1, %5, %cst {dimension_numbers = #tpu.dot_dimension_numbers<[1], [0], [0], [1], [0, 0, 1, 1], [], []>} : vector<8x128xbf16>, vector<128x128xbf16>, vector<8x128xf32> -> vector<8x128xf32>
    %7 = vector.extract_strided_slice %4 {offsets = [0, 0], sizes = [1, 128], strides = [1, 1]} : vector<4x128xf32> to vector<1x128xf32>
    %8 = vector.broadcast %7 : vector<1x128xf32> to vector<8x128xf32>
    %9 = arith.addf %6, %8 : vector<8x128xf32>
    %c0_9 = arith.constant 0 : index
    %c0_10 = arith.constant 0 : index
    %10 = vector.load %arg4[%c0_9, %c0_10] : memref<128x256xbf16, #tpu.memory_space<vmem>>, vector<128x256xbf16>
    %cst_11 = arith.constant dense<0.000000e+00> : vector<8x256xf32>
    %11 = tpu.matmul %3, %10, %cst_11 {dimension_numbers = #tpu.dot_dimension_numbers<[1], [0], [0], [1], [0, 0, 1, 1], [], []>} : vector<8x128xbf16>, vector<128x256xbf16>, vector<8x256xf32> -> vector<8x256xf32>
    %c0_12 = arith.constant 0 : index
    %c0_13 = arith.constant 0 : index
    %12 = vector.load %arg5[%c0_12, %c0_13] : memref<1x256xf32, #tpu.memory_space<vmem>>, vector<1x256xf32>
    %13 = vector.broadcast %12 : vector<1x256xf32> to vector<8x256xf32>
    %14 = arith.addf %11, %13 : vector<8x256xf32>
    %15 = vector.extract_strided_slice %14 {offsets = [0, 0], sizes = [8, 128], strides = [1, 1]} : vector<8x256xf32> to vector<8x128xf32>
    %16 = vector.extract_strided_slice %14 {offsets = [0, 128], sizes = [8, 128], strides = [1, 1]} : vector<8x256xf32> to vector<8x128xf32>
    %17 = vector.extract_strided_slice %9 {offsets = [0, 0], sizes = [8, 32], strides = [1, 1]} : vector<8x128xf32> to vector<8x32xf32>
    %18 = arith.truncf %17 : vector<8x32xf32> to vector<8x32xbf16>
    %19 = vector.extract_strided_slice %15 {offsets = [0, 0], sizes = [8, 32], strides = [1, 1]} : vector<8x128xf32> to vector<8x32xf32>
    %20 = arith.truncf %19 : vector<8x32xf32> to vector<8x32xbf16>
    %21 = vector.extract_strided_slice %16 {offsets = [0, 0], sizes = [8, 32], strides = [1, 1]} : vector<8x128xf32> to vector<8x32xf32>
    %22 = arith.truncf %21 : vector<8x32xf32> to vector<8x32xbf16>
    %cst_14 = arith.constant dense<0.000000e+00> : vector<8x8xf32>
    %23 = tpu.matmul %18, %20, %cst_14 {dimension_numbers = #tpu.dot_dimension_numbers<[1], [1], [0], [0], [0, 0, 1, 0], [], []>} : vector<8x32xbf16>, vector<8x32xbf16>, vector<8x8xf32> -> vector<8x8xf32>
    %cst_15 = arith.constant dense<0xFF800000> : vector<8xf32>
    %24 = vector.multi_reduction <maximumf>, %23, %cst_15 [1] : vector<8x8xf32> to vector<8xf32>
    %25 = vector.shape_cast %24 : vector<8xf32> to vector<8x1xf32>
    %26 = vector.broadcast %25 : vector<8x1xf32> to vector<8x8xf32>
    %27 = arith.subf %23, %26 : vector<8x8xf32>
    %28 = math.exp %27 : vector<8x8xf32>
    %cst_16 = arith.constant dense<0.000000e+00> : vector<8xf32>
    %29 = vector.multi_reduction <add>, %28, %cst_16 [1] : vector<8x8xf32> to vector<8xf32>
    %30 = vector.shape_cast %29 : vector<8xf32> to vector<8x1xf32>
    %31 = tpu.reciprocal %30 {approx = true} : vector<8x1xf32> -> vector<8x1xf32>
    %32 = vector.broadcast %31 : vector<8x1xf32> to vector<8x8xf32>
    %33 = arith.mulf %28, %32 : vector<8x8xf32>
    %34 = arith.truncf %33 : vector<8x8xf32> to vector<8x8xbf16>
    %cst_17 = arith.constant dense<0.000000e+00> : vector<8x32xf32>
    %35 = tpu.matmul %34, %22, %cst_17 {dimension_numbers = #tpu.dot_dimension_numbers<[1], [0], [0], [1], [0, 0, 1, 1], [], []>} : vector<8x8xbf16>, vector<8x32xbf16>, vector<8x32xf32> -> vector<8x32xf32>
    %c0_18 = arith.constant 0 : index
    %c0_19 = arith.constant 0 : index
    %36 = vector.load %arg9[%c0_18, %c0_19] : memref<8x128xf32, #tpu.memory_space<vmem>>, vector<8x32xf32>
    tpu.vector_store %arg9[%c0_18, %c0_19], %35 {strides = array<i32>} : memref<8x128xf32, #tpu.memory_space<vmem>>, vector<8x32xf32>,
    %37 = vector.extract_strided_slice %9 {offsets = [0, 32], sizes = [8, 32], strides = [1, 1]} : vector<8x128xf32> to vector<8x32xf32>
    %38 = arith.truncf %37 : vector<8x32xf32> to vector<8x32xbf16>
    %39 = vector.extract_strided_slice %15 {offsets = [0, 32], sizes = [8, 32], strides = [1, 1]} : vector<8x128xf32> to vector<8x32xf32>
    %40 = arith.truncf %39 : vector<8x32xf32> to vector<8x32xbf16>
    %41 = vector.extract_strided_slice %16 {offsets = [0, 32], sizes = [8, 32], strides = [1, 1]} : vector<8x128xf32> to vector<8x32xf32>
    %42 = arith.truncf %41 : vector<8x32xf32> to vector<8x32xbf16>
    %cst_20 = arith.constant dense<0.000000e+00> : vector<8x8xf32>
    %43 = tpu.matmul %38, %40, %cst_20 {dimension_numbers = #tpu.dot_dimension_numbers<[1], [1], [0], [0], [0, 0, 1, 0], [], []>} : vector<8x32xbf16>, vector<8x32xbf16>, vector<8x8xf32> -> vector<8x8xf32>
    %cst_21 = arith.constant dense<0xFF800000> : vector<8xf32>
    %44 = vector.multi_reduction <maximumf>, %43, %cst_21 [1] : vector<8x8xf32> to vector<8xf32>
    %45 = vector.shape_cast %44 : vector<8xf32> to vector<8x1xf32>
    %46 = vector.broadcast %45 : vector<8x1xf32> to vector<8x8xf32>
    %47 = arith.subf %43, %46 : vector<8x8xf32>
    %48 = math.exp %47 : vector<8x8xf32>
    %cst_22 = arith.constant dense<0.000000e+00> : vector<8xf32>
    %49 = vector.multi_reduction <add>, %48, %cst_22 [1] : vector<8x8xf32> to vector<8xf32>
    %50 = vector.shape_cast %49 : vector<8xf32> to vector<8x1xf32>
    %51 = tpu.reciprocal %50 {approx = true} : vector<8x1xf32> -> vector<8x1xf32>
    %52 = vector.broadcast %51 : vector<8x1xf32> to vector<8x8xf32>
    %53 = arith.mulf %48, %52 : vector<8x8xf32>
    %54 = arith.truncf %53 : vector<8x8xf32> to vector<8x8xbf16>
    %cst_23 = arith.constant dense<0.000000e+00> : vector<8x32xf32>
    %55 = tpu.matmul %54, %42, %cst_23 {dimension_numbers = #tpu.dot_dimension_numbers<[1], [0], [0], [1], [0, 0, 1, 1], [], []>} : vector<8x8xbf16>, vector<8x32xbf16>, vector<8x32xf32> -> vector<8x32xf32>
    %c0_24 = arith.constant 0 : index
    %c32 = arith.constant 32 : index
    %56 = vector.load %arg9[%c0_24, %c32] : memref<8x128xf32, #tpu.memory_space<vmem>>, vector<8x32xf32>
    tpu.vector_store %arg9[%c0_24, %c32], %55 {strides = array<i32>} : memref<8x128xf32, #tpu.memory_space<vmem>>, vector<8x32xf32>,
    %57 = vector.extract_strided_slice %9 {offsets = [0, 64], sizes = [8, 32], strides = [1, 1]} : vector<8x128xf32> to vector<8x32xf32>
    %58 = arith.truncf %57 : vector<8x32xf32> to vector<8x32xbf16>
    %59 = vector.extract_strided_slice %15 {offsets = [0, 64], sizes = [8, 32], strides = [1, 1]} : vector<8x128xf32> to vector<8x32xf32>
    %60 = arith.truncf %59 : vector<8x32xf32> to vector<8x32xbf16>
    %61 = vector.extract_strided_slice %16 {offsets = [0, 64], sizes = [8, 32], strides = [1, 1]} : vector<8x128xf32> to vector<8x32xf32>
    %62 = arith.truncf %61 : vector<8x32xf32> to vector<8x32xbf16>
    %cst_25 = arith.constant dense<0.000000e+00> : vector<8x8xf32>
    %63 = tpu.matmul %58, %60, %cst_25 {dimension_numbers = #tpu.dot_dimension_numbers<[1], [1], [0], [0], [0, 0, 1, 0], [], []>} : vector<8x32xbf16>, vector<8x32xbf16>, vector<8x8xf32> -> vector<8x8xf32>
    %cst_26 = arith.constant dense<0xFF800000> : vector<8xf32>
    %64 = vector.multi_reduction <maximumf>, %63, %cst_26 [1] : vector<8x8xf32> to vector<8xf32>
    %65 = vector.shape_cast %64 : vector<8xf32> to vector<8x1xf32>
    %66 = vector.broadcast %65 : vector<8x1xf32> to vector<8x8xf32>
    %67 = arith.subf %63, %66 : vector<8x8xf32>
    %68 = math.exp %67 : vector<8x8xf32>
    %cst_27 = arith.constant dense<0.000000e+00> : vector<8xf32>
    %69 = vector.multi_reduction <add>, %68, %cst_27 [1] : vector<8x8xf32> to vector<8xf32>
    %70 = vector.shape_cast %69 : vector<8xf32> to vector<8x1xf32>
    %71 = tpu.reciprocal %70 {approx = true} : vector<8x1xf32> -> vector<8x1xf32>
    %72 = vector.broadcast %71 : vector<8x1xf32> to vector<8x8xf32>
    %73 = arith.mulf %68, %72 : vector<8x8xf32>
    %74 = arith.truncf %73 : vector<8x8xf32> to vector<8x8xbf16>
    %cst_28 = arith.constant dense<0.000000e+00> : vector<8x32xf32>
    %75 = tpu.matmul %74, %62, %cst_28 {dimension_numbers = #tpu.dot_dimension_numbers<[1], [0], [0], [1], [0, 0, 1, 1], [], []>} : vector<8x8xbf16>, vector<8x32xbf16>, vector<8x32xf32> -> vector<8x32xf32>
    %c0_29 = arith.constant 0 : index
    %c64 = arith.constant 64 : index
    %76 = vector.load %arg9[%c0_29, %c64] : memref<8x128xf32, #tpu.memory_space<vmem>>, vector<8x32xf32>
    tpu.vector_store %arg9[%c0_29, %c64], %75 {strides = array<i32>} : memref<8x128xf32, #tpu.memory_space<vmem>>, vector<8x32xf32>,
    %77 = vector.extract_strided_slice %9 {offsets = [0, 96], sizes = [8, 32], strides = [1, 1]} : vector<8x128xf32> to vector<8x32xf32>
    %78 = arith.truncf %77 : vector<8x32xf32> to vector<8x32xbf16>
    %79 = vector.extract_strided_slice %15 {offsets = [0, 96], sizes = [8, 32], strides = [1, 1]} : vector<8x128xf32> to vector<8x32xf32>
    %80 = arith.truncf %79 : vector<8x32xf32> to vector<8x32xbf16>
    %81 = vector.extract_strided_slice %16 {offsets = [0, 96], sizes = [8, 32], strides = [1, 1]} : vector<8x128xf32> to vector<8x32xf32>
    %82 = arith.truncf %81 : vector<8x32xf32> to vector<8x32xbf16>
    %cst_30 = arith.constant dense<0.000000e+00> : vector<8x8xf32>
    %83 = tpu.matmul %78, %80, %cst_30 {dimension_numbers = #tpu.dot_dimension_numbers<[1], [1], [0], [0], [0, 0, 1, 0], [], []>} : vector<8x32xbf16>, vector<8x32xbf16>, vector<8x8xf32> -> vector<8x8xf32>
    %cst_31 = arith.constant dense<0xFF800000> : vector<8xf32>
    %84 = vector.multi_reduction <maximumf>, %83, %cst_31 [1] : vector<8x8xf32> to vector<8xf32>
    %85 = vector.shape_cast %84 : vector<8xf32> to vector<8x1xf32>
    %86 = vector.broadcast %85 : vector<8x1xf32> to vector<8x8xf32>
    %87 = arith.subf %83, %86 : vector<8x8xf32>
    %88 = math.exp %87 : vector<8x8xf32>
    %cst_32 = arith.constant dense<0.000000e+00> : vector<8xf32>
    %89 = vector.multi_reduction <add>, %88, %cst_32 [1] : vector<8x8xf32> to vector<8xf32>
    %90 = vector.shape_cast %89 : vector<8xf32> to vector<8x1xf32>
    %91 = tpu.reciprocal %90 {approx = true} : vector<8x1xf32> -> vector<8x1xf32>
    %92 = vector.broadcast %91 : vector<8x1xf32> to vector<8x8xf32>
    %93 = arith.mulf %88, %92 : vector<8x8xf32>
    %94 = arith.truncf %93 : vector<8x8xf32> to vector<8x8xbf16>
    %cst_33 = arith.constant dense<0.000000e+00> : vector<8x32xf32>
    %95 = tpu.matmul %94, %82, %cst_33 {dimension_numbers = #tpu.dot_dimension_numbers<[1], [0], [0], [1], [0, 0, 1, 1], [], []>} : vector<8x8xbf16>, vector<8x32xbf16>, vector<8x32xf32> -> vector<8x32xf32>
    %c0_34 = arith.constant 0 : index
    %c96 = arith.constant 96 : index
    %96 = vector.load %arg9[%c0_34, %c96] : memref<8x128xf32, #tpu.memory_space<vmem>>, vector<8x32xf32>
    tpu.vector_store %arg9[%c0_34, %c96], %95 {strides = array<i32>} : memref<8x128xf32, #tpu.memory_space<vmem>>, vector<8x32xf32>,
    %c0_35 = arith.constant 0 : index
    %c0_36 = arith.constant 0 : index
    %97 = vector.load %arg9[%c0_35, %c0_36] : memref<8x128xf32, #tpu.memory_space<vmem>>, vector<8x128xf32>
    %98 = arith.truncf %97 : vector<8x128xf32> to vector<8x128xbf16>
    %c0_37 = arith.constant 0 : index
    %c0_38 = arith.constant 0 : index
    %99 = vector.load %arg6[%c0_37, %c0_38] : memref<128x128xbf16, #tpu.memory_space<vmem>>, vector<128x128xbf16>
    %cst_39 = arith.constant dense<0.000000e+00> : vector<8x128xf32>
    %100 = tpu.matmul %98, %99, %cst_39 {dimension_numbers = #tpu.dot_dimension_numbers<[1], [0], [0], [1], [0, 0, 1, 1], [], []>} : vector<8x128xbf16>, vector<128x128xbf16>, vector<8x128xf32> -> vector<8x128xf32>
    %101 = vector.extract_strided_slice %4 {offsets = [1, 0], sizes = [1, 128], strides = [1, 1]} : vector<4x128xf32> to vector<1x128xf32>
    %102 = vector.broadcast %101 : vector<1x128xf32> to vector<8x128xf32>
    %103 = arith.addf %100, %102 : vector<8x128xf32>
    %104 = arith.extf %1 : vector<8x128xbf16> to vector<8x128xf32>
    %105 = vector.extract_strided_slice %4 {offsets = [2, 0], sizes = [1, 128], strides = [1, 1]} : vector<4x128xf32> to vector<1x128xf32>
    %106 = vector.extract_strided_slice %4 {offsets = [3, 0], sizes = [1, 128], strides = [1, 1]} : vector<4x128xf32> to vector<1x128xf32>
    %107 = arith.addf %104, %103 : vector<8x128xf32>
    %cst_40 = arith.constant dense<0.000000e+00> : vector<8xf32>
    %108 = vector.multi_reduction <add>, %107, %cst_40 [1] : vector<8x128xf32> to vector<8xf32>
    %109 = vector.shape_cast %108 : vector<8xf32> to vector<8x1xf32>
    %cst_41 = arith.constant 1.280000e+02 : f32
    %110 = vector.broadcast %cst_41 : f32 to vector<8x1xf32>
    %111 = arith.divf %109, %110 : vector<8x1xf32>
    %112 = vector.broadcast %111 : vector<8x1xf32> to vector<8x128xf32>
    %113 = arith.subf %107, %112 : vector<8x128xf32>
    %114 = arith.mulf %113, %113 : vector<8x128xf32>
    %cst_42 = arith.constant dense<0.000000e+00> : vector<8xf32>
    %115 = vector.multi_reduction <add>, %114, %cst_42 [1] : vector<8x128xf32> to vector<8xf32>
    %116 = vector.shape_cast %115 : vector<8xf32> to vector<8x1xf32>
    %cst_43 = arith.constant 1.280000e+02 : f32
    %117 = vector.broadcast %cst_43 : f32 to vector<8x1xf32>
    %118 = arith.divf %116, %117 : vector<8x1xf32>
    %119 = vector.broadcast %111 : vector<8x1xf32> to vector<8x128xf32>
    %120 = arith.subf %107, %119 : vector<8x128xf32>
    %cst_44 = arith.constant 9.99999974E-6 : f32
    %121 = vector.broadcast %cst_44 : f32 to vector<8x1xf32>
    %122 = arith.addf %118, %121 : vector<8x1xf32>
    %123 = math.rsqrt %122 : vector<8x1xf32>
    %124 = vector.broadcast %123 : vector<8x1xf32> to vector<8x128xf32>
    %125 = arith.mulf %120, %124 : vector<8x128xf32>
    %126 = vector.broadcast %105 : vector<1x128xf32> to vector<8x128xf32>
    %127 = arith.mulf %125, %126 : vector<8x128xf32>
    %128 = vector.broadcast %106 : vector<1x128xf32> to vector<8x128xf32>
    %129 = arith.addf %127, %128 : vector<8x128xf32>
    %130 = arith.truncf %129 : vector<8x128xf32> to vector<8x128xbf16>
    %c0_45 = arith.constant 0 : index
    %c0_46 = arith.constant 0 : index
    %c0_47 = arith.constant 0 : index
    %131 = vector.load %arg8[%c0_45, %c0_46, %c0_47] : memref<1x8x128xbf16, #tpu.memory_space<vmem>>, vector<1x8x128xbf16>
    %132 = vector.shape_cast %131 : vector<1x8x128xbf16> to vector<8x128xbf16>
    %133 = vector.shape_cast %130 : vector<8x128xbf16> to vector<1x8x128xbf16>
    tpu.vector_store %arg8[%c0_45, %c0_46, %c0_47], %133 {strides = array<i32>} : memref<1x8x128xbf16, #tpu.memory_space<vmem>>, vector<1x8x128xbf16>,
    return
  }
  func.func @transform_0(%arg0: i32) -> (i32, i32, i32) {
    %c0_i32 = arith.constant 0 : i32
    %c0_i32_0 = arith.constant 0 : i32
    %c0_i32_1 = arith.constant 0 : i32
    return %arg0, %c0_i32, %c0_i32_0 : i32, i32, i32
  }
  func.func @transform_1(%arg0: i32) -> (i32, i32, i32) {
    %c0_i32 = arith.constant 0 : i32
    %c0_i32_0 = arith.constant 0 : i32
    %c0_i32_1 = arith.constant 0 : i32
    return %arg0, %c0_i32, %c0_i32_0 : i32, i32, i32
  }
  func.func @transform_2(%arg0: i32) -> (i32, i32) {
    %c0_i32 = arith.constant 0 : i32
    %c0_i32_0 = arith.constant 0 : i32
    %c0_i32_1 = arith.constant 0 : i32
    return %c0_i32, %c0_i32_0 : i32, i32
  }
  func.func @transform_3(%arg0: i32) -> (i32, i32) {
    %c0_i32 = arith.constant 0 : i32
    %c0_i32_0 = arith.constant 0 : i32
    %c0_i32_1 = arith.constant 0 : i32
    return %c0_i32, %c0_i32_0 : i32, i32
  }
  func.func @transform_4(%arg0: i32) -> (i32, i32) {
    %c0_i32 = arith.constant 0 : i32
    %c0_i32_0 = arith.constant 0 : i32
    %c0_i32_1 = arith.constant 0 : i32
    return %c0_i32, %c0_i32_0 : i32, i32
  }
  func.func @transform_5(%arg0: i32) -> (i32, i32) {
    %c0_i32 = arith.constant 0 : i32
    %c0_i32_0 = arith.constant 0 : i32
    %c0_i32_1 = arith.constant 0 : i32
    return %c0_i32, %c0_i32_0 : i32, i32
  }
  func.func @transform_6(%arg0: i32) -> (i32, i32) {
    %c0_i32 = arith.constant 0 : i32
    %c0_i32_0 = arith.constant 0 : i32
    %c0_i32_1 = arith.constant 0 : i32
    return %c0_i32, %c0_i32_0 : i32, i32
  }
  func.func @transform_7(%arg0: i32) -> (i32, i32, i32) {
    %c0_i32 = arith.constant 0 : i32
    %c0_i32_0 = arith.constant 0 : i32
    %c0_i32_1 = arith.constant 0 : i32
    return %arg0, %c0_i32, %c0_i32_0 : i32, i32, i32
  }
}

module attributes {stable_mosaic.version = 11 : i64} {
  func.func @_ffn_ln_kernel(%arg0: i32, %arg1: i32, %arg2: memref<16x128xbf16, #tpu.memory_space<vmem>>, %arg3: memref<128x256xbf16, #tpu.memory_space<vmem>>, %arg4: memref<1x256xf32, #tpu.memory_space<vmem>>, %arg5: memref<256x128xbf16, #tpu.memory_space<vmem>>, %arg6: memref<3x128xf32, #tpu.memory_space<vmem>>, %arg7: memref<16x128xbf16, #tpu.memory_space<vmem>>, %arg8: memref<16x128xf32, #tpu.memory_space<vmem>>) attributes {dimension_semantics = [#tpu.dimension_semantics<parallel>, #tpu.dimension_semantics<arbitrary>], iteration_bounds = array<i64: 1, 1>, scalar_prefetch = 0 : i64, scratch_operands = 1 : i64, tpu.core_type = #tpu.core_type<tc>, window_params = [{transform_indices = @transform_0, window_bounds = array<i64: 16, 128>}, {transform_indices = @transform_1, window_bounds = array<i64: 128, 256>}, {transform_indices = @transform_2, window_bounds = array<i64: 1, 256>}, {transform_indices = @transform_3, window_bounds = array<i64: 256, 128>}, {pipeline_mode = #tpu.pipeline_mode<synchronous>, transform_indices = @transform_4, window_bounds = array<i64: 3, 128>}, {transform_indices = @transform_5, window_bounds = array<i64: 16, 128>}]} {
    %c0_i32 = arith.constant 0 : i32
    %0 = arith.cmpi eq, %arg1, %c0_i32 : i32
    %1 = arith.extui %0 : i1 to i32
    %c0_i32_0 = arith.constant 0 : i32
    %2 = arith.cmpi ne, %1, %c0_i32_0 : i32
    scf.if %2 {
      %cst_16 = arith.constant 0.000000e+00 : f32
      %20 = vector.broadcast %cst_16 : f32 to vector<16x128xf32>
      %c0_17 = arith.constant 0 : index
      %c0_18 = arith.constant 0 : index
      %21 = vector.load %arg8[%c0_17, %c0_18] : memref<16x128xf32, #tpu.memory_space<vmem>>, vector<16x128xf32>
      tpu.vector_store %arg8[%c0_17, %c0_18], %20 {strides = array<i32>} : memref<16x128xf32, #tpu.memory_space<vmem>>, vector<16x128xf32>,
    } else {
    }
    %c0 = arith.constant 0 : index
    %c0_1 = arith.constant 0 : index
    %3 = vector.load %arg2[%c0, %c0_1] : memref<16x128xbf16, #tpu.memory_space<vmem>>, vector<16x128xbf16>
    %c0_2 = arith.constant 0 : index
    %c0_3 = arith.constant 0 : index
    %4 = vector.load %arg3[%c0_2, %c0_3] : memref<128x256xbf16, #tpu.memory_space<vmem>>, vector<128x256xbf16>
    %cst = arith.constant dense<0.000000e+00> : vector<16x256xf32>
    %5 = tpu.matmul %3, %4, %cst {dimension_numbers = #tpu.dot_dimension_numbers<[1], [0], [0], [1], [0, 0, 1, 1], [], []>} : vector<16x128xbf16>, vector<128x256xbf16>, vector<16x256xf32> -> vector<16x256xf32>
    %c0_4 = arith.constant 0 : index
    %c0_5 = arith.constant 0 : index
    %6 = vector.load %arg4[%c0_4, %c0_5] : memref<1x256xf32, #tpu.memory_space<vmem>>, vector<1x256xf32>
    %7 = vector.broadcast %6 : vector<1x256xf32> to vector<16x256xf32>
    %8 = arith.addf %5, %7 : vector<16x256xf32>
    %cst_6 = arith.constant 0.000000e+00 : f32
    %9 = vector.broadcast %cst_6 : f32 to vector<16x256xf32>
    %10 = arith.maximumf %8, %9 : vector<16x256xf32>
    %c0_7 = arith.constant 0 : index
    %c0_8 = arith.constant 0 : index
    %11 = vector.load %arg8[%c0_7, %c0_8] : memref<16x128xf32, #tpu.memory_space<vmem>>, vector<16x128xf32>
    %12 = arith.truncf %10 : vector<16x256xf32> to vector<16x256xbf16>
    %c0_9 = arith.constant 0 : index
    %c0_10 = arith.constant 0 : index
    %13 = vector.load %arg5[%c0_9, %c0_10] : memref<256x128xbf16, #tpu.memory_space<vmem>>, vector<256x128xbf16>
    %cst_11 = arith.constant dense<0.000000e+00> : vector<16x128xf32>
    %14 = tpu.matmul %12, %13, %cst_11 {dimension_numbers = #tpu.dot_dimension_numbers<[1], [0], [0], [1], [0, 0, 1, 1], [], []>} : vector<16x256xbf16>, vector<256x128xbf16>, vector<16x128xf32> -> vector<16x128xf32>
    %15 = arith.addf %11, %14 : vector<16x128xf32>
    %c0_12 = arith.constant 0 : index
    %c0_13 = arith.constant 0 : index
    %16 = vector.load %arg8[%c0_12, %c0_13] : memref<16x128xf32, #tpu.memory_space<vmem>>, vector<16x128xf32>
    tpu.vector_store %arg8[%c0_12, %c0_13], %15 {strides = array<i32>} : memref<16x128xf32, #tpu.memory_space<vmem>>, vector<16x128xf32>,
    %c0_i32_14 = arith.constant 0 : i32
    %17 = arith.cmpi eq, %arg1, %c0_i32_14 : i32
    %18 = arith.extui %17 : i1 to i32
    %c0_i32_15 = arith.constant 0 : i32
    %19 = arith.cmpi ne, %18, %c0_i32_15 : i32
    scf.if %19 {
      %c0_16 = arith.constant 0 : index
      %c0_17 = arith.constant 0 : index
      %20 = vector.load %arg6[%c0_16, %c0_17] : memref<3x128xf32, #tpu.memory_space<vmem>>, vector<3x128xf32>
      %c0_18 = arith.constant 0 : index
      %c0_19 = arith.constant 0 : index
      %21 = vector.load %arg8[%c0_18, %c0_19] : memref<16x128xf32, #tpu.memory_space<vmem>>, vector<16x128xf32>
      %22 = vector.extract_strided_slice %20 {offsets = [0, 0], sizes = [1, 128], strides = [1, 1]} : vector<3x128xf32> to vector<1x128xf32>
      %23 = vector.broadcast %22 : vector<1x128xf32> to vector<16x128xf32>
      %24 = arith.addf %21, %23 : vector<16x128xf32>
      %25 = arith.extf %3 : vector<16x128xbf16> to vector<16x128xf32>
      %26 = vector.extract_strided_slice %20 {offsets = [1, 0], sizes = [1, 128], strides = [1, 1]} : vector<3x128xf32> to vector<1x128xf32>
      %27 = vector.extract_strided_slice %20 {offsets = [2, 0], sizes = [1, 128], strides = [1, 1]} : vector<3x128xf32> to vector<1x128xf32>
      %28 = arith.addf %25, %24 : vector<16x128xf32>
      %cst_20 = arith.constant dense<0.000000e+00> : vector<16xf32>
      %29 = vector.multi_reduction <add>, %28, %cst_20 [1] : vector<16x128xf32> to vector<16xf32>
      %30 = vector.shape_cast %29 : vector<16xf32> to vector<16x1xf32>
      %cst_21 = arith.constant 1.280000e+02 : f32
      %31 = vector.broadcast %cst_21 : f32 to vector<16x1xf32>
      %32 = arith.divf %30, %31 : vector<16x1xf32>
      %33 = vector.broadcast %32 : vector<16x1xf32> to vector<16x128xf32>
      %34 = arith.subf %28, %33 : vector<16x128xf32>
      %35 = arith.mulf %34, %34 : vector<16x128xf32>
      %cst_22 = arith.constant dense<0.000000e+00> : vector<16xf32>
      %36 = vector.multi_reduction <add>, %35, %cst_22 [1] : vector<16x128xf32> to vector<16xf32>
      %37 = vector.shape_cast %36 : vector<16xf32> to vector<16x1xf32>
      %cst_23 = arith.constant 1.280000e+02 : f32
      %38 = vector.broadcast %cst_23 : f32 to vector<16x1xf32>
      %39 = arith.divf %37, %38 : vector<16x1xf32>
      %40 = vector.broadcast %32 : vector<16x1xf32> to vector<16x128xf32>
      %41 = arith.subf %28, %40 : vector<16x128xf32>
      %cst_24 = arith.constant 9.99999974E-6 : f32
      %42 = vector.broadcast %cst_24 : f32 to vector<16x1xf32>
      %43 = arith.addf %39, %42 : vector<16x1xf32>
      %44 = math.rsqrt %43 : vector<16x1xf32>
      %45 = vector.broadcast %44 : vector<16x1xf32> to vector<16x128xf32>
      %46 = arith.mulf %41, %45 : vector<16x128xf32>
      %47 = vector.broadcast %26 : vector<1x128xf32> to vector<16x128xf32>
      %48 = arith.mulf %46, %47 : vector<16x128xf32>
      %49 = vector.broadcast %27 : vector<1x128xf32> to vector<16x128xf32>
      %50 = arith.addf %48, %49 : vector<16x128xf32>
      %51 = arith.truncf %50 : vector<16x128xf32> to vector<16x128xbf16>
      %c0_25 = arith.constant 0 : index
      %c0_26 = arith.constant 0 : index
      %52 = vector.load %arg7[%c0_25, %c0_26] : memref<16x128xbf16, #tpu.memory_space<vmem>>, vector<16x128xbf16>
      tpu.vector_store %arg7[%c0_25, %c0_26], %51 {strides = array<i32>} : memref<16x128xbf16, #tpu.memory_space<vmem>>, vector<16x128xbf16>,
    } else {
    }
    return
  }
  func.func @transform_0(%arg0: i32, %arg1: i32) -> (i32, i32) {
    %c0_i32 = arith.constant 0 : i32
    %c0_i32_0 = arith.constant 0 : i32
    return %arg0, %c0_i32 : i32, i32
  }
  func.func @transform_1(%arg0: i32, %arg1: i32) -> (i32, i32) {
    %c0_i32 = arith.constant 0 : i32
    %c0_i32_0 = arith.constant 0 : i32
    return %c0_i32, %arg1 : i32, i32
  }
  func.func @transform_2(%arg0: i32, %arg1: i32) -> (i32, i32) {
    %c0_i32 = arith.constant 0 : i32
    %c0_i32_0 = arith.constant 0 : i32
    return %c0_i32, %arg1 : i32, i32
  }
  func.func @transform_3(%arg0: i32, %arg1: i32) -> (i32, i32) {
    %c0_i32 = arith.constant 0 : i32
    %c0_i32_0 = arith.constant 0 : i32
    return %arg1, %c0_i32 : i32, i32
  }
  func.func @transform_4(%arg0: i32, %arg1: i32) -> (i32, i32) {
    %c0_i32 = arith.constant 0 : i32
    %c0_i32_0 = arith.constant 0 : i32
    %c0_i32_1 = arith.constant 0 : i32
    return %c0_i32, %c0_i32_0 : i32, i32
  }
  func.func @transform_5(%arg0: i32, %arg1: i32) -> (i32, i32) {
    %c0_i32 = arith.constant 0 : i32
    %c0_i32_0 = arith.constant 0 : i32
    return %arg0, %c0_i32 : i32, i32
  }
}

module attributes {stable_mosaic.version = 11 : i64} {
  func.func @_self_attn_layer_kernel(%arg0: i32, %arg1: memref<1x8x128xbf16, #tpu.memory_space<vmem>>, %arg2: memref<128x384xbf16, #tpu.memory_space<vmem>>, %arg3: memref<1x384xf32, #tpu.memory_space<vmem>>, %arg4: memref<128x128xbf16, #tpu.memory_space<vmem>>, %arg5: memref<3x128xf32, #tpu.memory_space<vmem>>, %arg6: memref<1x8x128xbf16, #tpu.memory_space<vmem>>, %arg7: memref<8x128xf32, #tpu.memory_space<vmem>>) attributes {dimension_semantics = [#tpu.dimension_semantics<parallel>], iteration_bounds = array<i64: 2>, scalar_prefetch = 0 : i64, scratch_operands = 1 : i64, tpu.core_type = #tpu.core_type<tc>, window_params = [{transform_indices = @transform_0, window_bounds = array<i64: 1, 8, 128>}, {pipeline_mode = #tpu.pipeline_mode<synchronous>, transform_indices = @transform_1, window_bounds = array<i64: 128, 384>}, {pipeline_mode = #tpu.pipeline_mode<synchronous>, transform_indices = @transform_2, window_bounds = array<i64: 1, 384>}, {pipeline_mode = #tpu.pipeline_mode<synchronous>, transform_indices = @transform_3, window_bounds = array<i64: 128, 128>}, {pipeline_mode = #tpu.pipeline_mode<synchronous>, transform_indices = @transform_4, window_bounds = array<i64: 3, 128>}, {transform_indices = @transform_5, window_bounds = array<i64: 1, 8, 128>}]} {
    %c0 = arith.constant 0 : index
    %c0_0 = arith.constant 0 : index
    %c0_1 = arith.constant 0 : index
    %0 = vector.load %arg1[%c0, %c0_0, %c0_1] : memref<1x8x128xbf16, #tpu.memory_space<vmem>>, vector<1x8x128xbf16>
    %1 = vector.shape_cast %0 : vector<1x8x128xbf16> to vector<8x128xbf16>
    %c0_2 = arith.constant 0 : index
    %c0_3 = arith.constant 0 : index
    %2 = vector.load %arg2[%c0_2, %c0_3] : memref<128x384xbf16, #tpu.memory_space<vmem>>, vector<128x384xbf16>
    %cst = arith.constant dense<0.000000e+00> : vector<8x384xf32>
    %3 = tpu.matmul %1, %2, %cst {dimension_numbers = #tpu.dot_dimension_numbers<[1], [0], [0], [1], [0, 0, 1, 1], [], []>} : vector<8x128xbf16>, vector<128x384xbf16>, vector<8x384xf32> -> vector<8x384xf32>
    %c0_4 = arith.constant 0 : index
    %c0_5 = arith.constant 0 : index
    %4 = vector.load %arg3[%c0_4, %c0_5] : memref<1x384xf32, #tpu.memory_space<vmem>>, vector<1x384xf32>
    %5 = vector.broadcast %4 : vector<1x384xf32> to vector<8x384xf32>
    %6 = arith.addf %3, %5 : vector<8x384xf32>
    %7 = vector.extract_strided_slice %6 {offsets = [0, 0], sizes = [8, 128], strides = [1, 1]} : vector<8x384xf32> to vector<8x128xf32>
    %8 = vector.extract_strided_slice %6 {offsets = [0, 128], sizes = [8, 128], strides = [1, 1]} : vector<8x384xf32> to vector<8x128xf32>
    %9 = vector.extract_strided_slice %6 {offsets = [0, 256], sizes = [8, 128], strides = [1, 1]} : vector<8x384xf32> to vector<8x128xf32>
    %10 = tpu.iota {dimensions = array<i32: 0>} : vector<8x8xi32>
    %11 = tpu.iota {dimensions = array<i32: 1>} : vector<8x8xi32>
    %12 = arith.cmpi sle, %11, %10 : vector<8x8xi32>
    %13 = vector.extract_strided_slice %7 {offsets = [0, 0], sizes = [8, 32], strides = [1, 1]} : vector<8x128xf32> to vector<8x32xf32>
    %14 = arith.truncf %13 : vector<8x32xf32> to vector<8x32xbf16>
    %15 = vector.extract_strided_slice %8 {offsets = [0, 0], sizes = [8, 32], strides = [1, 1]} : vector<8x128xf32> to vector<8x32xf32>
    %16 = arith.truncf %15 : vector<8x32xf32> to vector<8x32xbf16>
    %17 = vector.extract_strided_slice %9 {offsets = [0, 0], sizes = [8, 32], strides = [1, 1]} : vector<8x128xf32> to vector<8x32xf32>
    %18 = arith.truncf %17 : vector<8x32xf32> to vector<8x32xbf16>
    %cst_6 = arith.constant dense<0.000000e+00> : vector<8x8xf32>
    %19 = tpu.matmul %14, %16, %cst_6 {dimension_numbers = #tpu.dot_dimension_numbers<[1], [1], [0], [0], [0, 0, 1, 0], [], []>} : vector<8x32xbf16>, vector<8x32xbf16>, vector<8x8xf32> -> vector<8x8xf32>
    %cst_7 = arith.constant -1.000000e+09 : f32
    %20 = vector.broadcast %cst_7 : f32 to vector<8x8xf32>
    %21 = arith.select %12, %19, %20 : vector<8x8xi1>, vector<8x8xf32>
    %cst_8 = arith.constant dense<0xFF800000> : vector<8xf32>
    %22 = vector.multi_reduction <maximumf>, %21, %cst_8 [1] : vector<8x8xf32> to vector<8xf32>
    %23 = vector.shape_cast %22 : vector<8xf32> to vector<8x1xf32>
    %24 = vector.broadcast %23 : vector<8x1xf32> to vector<8x8xf32>
    %25 = arith.subf %21, %24 : vector<8x8xf32>
    %26 = math.exp %25 : vector<8x8xf32>
    %cst_9 = arith.constant dense<0.000000e+00> : vector<8xf32>
    %27 = vector.multi_reduction <add>, %26, %cst_9 [1] : vector<8x8xf32> to vector<8xf32>
    %28 = vector.shape_cast %27 : vector<8xf32> to vector<8x1xf32>
    %29 = tpu.reciprocal %28 {approx = true} : vector<8x1xf32> -> vector<8x1xf32>
    %30 = vector.broadcast %29 : vector<8x1xf32> to vector<8x8xf32>
    %31 = arith.mulf %26, %30 : vector<8x8xf32>
    %32 = arith.truncf %31 : vector<8x8xf32> to vector<8x8xbf16>
    %cst_10 = arith.constant dense<0.000000e+00> : vector<8x32xf32>
    %33 = tpu.matmul %32, %18, %cst_10 {dimension_numbers = #tpu.dot_dimension_numbers<[1], [0], [0], [1], [0, 0, 1, 1], [], []>} : vector<8x8xbf16>, vector<8x32xbf16>, vector<8x32xf32> -> vector<8x32xf32>
    %c0_11 = arith.constant 0 : index
    %c0_12 = arith.constant 0 : index
    %34 = vector.load %arg7[%c0_11, %c0_12] : memref<8x128xf32, #tpu.memory_space<vmem>>, vector<8x32xf32>
    tpu.vector_store %arg7[%c0_11, %c0_12], %33 {strides = array<i32>} : memref<8x128xf32, #tpu.memory_space<vmem>>, vector<8x32xf32>,
    %35 = vector.extract_strided_slice %7 {offsets = [0, 32], sizes = [8, 32], strides = [1, 1]} : vector<8x128xf32> to vector<8x32xf32>
    %36 = arith.truncf %35 : vector<8x32xf32> to vector<8x32xbf16>
    %37 = vector.extract_strided_slice %8 {offsets = [0, 32], sizes = [8, 32], strides = [1, 1]} : vector<8x128xf32> to vector<8x32xf32>
    %38 = arith.truncf %37 : vector<8x32xf32> to vector<8x32xbf16>
    %39 = vector.extract_strided_slice %9 {offsets = [0, 32], sizes = [8, 32], strides = [1, 1]} : vector<8x128xf32> to vector<8x32xf32>
    %40 = arith.truncf %39 : vector<8x32xf32> to vector<8x32xbf16>
    %cst_13 = arith.constant dense<0.000000e+00> : vector<8x8xf32>
    %41 = tpu.matmul %36, %38, %cst_13 {dimension_numbers = #tpu.dot_dimension_numbers<[1], [1], [0], [0], [0, 0, 1, 0], [], []>} : vector<8x32xbf16>, vector<8x32xbf16>, vector<8x8xf32> -> vector<8x8xf32>
    %cst_14 = arith.constant -1.000000e+09 : f32
    %42 = vector.broadcast %cst_14 : f32 to vector<8x8xf32>
    %43 = arith.select %12, %41, %42 : vector<8x8xi1>, vector<8x8xf32>
    %cst_15 = arith.constant dense<0xFF800000> : vector<8xf32>
    %44 = vector.multi_reduction <maximumf>, %43, %cst_15 [1] : vector<8x8xf32> to vector<8xf32>
    %45 = vector.shape_cast %44 : vector<8xf32> to vector<8x1xf32>
    %46 = vector.broadcast %45 : vector<8x1xf32> to vector<8x8xf32>
    %47 = arith.subf %43, %46 : vector<8x8xf32>
    %48 = math.exp %47 : vector<8x8xf32>
    %cst_16 = arith.constant dense<0.000000e+00> : vector<8xf32>
    %49 = vector.multi_reduction <add>, %48, %cst_16 [1] : vector<8x8xf32> to vector<8xf32>
    %50 = vector.shape_cast %49 : vector<8xf32> to vector<8x1xf32>
    %51 = tpu.reciprocal %50 {approx = true} : vector<8x1xf32> -> vector<8x1xf32>
    %52 = vector.broadcast %51 : vector<8x1xf32> to vector<8x8xf32>
    %53 = arith.mulf %48, %52 : vector<8x8xf32>
    %54 = arith.truncf %53 : vector<8x8xf32> to vector<8x8xbf16>
    %cst_17 = arith.constant dense<0.000000e+00> : vector<8x32xf32>
    %55 = tpu.matmul %54, %40, %cst_17 {dimension_numbers = #tpu.dot_dimension_numbers<[1], [0], [0], [1], [0, 0, 1, 1], [], []>} : vector<8x8xbf16>, vector<8x32xbf16>, vector<8x32xf32> -> vector<8x32xf32>
    %c0_18 = arith.constant 0 : index
    %c32 = arith.constant 32 : index
    %56 = vector.load %arg7[%c0_18, %c32] : memref<8x128xf32, #tpu.memory_space<vmem>>, vector<8x32xf32>
    tpu.vector_store %arg7[%c0_18, %c32], %55 {strides = array<i32>} : memref<8x128xf32, #tpu.memory_space<vmem>>, vector<8x32xf32>,
    %57 = vector.extract_strided_slice %7 {offsets = [0, 64], sizes = [8, 32], strides = [1, 1]} : vector<8x128xf32> to vector<8x32xf32>
    %58 = arith.truncf %57 : vector<8x32xf32> to vector<8x32xbf16>
    %59 = vector.extract_strided_slice %8 {offsets = [0, 64], sizes = [8, 32], strides = [1, 1]} : vector<8x128xf32> to vector<8x32xf32>
    %60 = arith.truncf %59 : vector<8x32xf32> to vector<8x32xbf16>
    %61 = vector.extract_strided_slice %9 {offsets = [0, 64], sizes = [8, 32], strides = [1, 1]} : vector<8x128xf32> to vector<8x32xf32>
    %62 = arith.truncf %61 : vector<8x32xf32> to vector<8x32xbf16>
    %cst_19 = arith.constant dense<0.000000e+00> : vector<8x8xf32>
    %63 = tpu.matmul %58, %60, %cst_19 {dimension_numbers = #tpu.dot_dimension_numbers<[1], [1], [0], [0], [0, 0, 1, 0], [], []>} : vector<8x32xbf16>, vector<8x32xbf16>, vector<8x8xf32> -> vector<8x8xf32>
    %cst_20 = arith.constant -1.000000e+09 : f32
    %64 = vector.broadcast %cst_20 : f32 to vector<8x8xf32>
    %65 = arith.select %12, %63, %64 : vector<8x8xi1>, vector<8x8xf32>
    %cst_21 = arith.constant dense<0xFF800000> : vector<8xf32>
    %66 = vector.multi_reduction <maximumf>, %65, %cst_21 [1] : vector<8x8xf32> to vector<8xf32>
    %67 = vector.shape_cast %66 : vector<8xf32> to vector<8x1xf32>
    %68 = vector.broadcast %67 : vector<8x1xf32> to vector<8x8xf32>
    %69 = arith.subf %65, %68 : vector<8x8xf32>
    %70 = math.exp %69 : vector<8x8xf32>
    %cst_22 = arith.constant dense<0.000000e+00> : vector<8xf32>
    %71 = vector.multi_reduction <add>, %70, %cst_22 [1] : vector<8x8xf32> to vector<8xf32>
    %72 = vector.shape_cast %71 : vector<8xf32> to vector<8x1xf32>
    %73 = tpu.reciprocal %72 {approx = true} : vector<8x1xf32> -> vector<8x1xf32>
    %74 = vector.broadcast %73 : vector<8x1xf32> to vector<8x8xf32>
    %75 = arith.mulf %70, %74 : vector<8x8xf32>
    %76 = arith.truncf %75 : vector<8x8xf32> to vector<8x8xbf16>
    %cst_23 = arith.constant dense<0.000000e+00> : vector<8x32xf32>
    %77 = tpu.matmul %76, %62, %cst_23 {dimension_numbers = #tpu.dot_dimension_numbers<[1], [0], [0], [1], [0, 0, 1, 1], [], []>} : vector<8x8xbf16>, vector<8x32xbf16>, vector<8x32xf32> -> vector<8x32xf32>
    %c0_24 = arith.constant 0 : index
    %c64 = arith.constant 64 : index
    %78 = vector.load %arg7[%c0_24, %c64] : memref<8x128xf32, #tpu.memory_space<vmem>>, vector<8x32xf32>
    tpu.vector_store %arg7[%c0_24, %c64], %77 {strides = array<i32>} : memref<8x128xf32, #tpu.memory_space<vmem>>, vector<8x32xf32>,
    %79 = vector.extract_strided_slice %7 {offsets = [0, 96], sizes = [8, 32], strides = [1, 1]} : vector<8x128xf32> to vector<8x32xf32>
    %80 = arith.truncf %79 : vector<8x32xf32> to vector<8x32xbf16>
    %81 = vector.extract_strided_slice %8 {offsets = [0, 96], sizes = [8, 32], strides = [1, 1]} : vector<8x128xf32> to vector<8x32xf32>
    %82 = arith.truncf %81 : vector<8x32xf32> to vector<8x32xbf16>
    %83 = vector.extract_strided_slice %9 {offsets = [0, 96], sizes = [8, 32], strides = [1, 1]} : vector<8x128xf32> to vector<8x32xf32>
    %84 = arith.truncf %83 : vector<8x32xf32> to vector<8x32xbf16>
    %cst_25 = arith.constant dense<0.000000e+00> : vector<8x8xf32>
    %85 = tpu.matmul %80, %82, %cst_25 {dimension_numbers = #tpu.dot_dimension_numbers<[1], [1], [0], [0], [0, 0, 1, 0], [], []>} : vector<8x32xbf16>, vector<8x32xbf16>, vector<8x8xf32> -> vector<8x8xf32>
    %cst_26 = arith.constant -1.000000e+09 : f32
    %86 = vector.broadcast %cst_26 : f32 to vector<8x8xf32>
    %87 = arith.select %12, %85, %86 : vector<8x8xi1>, vector<8x8xf32>
    %cst_27 = arith.constant dense<0xFF800000> : vector<8xf32>
    %88 = vector.multi_reduction <maximumf>, %87, %cst_27 [1] : vector<8x8xf32> to vector<8xf32>
    %89 = vector.shape_cast %88 : vector<8xf32> to vector<8x1xf32>
    %90 = vector.broadcast %89 : vector<8x1xf32> to vector<8x8xf32>
    %91 = arith.subf %87, %90 : vector<8x8xf32>
    %92 = math.exp %91 : vector<8x8xf32>
    %cst_28 = arith.constant dense<0.000000e+00> : vector<8xf32>
    %93 = vector.multi_reduction <add>, %92, %cst_28 [1] : vector<8x8xf32> to vector<8xf32>
    %94 = vector.shape_cast %93 : vector<8xf32> to vector<8x1xf32>
    %95 = tpu.reciprocal %94 {approx = true} : vector<8x1xf32> -> vector<8x1xf32>
    %96 = vector.broadcast %95 : vector<8x1xf32> to vector<8x8xf32>
    %97 = arith.mulf %92, %96 : vector<8x8xf32>
    %98 = arith.truncf %97 : vector<8x8xf32> to vector<8x8xbf16>
    %cst_29 = arith.constant dense<0.000000e+00> : vector<8x32xf32>
    %99 = tpu.matmul %98, %84, %cst_29 {dimension_numbers = #tpu.dot_dimension_numbers<[1], [0], [0], [1], [0, 0, 1, 1], [], []>} : vector<8x8xbf16>, vector<8x32xbf16>, vector<8x32xf32> -> vector<8x32xf32>
    %c0_30 = arith.constant 0 : index
    %c96 = arith.constant 96 : index
    %100 = vector.load %arg7[%c0_30, %c96] : memref<8x128xf32, #tpu.memory_space<vmem>>, vector<8x32xf32>
    tpu.vector_store %arg7[%c0_30, %c96], %99 {strides = array<i32>} : memref<8x128xf32, #tpu.memory_space<vmem>>, vector<8x32xf32>,
    %c0_31 = arith.constant 0 : index
    %c0_32 = arith.constant 0 : index
    %101 = vector.load %arg5[%c0_31, %c0_32] : memref<3x128xf32, #tpu.memory_space<vmem>>, vector<3x128xf32>
    %c0_33 = arith.constant 0 : index
    %c0_34 = arith.constant 0 : index
    %102 = vector.load %arg7[%c0_33, %c0_34] : memref<8x128xf32, #tpu.memory_space<vmem>>, vector<8x128xf32>
    %103 = arith.truncf %102 : vector<8x128xf32> to vector<8x128xbf16>
    %c0_35 = arith.constant 0 : index
    %c0_36 = arith.constant 0 : index
    %104 = vector.load %arg4[%c0_35, %c0_36] : memref<128x128xbf16, #tpu.memory_space<vmem>>, vector<128x128xbf16>
    %cst_37 = arith.constant dense<0.000000e+00> : vector<8x128xf32>
    %105 = tpu.matmul %103, %104, %cst_37 {dimension_numbers = #tpu.dot_dimension_numbers<[1], [0], [0], [1], [0, 0, 1, 1], [], []>} : vector<8x128xbf16>, vector<128x128xbf16>, vector<8x128xf32> -> vector<8x128xf32>
    %106 = vector.extract_strided_slice %101 {offsets = [0, 0], sizes = [1, 128], strides = [1, 1]} : vector<3x128xf32> to vector<1x128xf32>
    %107 = vector.broadcast %106 : vector<1x128xf32> to vector<8x128xf32>
    %108 = arith.addf %105, %107 : vector<8x128xf32>
    %109 = arith.extf %1 : vector<8x128xbf16> to vector<8x128xf32>
    %110 = vector.extract_strided_slice %101 {offsets = [1, 0], sizes = [1, 128], strides = [1, 1]} : vector<3x128xf32> to vector<1x128xf32>
    %111 = vector.extract_strided_slice %101 {offsets = [2, 0], sizes = [1, 128], strides = [1, 1]} : vector<3x128xf32> to vector<1x128xf32>
    %112 = arith.addf %109, %108 : vector<8x128xf32>
    %cst_38 = arith.constant dense<0.000000e+00> : vector<8xf32>
    %113 = vector.multi_reduction <add>, %112, %cst_38 [1] : vector<8x128xf32> to vector<8xf32>
    %114 = vector.shape_cast %113 : vector<8xf32> to vector<8x1xf32>
    %cst_39 = arith.constant 1.280000e+02 : f32
    %115 = vector.broadcast %cst_39 : f32 to vector<8x1xf32>
    %116 = arith.divf %114, %115 : vector<8x1xf32>
    %117 = vector.broadcast %116 : vector<8x1xf32> to vector<8x128xf32>
    %118 = arith.subf %112, %117 : vector<8x128xf32>
    %119 = arith.mulf %118, %118 : vector<8x128xf32>
    %cst_40 = arith.constant dense<0.000000e+00> : vector<8xf32>
    %120 = vector.multi_reduction <add>, %119, %cst_40 [1] : vector<8x128xf32> to vector<8xf32>
    %121 = vector.shape_cast %120 : vector<8xf32> to vector<8x1xf32>
    %cst_41 = arith.constant 1.280000e+02 : f32
    %122 = vector.broadcast %cst_41 : f32 to vector<8x1xf32>
    %123 = arith.divf %121, %122 : vector<8x1xf32>
    %124 = vector.broadcast %116 : vector<8x1xf32> to vector<8x128xf32>
    %125 = arith.subf %112, %124 : vector<8x128xf32>
    %cst_42 = arith.constant 9.99999974E-6 : f32
    %126 = vector.broadcast %cst_42 : f32 to vector<8x1xf32>
    %127 = arith.addf %123, %126 : vector<8x1xf32>
    %128 = math.rsqrt %127 : vector<8x1xf32>
    %129 = vector.broadcast %128 : vector<8x1xf32> to vector<8x128xf32>
    %130 = arith.mulf %125, %129 : vector<8x128xf32>
    %131 = vector.broadcast %110 : vector<1x128xf32> to vector<8x128xf32>
    %132 = arith.mulf %130, %131 : vector<8x128xf32>
    %133 = vector.broadcast %111 : vector<1x128xf32> to vector<8x128xf32>
    %134 = arith.addf %132, %133 : vector<8x128xf32>
    %135 = arith.truncf %134 : vector<8x128xf32> to vector<8x128xbf16>
    %c0_43 = arith.constant 0 : index
    %c0_44 = arith.constant 0 : index
    %c0_45 = arith.constant 0 : index
    %136 = vector.load %arg6[%c0_43, %c0_44, %c0_45] : memref<1x8x128xbf16, #tpu.memory_space<vmem>>, vector<1x8x128xbf16>
    %137 = vector.shape_cast %136 : vector<1x8x128xbf16> to vector<8x128xbf16>
    %138 = vector.shape_cast %135 : vector<8x128xbf16> to vector<1x8x128xbf16>
    tpu.vector_store %arg6[%c0_43, %c0_44, %c0_45], %138 {strides = array<i32>} : memref<1x8x128xbf16, #tpu.memory_space<vmem>>, vector<1x8x128xbf16>,
    return
  }
  func.func @transform_0(%arg0: i32) -> (i32, i32, i32) {
    %c0_i32 = arith.constant 0 : i32
    %c0_i32_0 = arith.constant 0 : i32
    %c0_i32_1 = arith.constant 0 : i32
    return %arg0, %c0_i32, %c0_i32_0 : i32, i32, i32
  }
  func.func @transform_1(%arg0: i32) -> (i32, i32) {
    %c0_i32 = arith.constant 0 : i32
    %c0_i32_0 = arith.constant 0 : i32
    %c0_i32_1 = arith.constant 0 : i32
    return %c0_i32, %c0_i32_0 : i32, i32
  }
  func.func @transform_2(%arg0: i32) -> (i32, i32) {
    %c0_i32 = arith.constant 0 : i32
    %c0_i32_0 = arith.constant 0 : i32
    %c0_i32_1 = arith.constant 0 : i32
    return %c0_i32, %c0_i32_0 : i32, i32
  }
  func.func @transform_3(%arg0: i32) -> (i32, i32) {
    %c0_i32 = arith.constant 0 : i32
    %c0_i32_0 = arith.constant 0 : i32
    %c0_i32_1 = arith.constant 0 : i32
    return %c0_i32, %c0_i32_0 : i32, i32
  }
  func.func @transform_4(%arg0: i32) -> (i32, i32) {
    %c0_i32 = arith.constant 0 : i32
    %c0_i32_0 = arith.constant 0 : i32
    %c0_i32_1 = arith.constant 0 : i32
    return %c0_i32, %c0_i32_0 : i32, i32
  }
  func.func @transform_5(%arg0: i32) -> (i32, i32, i32) {
    %c0_i32 = arith.constant 0 : i32
    %c0_i32_0 = arith.constant 0 : i32
    %c0_i32_1 = arith.constant 0 : i32
    return %arg0, %c0_i32, %c0_i32_0 : i32, i32, i32
  }
}

module attributes {stable_mosaic.version = 11 : i64} {
  func.func @_cross_attn_layer_kernel(%arg0: i32, %arg1: memref<1x8x128xbf16, #tpu.memory_space<vmem>>, %arg2: memref<1x8x128xbf16, #tpu.memory_space<vmem>>, %arg3: memref<128x128xbf16, #tpu.memory_space<vmem>>, %arg4: memref<128x256xbf16, #tpu.memory_space<vmem>>, %arg5: memref<1x256xf32, #tpu.memory_space<vmem>>, %arg6: memref<128x128xbf16, #tpu.memory_space<vmem>>, %arg7: memref<4x128xf32, #tpu.memory_space<vmem>>, %arg8: memref<1x8x128xbf16, #tpu.memory_space<vmem>>, %arg9: memref<8x128xf32, #tpu.memory_space<vmem>>) attributes {dimension_semantics = [#tpu.dimension_semantics<parallel>], iteration_bounds = array<i64: 2>, scalar_prefetch = 0 : i64, scratch_operands = 1 : i64, tpu.core_type = #tpu.core_type<tc>, window_params = [{transform_indices = @transform_0, window_bounds = array<i64: 1, 8, 128>}, {transform_indices = @transform_1, window_bounds = array<i64: 1, 8, 128>}, {pipeline_mode = #tpu.pipeline_mode<synchronous>, transform_indices = @transform_2, window_bounds = array<i64: 128, 128>}, {pipeline_mode = #tpu.pipeline_mode<synchronous>, transform_indices = @transform_3, window_bounds = array<i64: 128, 256>}, {pipeline_mode = #tpu.pipeline_mode<synchronous>, transform_indices = @transform_4, window_bounds = array<i64: 1, 256>}, {pipeline_mode = #tpu.pipeline_mode<synchronous>, transform_indices = @transform_5, window_bounds = array<i64: 128, 128>}, {pipeline_mode = #tpu.pipeline_mode<synchronous>, transform_indices = @transform_6, window_bounds = array<i64: 4, 128>}, {transform_indices = @transform_7, window_bounds = array<i64: 1, 8, 128>}]} {
    %c0 = arith.constant 0 : index
    %c0_0 = arith.constant 0 : index
    %c0_1 = arith.constant 0 : index
    %0 = vector.load %arg1[%c0, %c0_0, %c0_1] : memref<1x8x128xbf16, #tpu.memory_space<vmem>>, vector<1x8x128xbf16>
    %1 = vector.shape_cast %0 : vector<1x8x128xbf16> to vector<8x128xbf16>
    %c0_2 = arith.constant 0 : index
    %c0_3 = arith.constant 0 : index
    %c0_4 = arith.constant 0 : index
    %2 = vector.load %arg2[%c0_2, %c0_3, %c0_4] : memref<1x8x128xbf16, #tpu.memory_space<vmem>>, vector<1x8x128xbf16>
    %3 = vector.shape_cast %2 : vector<1x8x128xbf16> to vector<8x128xbf16>
    %c0_5 = arith.constant 0 : index
    %c0_6 = arith.constant 0 : index
    %4 = vector.load %arg7[%c0_5, %c0_6] : memref<4x128xf32, #tpu.memory_space<vmem>>, vector<4x128xf32>
    %c0_7 = arith.constant 0 : index
    %c0_8 = arith.constant 0 : index
    %5 = vector.load %arg3[%c0_7, %c0_8] : memref<128x128xbf16, #tpu.memory_space<vmem>>, vector<128x128xbf16>
    %cst = arith.constant dense<0.000000e+00> : vector<8x128xf32>
    %6 = tpu.matmul %1, %5, %cst {dimension_numbers = #tpu.dot_dimension_numbers<[1], [0], [0], [1], [0, 0, 1, 1], [], []>} : vector<8x128xbf16>, vector<128x128xbf16>, vector<8x128xf32> -> vector<8x128xf32>
    %7 = vector.extract_strided_slice %4 {offsets = [0, 0], sizes = [1, 128], strides = [1, 1]} : vector<4x128xf32> to vector<1x128xf32>
    %8 = vector.broadcast %7 : vector<1x128xf32> to vector<8x128xf32>
    %9 = arith.addf %6, %8 : vector<8x128xf32>
    %c0_9 = arith.constant 0 : index
    %c0_10 = arith.constant 0 : index
    %10 = vector.load %arg4[%c0_9, %c0_10] : memref<128x256xbf16, #tpu.memory_space<vmem>>, vector<128x256xbf16>
    %cst_11 = arith.constant dense<0.000000e+00> : vector<8x256xf32>
    %11 = tpu.matmul %3, %10, %cst_11 {dimension_numbers = #tpu.dot_dimension_numbers<[1], [0], [0], [1], [0, 0, 1, 1], [], []>} : vector<8x128xbf16>, vector<128x256xbf16>, vector<8x256xf32> -> vector<8x256xf32>
    %c0_12 = arith.constant 0 : index
    %c0_13 = arith.constant 0 : index
    %12 = vector.load %arg5[%c0_12, %c0_13] : memref<1x256xf32, #tpu.memory_space<vmem>>, vector<1x256xf32>
    %13 = vector.broadcast %12 : vector<1x256xf32> to vector<8x256xf32>
    %14 = arith.addf %11, %13 : vector<8x256xf32>
    %15 = vector.extract_strided_slice %14 {offsets = [0, 0], sizes = [8, 128], strides = [1, 1]} : vector<8x256xf32> to vector<8x128xf32>
    %16 = vector.extract_strided_slice %14 {offsets = [0, 128], sizes = [8, 128], strides = [1, 1]} : vector<8x256xf32> to vector<8x128xf32>
    %17 = vector.extract_strided_slice %9 {offsets = [0, 0], sizes = [8, 32], strides = [1, 1]} : vector<8x128xf32> to vector<8x32xf32>
    %18 = arith.truncf %17 : vector<8x32xf32> to vector<8x32xbf16>
    %19 = vector.extract_strided_slice %15 {offsets = [0, 0], sizes = [8, 32], strides = [1, 1]} : vector<8x128xf32> to vector<8x32xf32>
    %20 = arith.truncf %19 : vector<8x32xf32> to vector<8x32xbf16>
    %21 = vector.extract_strided_slice %16 {offsets = [0, 0], sizes = [8, 32], strides = [1, 1]} : vector<8x128xf32> to vector<8x32xf32>
    %22 = arith.truncf %21 : vector<8x32xf32> to vector<8x32xbf16>
    %cst_14 = arith.constant dense<0.000000e+00> : vector<8x8xf32>
    %23 = tpu.matmul %18, %20, %cst_14 {dimension_numbers = #tpu.dot_dimension_numbers<[1], [1], [0], [0], [0, 0, 1, 0], [], []>} : vector<8x32xbf16>, vector<8x32xbf16>, vector<8x8xf32> -> vector<8x8xf32>
    %cst_15 = arith.constant dense<0xFF800000> : vector<8xf32>
    %24 = vector.multi_reduction <maximumf>, %23, %cst_15 [1] : vector<8x8xf32> to vector<8xf32>
    %25 = vector.shape_cast %24 : vector<8xf32> to vector<8x1xf32>
    %26 = vector.broadcast %25 : vector<8x1xf32> to vector<8x8xf32>
    %27 = arith.subf %23, %26 : vector<8x8xf32>
    %28 = math.exp %27 : vector<8x8xf32>
    %cst_16 = arith.constant dense<0.000000e+00> : vector<8xf32>
    %29 = vector.multi_reduction <add>, %28, %cst_16 [1] : vector<8x8xf32> to vector<8xf32>
    %30 = vector.shape_cast %29 : vector<8xf32> to vector<8x1xf32>
    %31 = tpu.reciprocal %30 {approx = true} : vector<8x1xf32> -> vector<8x1xf32>
    %32 = vector.broadcast %31 : vector<8x1xf32> to vector<8x8xf32>
    %33 = arith.mulf %28, %32 : vector<8x8xf32>
    %34 = arith.truncf %33 : vector<8x8xf32> to vector<8x8xbf16>
    %cst_17 = arith.constant dense<0.000000e+00> : vector<8x32xf32>
    %35 = tpu.matmul %34, %22, %cst_17 {dimension_numbers = #tpu.dot_dimension_numbers<[1], [0], [0], [1], [0, 0, 1, 1], [], []>} : vector<8x8xbf16>, vector<8x32xbf16>, vector<8x32xf32> -> vector<8x32xf32>
    %c0_18 = arith.constant 0 : index
    %c0_19 = arith.constant 0 : index
    %36 = vector.load %arg9[%c0_18, %c0_19] : memref<8x128xf32, #tpu.memory_space<vmem>>, vector<8x32xf32>
    tpu.vector_store %arg9[%c0_18, %c0_19], %35 {strides = array<i32>} : memref<8x128xf32, #tpu.memory_space<vmem>>, vector<8x32xf32>,
    %37 = vector.extract_strided_slice %9 {offsets = [0, 32], sizes = [8, 32], strides = [1, 1]} : vector<8x128xf32> to vector<8x32xf32>
    %38 = arith.truncf %37 : vector<8x32xf32> to vector<8x32xbf16>
    %39 = vector.extract_strided_slice %15 {offsets = [0, 32], sizes = [8, 32], strides = [1, 1]} : vector<8x128xf32> to vector<8x32xf32>
    %40 = arith.truncf %39 : vector<8x32xf32> to vector<8x32xbf16>
    %41 = vector.extract_strided_slice %16 {offsets = [0, 32], sizes = [8, 32], strides = [1, 1]} : vector<8x128xf32> to vector<8x32xf32>
    %42 = arith.truncf %41 : vector<8x32xf32> to vector<8x32xbf16>
    %cst_20 = arith.constant dense<0.000000e+00> : vector<8x8xf32>
    %43 = tpu.matmul %38, %40, %cst_20 {dimension_numbers = #tpu.dot_dimension_numbers<[1], [1], [0], [0], [0, 0, 1, 0], [], []>} : vector<8x32xbf16>, vector<8x32xbf16>, vector<8x8xf32> -> vector<8x8xf32>
    %cst_21 = arith.constant dense<0xFF800000> : vector<8xf32>
    %44 = vector.multi_reduction <maximumf>, %43, %cst_21 [1] : vector<8x8xf32> to vector<8xf32>
    %45 = vector.shape_cast %44 : vector<8xf32> to vector<8x1xf32>
    %46 = vector.broadcast %45 : vector<8x1xf32> to vector<8x8xf32>
    %47 = arith.subf %43, %46 : vector<8x8xf32>
    %48 = math.exp %47 : vector<8x8xf32>
    %cst_22 = arith.constant dense<0.000000e+00> : vector<8xf32>
    %49 = vector.multi_reduction <add>, %48, %cst_22 [1] : vector<8x8xf32> to vector<8xf32>
    %50 = vector.shape_cast %49 : vector<8xf32> to vector<8x1xf32>
    %51 = tpu.reciprocal %50 {approx = true} : vector<8x1xf32> -> vector<8x1xf32>
    %52 = vector.broadcast %51 : vector<8x1xf32> to vector<8x8xf32>
    %53 = arith.mulf %48, %52 : vector<8x8xf32>
    %54 = arith.truncf %53 : vector<8x8xf32> to vector<8x8xbf16>
    %cst_23 = arith.constant dense<0.000000e+00> : vector<8x32xf32>
    %55 = tpu.matmul %54, %42, %cst_23 {dimension_numbers = #tpu.dot_dimension_numbers<[1], [0], [0], [1], [0, 0, 1, 1], [], []>} : vector<8x8xbf16>, vector<8x32xbf16>, vector<8x32xf32> -> vector<8x32xf32>
    %c0_24 = arith.constant 0 : index
    %c32 = arith.constant 32 : index
    %56 = vector.load %arg9[%c0_24, %c32] : memref<8x128xf32, #tpu.memory_space<vmem>>, vector<8x32xf32>
    tpu.vector_store %arg9[%c0_24, %c32], %55 {strides = array<i32>} : memref<8x128xf32, #tpu.memory_space<vmem>>, vector<8x32xf32>,
    %57 = vector.extract_strided_slice %9 {offsets = [0, 64], sizes = [8, 32], strides = [1, 1]} : vector<8x128xf32> to vector<8x32xf32>
    %58 = arith.truncf %57 : vector<8x32xf32> to vector<8x32xbf16>
    %59 = vector.extract_strided_slice %15 {offsets = [0, 64], sizes = [8, 32], strides = [1, 1]} : vector<8x128xf32> to vector<8x32xf32>
    %60 = arith.truncf %59 : vector<8x32xf32> to vector<8x32xbf16>
    %61 = vector.extract_strided_slice %16 {offsets = [0, 64], sizes = [8, 32], strides = [1, 1]} : vector<8x128xf32> to vector<8x32xf32>
    %62 = arith.truncf %61 : vector<8x32xf32> to vector<8x32xbf16>
    %cst_25 = arith.constant dense<0.000000e+00> : vector<8x8xf32>
    %63 = tpu.matmul %58, %60, %cst_25 {dimension_numbers = #tpu.dot_dimension_numbers<[1], [1], [0], [0], [0, 0, 1, 0], [], []>} : vector<8x32xbf16>, vector<8x32xbf16>, vector<8x8xf32> -> vector<8x8xf32>
    %cst_26 = arith.constant dense<0xFF800000> : vector<8xf32>
    %64 = vector.multi_reduction <maximumf>, %63, %cst_26 [1] : vector<8x8xf32> to vector<8xf32>
    %65 = vector.shape_cast %64 : vector<8xf32> to vector<8x1xf32>
    %66 = vector.broadcast %65 : vector<8x1xf32> to vector<8x8xf32>
    %67 = arith.subf %63, %66 : vector<8x8xf32>
    %68 = math.exp %67 : vector<8x8xf32>
    %cst_27 = arith.constant dense<0.000000e+00> : vector<8xf32>
    %69 = vector.multi_reduction <add>, %68, %cst_27 [1] : vector<8x8xf32> to vector<8xf32>
    %70 = vector.shape_cast %69 : vector<8xf32> to vector<8x1xf32>
    %71 = tpu.reciprocal %70 {approx = true} : vector<8x1xf32> -> vector<8x1xf32>
    %72 = vector.broadcast %71 : vector<8x1xf32> to vector<8x8xf32>
    %73 = arith.mulf %68, %72 : vector<8x8xf32>
    %74 = arith.truncf %73 : vector<8x8xf32> to vector<8x8xbf16>
    %cst_28 = arith.constant dense<0.000000e+00> : vector<8x32xf32>
    %75 = tpu.matmul %74, %62, %cst_28 {dimension_numbers = #tpu.dot_dimension_numbers<[1], [0], [0], [1], [0, 0, 1, 1], [], []>} : vector<8x8xbf16>, vector<8x32xbf16>, vector<8x32xf32> -> vector<8x32xf32>
    %c0_29 = arith.constant 0 : index
    %c64 = arith.constant 64 : index
    %76 = vector.load %arg9[%c0_29, %c64] : memref<8x128xf32, #tpu.memory_space<vmem>>, vector<8x32xf32>
    tpu.vector_store %arg9[%c0_29, %c64], %75 {strides = array<i32>} : memref<8x128xf32, #tpu.memory_space<vmem>>, vector<8x32xf32>,
    %77 = vector.extract_strided_slice %9 {offsets = [0, 96], sizes = [8, 32], strides = [1, 1]} : vector<8x128xf32> to vector<8x32xf32>
    %78 = arith.truncf %77 : vector<8x32xf32> to vector<8x32xbf16>
    %79 = vector.extract_strided_slice %15 {offsets = [0, 96], sizes = [8, 32], strides = [1, 1]} : vector<8x128xf32> to vector<8x32xf32>
    %80 = arith.truncf %79 : vector<8x32xf32> to vector<8x32xbf16>
    %81 = vector.extract_strided_slice %16 {offsets = [0, 96], sizes = [8, 32], strides = [1, 1]} : vector<8x128xf32> to vector<8x32xf32>
    %82 = arith.truncf %81 : vector<8x32xf32> to vector<8x32xbf16>
    %cst_30 = arith.constant dense<0.000000e+00> : vector<8x8xf32>
    %83 = tpu.matmul %78, %80, %cst_30 {dimension_numbers = #tpu.dot_dimension_numbers<[1], [1], [0], [0], [0, 0, 1, 0], [], []>} : vector<8x32xbf16>, vector<8x32xbf16>, vector<8x8xf32> -> vector<8x8xf32>
    %cst_31 = arith.constant dense<0xFF800000> : vector<8xf32>
    %84 = vector.multi_reduction <maximumf>, %83, %cst_31 [1] : vector<8x8xf32> to vector<8xf32>
    %85 = vector.shape_cast %84 : vector<8xf32> to vector<8x1xf32>
    %86 = vector.broadcast %85 : vector<8x1xf32> to vector<8x8xf32>
    %87 = arith.subf %83, %86 : vector<8x8xf32>
    %88 = math.exp %87 : vector<8x8xf32>
    %cst_32 = arith.constant dense<0.000000e+00> : vector<8xf32>
    %89 = vector.multi_reduction <add>, %88, %cst_32 [1] : vector<8x8xf32> to vector<8xf32>
    %90 = vector.shape_cast %89 : vector<8xf32> to vector<8x1xf32>
    %91 = tpu.reciprocal %90 {approx = true} : vector<8x1xf32> -> vector<8x1xf32>
    %92 = vector.broadcast %91 : vector<8x1xf32> to vector<8x8xf32>
    %93 = arith.mulf %88, %92 : vector<8x8xf32>
    %94 = arith.truncf %93 : vector<8x8xf32> to vector<8x8xbf16>
    %cst_33 = arith.constant dense<0.000000e+00> : vector<8x32xf32>
    %95 = tpu.matmul %94, %82, %cst_33 {dimension_numbers = #tpu.dot_dimension_numbers<[1], [0], [0], [1], [0, 0, 1, 1], [], []>} : vector<8x8xbf16>, vector<8x32xbf16>, vector<8x32xf32> -> vector<8x32xf32>
    %c0_34 = arith.constant 0 : index
    %c96 = arith.constant 96 : index
    %96 = vector.load %arg9[%c0_34, %c96] : memref<8x128xf32, #tpu.memory_space<vmem>>, vector<8x32xf32>
    tpu.vector_store %arg9[%c0_34, %c96], %95 {strides = array<i32>} : memref<8x128xf32, #tpu.memory_space<vmem>>, vector<8x32xf32>,
    %c0_35 = arith.constant 0 : index
    %c0_36 = arith.constant 0 : index
    %97 = vector.load %arg9[%c0_35, %c0_36] : memref<8x128xf32, #tpu.memory_space<vmem>>, vector<8x128xf32>
    %98 = arith.truncf %97 : vector<8x128xf32> to vector<8x128xbf16>
    %c0_37 = arith.constant 0 : index
    %c0_38 = arith.constant 0 : index
    %99 = vector.load %arg6[%c0_37, %c0_38] : memref<128x128xbf16, #tpu.memory_space<vmem>>, vector<128x128xbf16>
    %cst_39 = arith.constant dense<0.000000e+00> : vector<8x128xf32>
    %100 = tpu.matmul %98, %99, %cst_39 {dimension_numbers = #tpu.dot_dimension_numbers<[1], [0], [0], [1], [0, 0, 1, 1], [], []>} : vector<8x128xbf16>, vector<128x128xbf16>, vector<8x128xf32> -> vector<8x128xf32>
    %101 = vector.extract_strided_slice %4 {offsets = [1, 0], sizes = [1, 128], strides = [1, 1]} : vector<4x128xf32> to vector<1x128xf32>
    %102 = vector.broadcast %101 : vector<1x128xf32> to vector<8x128xf32>
    %103 = arith.addf %100, %102 : vector<8x128xf32>
    %104 = arith.extf %1 : vector<8x128xbf16> to vector<8x128xf32>
    %105 = vector.extract_strided_slice %4 {offsets = [2, 0], sizes = [1, 128], strides = [1, 1]} : vector<4x128xf32> to vector<1x128xf32>
    %106 = vector.extract_strided_slice %4 {offsets = [3, 0], sizes = [1, 128], strides = [1, 1]} : vector<4x128xf32> to vector<1x128xf32>
    %107 = arith.addf %104, %103 : vector<8x128xf32>
    %cst_40 = arith.constant dense<0.000000e+00> : vector<8xf32>
    %108 = vector.multi_reduction <add>, %107, %cst_40 [1] : vector<8x128xf32> to vector<8xf32>
    %109 = vector.shape_cast %108 : vector<8xf32> to vector<8x1xf32>
    %cst_41 = arith.constant 1.280000e+02 : f32
    %110 = vector.broadcast %cst_41 : f32 to vector<8x1xf32>
    %111 = arith.divf %109, %110 : vector<8x1xf32>
    %112 = vector.broadcast %111 : vector<8x1xf32> to vector<8x128xf32>
    %113 = arith.subf %107, %112 : vector<8x128xf32>
    %114 = arith.mulf %113, %113 : vector<8x128xf32>
    %cst_42 = arith.constant dense<0.000000e+00> : vector<8xf32>
    %115 = vector.multi_reduction <add>, %114, %cst_42 [1] : vector<8x128xf32> to vector<8xf32>
    %116 = vector.shape_cast %115 : vector<8xf32> to vector<8x1xf32>
    %cst_43 = arith.constant 1.280000e+02 : f32
    %117 = vector.broadcast %cst_43 : f32 to vector<8x1xf32>
    %118 = arith.divf %116, %117 : vector<8x1xf32>
    %119 = vector.broadcast %111 : vector<8x1xf32> to vector<8x128xf32>
    %120 = arith.subf %107, %119 : vector<8x128xf32>
    %cst_44 = arith.constant 9.99999974E-6 : f32
    %121 = vector.broadcast %cst_44 : f32 to vector<8x1xf32>
    %122 = arith.addf %118, %121 : vector<8x1xf32>
    %123 = math.rsqrt %122 : vector<8x1xf32>
    %124 = vector.broadcast %123 : vector<8x1xf32> to vector<8x128xf32>
    %125 = arith.mulf %120, %124 : vector<8x128xf32>
    %126 = vector.broadcast %105 : vector<1x128xf32> to vector<8x128xf32>
    %127 = arith.mulf %125, %126 : vector<8x128xf32>
    %128 = vector.broadcast %106 : vector<1x128xf32> to vector<8x128xf32>
    %129 = arith.addf %127, %128 : vector<8x128xf32>
    %130 = arith.truncf %129 : vector<8x128xf32> to vector<8x128xbf16>
    %c0_45 = arith.constant 0 : index
    %c0_46 = arith.constant 0 : index
    %c0_47 = arith.constant 0 : index
    %131 = vector.load %arg8[%c0_45, %c0_46, %c0_47] : memref<1x8x128xbf16, #tpu.memory_space<vmem>>, vector<1x8x128xbf16>
    %132 = vector.shape_cast %131 : vector<1x8x128xbf16> to vector<8x128xbf16>
    %133 = vector.shape_cast %130 : vector<8x128xbf16> to vector<1x8x128xbf16>
    tpu.vector_store %arg8[%c0_45, %c0_46, %c0_47], %133 {strides = array<i32>} : memref<1x8x128xbf16, #tpu.memory_space<vmem>>, vector<1x8x128xbf16>,
    return
  }
  func.func @transform_0(%arg0: i32) -> (i32, i32, i32) {
    %c0_i32 = arith.constant 0 : i32
    %c0_i32_0 = arith.constant 0 : i32
    %c0_i32_1 = arith.constant 0 : i32
    return %arg0, %c0_i32, %c0_i32_0 : i32, i32, i32
  }
  func.func @transform_1(%arg0: i32) -> (i32, i32, i32) {
    %c0_i32 = arith.constant 0 : i32
    %c0_i32_0 = arith.constant 0 : i32
    %c0_i32_1 = arith.constant 0 : i32
    return %arg0, %c0_i32, %c0_i32_0 : i32, i32, i32
  }
  func.func @transform_2(%arg0: i32) -> (i32, i32) {
    %c0_i32 = arith.constant 0 : i32
    %c0_i32_0 = arith.constant 0 : i32
    %c0_i32_1 = arith.constant 0 : i32
    return %c0_i32, %c0_i32_0 : i32, i32
  }
  func.func @transform_3(%arg0: i32) -> (i32, i32) {
    %c0_i32 = arith.constant 0 : i32
    %c0_i32_0 = arith.constant 0 : i32
    %c0_i32_1 = arith.constant 0 : i32
    return %c0_i32, %c0_i32_0 : i32, i32
  }
  func.func @transform_4(%arg0: i32) -> (i32, i32) {
    %c0_i32 = arith.constant 0 : i32
    %c0_i32_0 = arith.constant 0 : i32
    %c0_i32_1 = arith.constant 0 : i32
    return %c0_i32, %c0_i32_0 : i32, i32
  }
  func.func @transform_5(%arg0: i32) -> (i32, i32) {
    %c0_i32 = arith.constant 0 : i32
    %c0_i32_0 = arith.constant 0 : i32
    %c0_i32_1 = arith.constant 0 : i32
    return %c0_i32, %c0_i32_0 : i32, i32
  }
  func.func @transform_6(%arg0: i32) -> (i32, i32) {
    %c0_i32 = arith.constant 0 : i32
    %c0_i32_0 = arith.constant 0 : i32
    %c0_i32_1 = arith.constant 0 : i32
    return %c0_i32, %c0_i32_0 : i32, i32
  }
  func.func @transform_7(%arg0: i32) -> (i32, i32, i32) {
    %c0_i32 = arith.constant 0 : i32
    %c0_i32_0 = arith.constant 0 : i32
    %c0_i32_1 = arith.constant 0 : i32
    return %arg0, %c0_i32, %c0_i32_0 : i32, i32, i32
  }
}

module attributes {stable_mosaic.version = 11 : i64} {
  func.func @_ffn_ln_kernel(%arg0: i32, %arg1: i32, %arg2: memref<16x128xbf16, #tpu.memory_space<vmem>>, %arg3: memref<128x256xbf16, #tpu.memory_space<vmem>>, %arg4: memref<1x256xf32, #tpu.memory_space<vmem>>, %arg5: memref<256x128xbf16, #tpu.memory_space<vmem>>, %arg6: memref<3x128xf32, #tpu.memory_space<vmem>>, %arg7: memref<16x128xf32, #tpu.memory_space<vmem>>, %arg8: memref<16x128xf32, #tpu.memory_space<vmem>>) attributes {dimension_semantics = [#tpu.dimension_semantics<parallel>, #tpu.dimension_semantics<arbitrary>], iteration_bounds = array<i64: 1, 1>, scalar_prefetch = 0 : i64, scratch_operands = 1 : i64, tpu.core_type = #tpu.core_type<tc>, window_params = [{transform_indices = @transform_0, window_bounds = array<i64: 16, 128>}, {transform_indices = @transform_1, window_bounds = array<i64: 128, 256>}, {transform_indices = @transform_2, window_bounds = array<i64: 1, 256>}, {transform_indices = @transform_3, window_bounds = array<i64: 256, 128>}, {pipeline_mode = #tpu.pipeline_mode<synchronous>, transform_indices = @transform_4, window_bounds = array<i64: 3, 128>}, {transform_indices = @transform_5, window_bounds = array<i64: 16, 128>}]} {
    %c0_i32 = arith.constant 0 : i32
    %0 = arith.cmpi eq, %arg1, %c0_i32 : i32
    %1 = arith.extui %0 : i1 to i32
    %c0_i32_0 = arith.constant 0 : i32
    %2 = arith.cmpi ne, %1, %c0_i32_0 : i32
    scf.if %2 {
      %cst_16 = arith.constant 0.000000e+00 : f32
      %20 = vector.broadcast %cst_16 : f32 to vector<16x128xf32>
      %c0_17 = arith.constant 0 : index
      %c0_18 = arith.constant 0 : index
      %21 = vector.load %arg8[%c0_17, %c0_18] : memref<16x128xf32, #tpu.memory_space<vmem>>, vector<16x128xf32>
      tpu.vector_store %arg8[%c0_17, %c0_18], %20 {strides = array<i32>} : memref<16x128xf32, #tpu.memory_space<vmem>>, vector<16x128xf32>,
    } else {
    }
    %c0 = arith.constant 0 : index
    %c0_1 = arith.constant 0 : index
    %3 = vector.load %arg2[%c0, %c0_1] : memref<16x128xbf16, #tpu.memory_space<vmem>>, vector<16x128xbf16>
    %c0_2 = arith.constant 0 : index
    %c0_3 = arith.constant 0 : index
    %4 = vector.load %arg3[%c0_2, %c0_3] : memref<128x256xbf16, #tpu.memory_space<vmem>>, vector<128x256xbf16>
    %cst = arith.constant dense<0.000000e+00> : vector<16x256xf32>
    %5 = tpu.matmul %3, %4, %cst {dimension_numbers = #tpu.dot_dimension_numbers<[1], [0], [0], [1], [0, 0, 1, 1], [], []>} : vector<16x128xbf16>, vector<128x256xbf16>, vector<16x256xf32> -> vector<16x256xf32>
    %c0_4 = arith.constant 0 : index
    %c0_5 = arith.constant 0 : index
    %6 = vector.load %arg4[%c0_4, %c0_5] : memref<1x256xf32, #tpu.memory_space<vmem>>, vector<1x256xf32>
    %7 = vector.broadcast %6 : vector<1x256xf32> to vector<16x256xf32>
    %8 = arith.addf %5, %7 : vector<16x256xf32>
    %cst_6 = arith.constant 0.000000e+00 : f32
    %9 = vector.broadcast %cst_6 : f32 to vector<16x256xf32>
    %10 = arith.maximumf %8, %9 : vector<16x256xf32>
    %c0_7 = arith.constant 0 : index
    %c0_8 = arith.constant 0 : index
    %11 = vector.load %arg8[%c0_7, %c0_8] : memref<16x128xf32, #tpu.memory_space<vmem>>, vector<16x128xf32>
    %12 = arith.truncf %10 : vector<16x256xf32> to vector<16x256xbf16>
    %c0_9 = arith.constant 0 : index
    %c0_10 = arith.constant 0 : index
    %13 = vector.load %arg5[%c0_9, %c0_10] : memref<256x128xbf16, #tpu.memory_space<vmem>>, vector<256x128xbf16>
    %cst_11 = arith.constant dense<0.000000e+00> : vector<16x128xf32>
    %14 = tpu.matmul %12, %13, %cst_11 {dimension_numbers = #tpu.dot_dimension_numbers<[1], [0], [0], [1], [0, 0, 1, 1], [], []>} : vector<16x256xbf16>, vector<256x128xbf16>, vector<16x128xf32> -> vector<16x128xf32>
    %15 = arith.addf %11, %14 : vector<16x128xf32>
    %c0_12 = arith.constant 0 : index
    %c0_13 = arith.constant 0 : index
    %16 = vector.load %arg8[%c0_12, %c0_13] : memref<16x128xf32, #tpu.memory_space<vmem>>, vector<16x128xf32>
    tpu.vector_store %arg8[%c0_12, %c0_13], %15 {strides = array<i32>} : memref<16x128xf32, #tpu.memory_space<vmem>>, vector<16x128xf32>,
    %c0_i32_14 = arith.constant 0 : i32
    %17 = arith.cmpi eq, %arg1, %c0_i32_14 : i32
    %18 = arith.extui %17 : i1 to i32
    %c0_i32_15 = arith.constant 0 : i32
    %19 = arith.cmpi ne, %18, %c0_i32_15 : i32
    scf.if %19 {
      %c0_16 = arith.constant 0 : index
      %c0_17 = arith.constant 0 : index
      %20 = vector.load %arg6[%c0_16, %c0_17] : memref<3x128xf32, #tpu.memory_space<vmem>>, vector<3x128xf32>
      %c0_18 = arith.constant 0 : index
      %c0_19 = arith.constant 0 : index
      %21 = vector.load %arg8[%c0_18, %c0_19] : memref<16x128xf32, #tpu.memory_space<vmem>>, vector<16x128xf32>
      %22 = vector.extract_strided_slice %20 {offsets = [0, 0], sizes = [1, 128], strides = [1, 1]} : vector<3x128xf32> to vector<1x128xf32>
      %23 = vector.broadcast %22 : vector<1x128xf32> to vector<16x128xf32>
      %24 = arith.addf %21, %23 : vector<16x128xf32>
      %25 = arith.extf %3 : vector<16x128xbf16> to vector<16x128xf32>
      %26 = vector.extract_strided_slice %20 {offsets = [1, 0], sizes = [1, 128], strides = [1, 1]} : vector<3x128xf32> to vector<1x128xf32>
      %27 = vector.extract_strided_slice %20 {offsets = [2, 0], sizes = [1, 128], strides = [1, 1]} : vector<3x128xf32> to vector<1x128xf32>
      %28 = arith.addf %25, %24 : vector<16x128xf32>
      %cst_20 = arith.constant dense<0.000000e+00> : vector<16xf32>
      %29 = vector.multi_reduction <add>, %28, %cst_20 [1] : vector<16x128xf32> to vector<16xf32>
      %30 = vector.shape_cast %29 : vector<16xf32> to vector<16x1xf32>
      %cst_21 = arith.constant 1.280000e+02 : f32
      %31 = vector.broadcast %cst_21 : f32 to vector<16x1xf32>
      %32 = arith.divf %30, %31 : vector<16x1xf32>
      %33 = vector.broadcast %32 : vector<16x1xf32> to vector<16x128xf32>
      %34 = arith.subf %28, %33 : vector<16x128xf32>
      %35 = arith.mulf %34, %34 : vector<16x128xf32>
      %cst_22 = arith.constant dense<0.000000e+00> : vector<16xf32>
      %36 = vector.multi_reduction <add>, %35, %cst_22 [1] : vector<16x128xf32> to vector<16xf32>
      %37 = vector.shape_cast %36 : vector<16xf32> to vector<16x1xf32>
      %cst_23 = arith.constant 1.280000e+02 : f32
      %38 = vector.broadcast %cst_23 : f32 to vector<16x1xf32>
      %39 = arith.divf %37, %38 : vector<16x1xf32>
      %40 = vector.broadcast %32 : vector<16x1xf32> to vector<16x128xf32>
      %41 = arith.subf %28, %40 : vector<16x128xf32>
      %cst_24 = arith.constant 9.99999974E-6 : f32
      %42 = vector.broadcast %cst_24 : f32 to vector<16x1xf32>
      %43 = arith.addf %39, %42 : vector<16x1xf32>
      %44 = math.rsqrt %43 : vector<16x1xf32>
      %45 = vector.broadcast %44 : vector<16x1xf32> to vector<16x128xf32>
      %46 = arith.mulf %41, %45 : vector<16x128xf32>
      %47 = vector.broadcast %26 : vector<1x128xf32> to vector<16x128xf32>
      %48 = arith.mulf %46, %47 : vector<16x128xf32>
      %49 = vector.broadcast %27 : vector<1x128xf32> to vector<16x128xf32>
      %50 = arith.addf %48, %49 : vector<16x128xf32>
      %c0_25 = arith.constant 0 : index
      %c0_26 = arith.constant 0 : index
      %51 = vector.load %arg7[%c0_25, %c0_26] : memref<16x128xf32, #tpu.memory_space<vmem>>, vector<16x128xf32>
      tpu.vector_store %arg7[%c0_25, %c0_26], %50 {strides = array<i32>} : memref<16x128xf32, #tpu.memory_space<vmem>>, vector<16x128xf32>,
    } else {
    }
    return
  }
  func.func @transform_0(%arg0: i32, %arg1: i32) -> (i32, i32) {
    %c0_i32 = arith.constant 0 : i32
    %c0_i32_0 = arith.constant 0 : i32
    return %arg0, %c0_i32 : i32, i32
  }
  func.func @transform_1(%arg0: i32, %arg1: i32) -> (i32, i32) {
    %c0_i32 = arith.constant 0 : i32
    %c0_i32_0 = arith.constant 0 : i32
    return %c0_i32, %arg1 : i32, i32
  }
  func.func @transform_2(%arg0: i32, %arg1: i32) -> (i32, i32) {
    %c0_i32 = arith.constant 0 : i32
    %c0_i32_0 = arith.constant 0 : i32
    return %c0_i32, %arg1 : i32, i32
  }
  func.func @transform_3(%arg0: i32, %arg1: i32) -> (i32, i32) {
    %c0_i32 = arith.constant 0 : i32
    %c0_i32_0 = arith.constant 0 : i32
    return %arg1, %c0_i32 : i32, i32
  }
  func.func @transform_4(%arg0: i32, %arg1: i32) -> (i32, i32) {
    %c0_i32 = arith.constant 0 : i32
    %c0_i32_0 = arith.constant 0 : i32
    %c0_i32_1 = arith.constant 0 : i32
    return %c0_i32, %c0_i32_0 : i32, i32
  }
  func.func @transform_5(%arg0: i32, %arg1: i32) -> (i32, i32) {
    %c0_i32 = arith.constant 0 : i32
    %c0_i32_0 = arith.constant 0 : i32
    return %arg0, %c0_i32 : i32, i32
  }
}

</mosaic_0001>

<bundles_post_ra>
// kernel: transformer_decoder.7
= control target key start
LH: loop header
LB: loop body
LE: loop exit
PB: predicated region body
PF: predicated region fallthrough
CT: control target
= control target key end

     0   :  { %12 = vsyncpa [#allocation4], 0  ;;  %s1553_s0 = inlined_call_operand.vmem [shape: bf16[2,8,128], index: 0, kind: input, shape index: {}]   ;;  %s1554_s1 = inlined_call_operand.vmem [shape: bf16[2,8,128], index: 1, kind: input, shape index: {}]   ;;  %s1555_s2 = inlined_call_operand.hbm [shape: bf16[128,128], index: 2, kind: input, shape index: {}]   ;;  %s1556_s3 = inlined_call_operand.vmem [shape: bf16[128,256], index: 3, kind: input, shape index: {}]   ;;  %s1557_s4 = inlined_call_operand.vmem [shape: f32[1,256], index: 4, kind: input, shape index: {}]   ;;  %s1558_s5 = inlined_call_operand.hbm [shape: bf16[128,128], index: 5, kind: input, shape index: {}]   ;;  %s1559_s6 = inlined_call_operand.vmem [shape: f32[4,128], index: 6, kind: input, shape index: {}]   ;;  %s1560_s7 = inlined_call_operand.vmem [shape: bf16[2,8,128], index: 7, kind: output, shape index: {}]  }
   0x1   :  { %13 = vsyncpa [#allocation6], 0  ;;  %s1344_s24 = smov 0  }
   0x2 LB: > { %s218_s27 = sshll.u32 %s1555_s2, 4  ;;  %s1353_s28 = sadd.s32 4294967295, %s1294_s24   ;;  %s1294_s24 = sphi %s1344_s24, %s19_s24   ;;  %s219_s27 = int_to_ptr.hbm [resolvable:$true] %s218_s27 }
   0x3   : > { %p985_p0 = scmp.ge.s32.totalorder %s1294_s24, 1  ;;  %p207_p1 = scmp.lt.s32.totalorder %s1294_s24, 3 }
   0x4   : > { %p1180_p2 = scmp.eq.s32.totalorder %s1353_s28, 0  ;;  %s1296_s30 = smov [#allocation3]  }
   0x5   : > { %p1358_p3 = pnand %p985_p0, %p207_p1  ;;  %s220_s8 = sshll.u32 %s1296_s30, 4  ;;  %s221_s8 = int_to_ptr.vmem [resolvable:$true] %s220_s8 }
   0x6   : > { %s238_s11 = sshll.u32 %s1558_s5, 4  ;;  %s1297_s12 = smov [#allocation5]   ;;  %s239_s11 = int_to_ptr.hbm [resolvable:$true] %s238_s11 }
   0x7   : > { %p1173_p4 = pneg %p1358_p3  ;;  %s240_s13 = sshll.u32 %s1297_s12, 4  ;;  %s241_s13 = int_to_ptr.vmem [resolvable:$true] %s240_s13 }
   0x8   : > { %s1298_s14 = smov 64   ;;  %s1299_s15 = smov 4  }
   0x9   : > { %p1174_p5 = pnand %p1180_p2, %p1173_p4  ;;  %273 = sbr.rel (%p1358_p3) target bundleno = 1666 (0x682), region = 48 }
   0xb   : > { %1176 = dma.hbm_to_vmem [thread:$0]  (!%p1174_p5), %s219_s27, 1024, %s221_s8, [#allocation4], %s1298_s14, %s1298_s14, %s1299_s15  }
   0xc   : > { %1179 = dma.hbm_to_vmem [thread:$0]  (!%p1174_p5), %s239_s11, 1024, %s241_s13, [#allocation6], %s1298_s14, %s1298_s14, %s1299_s15  }
   0xe   : > { %1285 = dma.done.wait (%p1180_p2), [#allocation4], 1024  }
   0xf   : > { %1287 = vsyncadd (%p1180_p2), [#allocation4], 4294966272 }
  0x10   : > { %1289 = dma.done.wait (%p1180_p2), [#allocation6], 1024  }
  0x11   : > { %1291 = vsyncadd (%p1180_p2), [#allocation6], 4294966272  ;;  %v1140_v0 = vld [vmem:[#allocation3 + $0x38] sm:$0xff]  ;;  %v1085_v1 = vld [vmem:[%s1556_s3 + $0x70] sm:$0xf]  ;;  %p313_p6 = scmp.lt.s32.totalorder %s1353_s28, 1 }
  0x12   : > { %v1156_v2 = vld [vmem:[%s1556_s3 + $0x74] sm:$0xf0]  ;;  %v1077_v4 = vld [vmem:[%s1556_s3 + $0x60] sm:$0xf]  ;;  %v1154_v5 = vld [vmem:[%s1556_s3 + $0x64] sm:$0xf0]  ;;  %394 = vmatpush.bf16.msra.mxu0 %v1140_v0 }
  0x13   : > { %v1086_v3 = vor.u32 %v1156_v2, %v1085_v1  ;;  %v1139_v6 = vld [vmem:[#allocation3 + $0x30] sm:$0xff]  ;;  %v1078_v7 = vor.u32 %v1154_v5, %v1077_v4  ;;  %v1069_v8 = vld [vmem:[%s1556_s3 + $0x50] sm:$0xf]  ;;  %v1061_v12 = vld [vmem:[%s1556_s3 + $0x40] sm:$0xf]  ;;  %s1563_s28 = smov (!%p313_p6, %s1353_s28), 1 }
  0x14   : > { %v1152_v9 = vld [vmem:[%s1556_s3 + $0x54] sm:$0xf0]  ;;  %v1138_v10 = vld [vmem:[#allocation3 + $0x28] sm:$0xff]  ;;  %v1150_v13 = vld [vmem:[%s1556_s3 + $0x44] sm:$0xf0]  ;;  %s1459_s27 = sshll.u32 %s1563_s28, 2 }
  0x15   : > { %509 = vmatpush.bf16.msra.mxu1 %v1086_v3  ;;  %v1070_v11 = vor.u32 %v1152_v9, %v1069_v8  ;;  %v1155_v14 = vld [vmem:[%s1556_s3 + $0x74] sm:$0xf]  ;;  %v1087_v15 = vld [vmem:[%s1556_s3 + $0x78] sm:$0xf0]  ;;  %v1153_v16 = vld [vmem:[%s1556_s3 + $0x64] sm:$0xf]  ;;  %v1062_v20 = vor.u32 %v1150_v13, %v1061_v12  ;;  %s316_s28 = scalar_lea.vmem %s1553_s0, %s1459_s27  ;;  %s320_s14 = scalar_lea.vmem %s1554_s1, %s1459_s27 }
  0x16   : > { %395 = vmatpush.bf16.msra.mxu0 %v1139_v6  ;;  %v1079_v17 = vld [vmem:[%s1556_s3 + $0x68] sm:$0xf0]  ;;  %v1090_v19 = vor.u32 %v1155_v14, %v1087_v15  ;;  %v1053_v21 = vld [vmem:[%s1556_s3 + $0x30] sm:$0xf]  ;;  %v1148_v22 = vld [vmem:[%s1556_s3 + $0x34] sm:$0xf0] }
  0x17   : > { %v1137_v18 = vld [vmem:[#allocation3 + $0x20] sm:$0xff]  ;;  %v1082_v23 = vor.u32 %v1153_v16, %v1079_v17  ;;  %v1151_v24 = vld [vmem:[%s1556_s3 + $0x54] sm:$0xf]  ;;  %v1071_v25 = vld [vmem:[%s1556_s3 + $0x58] sm:$0xf0]  ;;  %v1054_v27 = vor.u32 %v1148_v22, %v1053_v21  ;;  %vm538_vm0 = vcmask 261120  }
  0x18   : > { %522 = vmatpush.bf16.msra.mxu2 %v1090_v19  ;;  %v1136_v26 = vld [vmem:[#allocation3 + $0x18] sm:$0xff]  ;;  %v1146_v29 = vld [vmem:[%s1556_s3 + $0x24] sm:$0xf0]  ;;  %v1074_v30 = vor.u32 %v1151_v24, %v1071_v25  ;;  %v1063_v32 = vld [vmem:[%s1556_s3 + $0x48] sm:$0xf0]  ;;  %s1300_s30 = smov 64  }
  0x19   : > { %510 = vmatpush.bf16.msra.mxu1 %v1078_v7  ;;  %v1045_v28 = vld [vmem:[%s1556_s3 + $0x20] sm:$0xf]  ;;  %v1149_v31 = vld [vmem:[%s1556_s3 + $0x44] sm:$0xf]  ;;  %v1135_v33 = vld [vmem:[#allocation3 + $0x10] sm:$0xff]  ;;  %s1301_s8 = smov 96  }
  0x1a   : > { %396 = vmatpush.bf16.msra.mxu0 %v1138_v10  ;;  %v1046_v34 = vor.u32 %v1146_v29, %v1045_v28  ;;  %v1037_v35 = vld [vmem:[%s1556_s3 + $0x10] sm:$0xf]  ;;  %v1144_v36 = vld [vmem:[%s1556_s3 + $0x14] sm:$0xf0]  ;;  %v1066_v37 = vor.u32 %v1149_v31, %v1063_v32  ;;  %v1147_v38 = vld [vmem:[%s1556_s3 + $0x34] sm:$0xf] }
  0x1b   : > { %v1055_v39 = vld [vmem:[%s1556_s3 + $0x38] sm:$0xf0]  ;;  %v1134_v40 = vld [vmem:[#allocation3 + $0x8] sm:$0xff]  ;;  %v1038_v41 = vor.u32 %v1144_v36, %v1037_v35  ;;  %v1029_v42 = vld [vmem:[%s1556_s3] sm:$0xf]  ;;  %s1302_s9 = smov 32  }
  0x1c   : > { %523 = vmatpush.bf16.msra.mxu2 %v1082_v23  ;;  %v1142_v43 = vld [vmem:[%s1556_s3 + $0x4] sm:$0xf0]  ;;  %v1058_v44 = vor.u32 %v1147_v38, %v1055_v39  ;;  %v1145_v45 = vld [vmem:[%s1556_s3 + $0x24] sm:$0xf]  ;;  %v1047_v46 = vld [vmem:[%s1556_s3 + $0x28] sm:$0xf0] }
  0x1d   : > { %511 = vmatpush.bf16.msra.mxu1 %v1070_v11  ;;  %v1133_v47 = vld [vmem:[#allocation3] sm:$0xff]  ;;  %v1030_v48 = vor.u32 %v1142_v43, %v1029_v42  ;;  %v1050_v49 = vor.u32 %v1145_v45, %v1047_v46  ;;  %v1143_v50 = vld [vmem:[%s1556_s3 + $0x14] sm:$0xf]  ;;  %v1039_v51 = vld [vmem:[%s1556_s3 + $0x18] sm:$0xf0]  ;;  %vm574_vm1 = vcmask 1043456  }
  0x1e   : > { %397 = vmatpush.bf16.msra.mxu0 %v1137_v18  ;;  %v1481_v52 = vld [vmem:[%s316_s28] sm:$0xf]  ;;  %v1042_v54 = vor.u32 %v1143_v50, %v1039_v51  ;;  %v1141_v55 = vld [vmem:[%s1556_s3 + $0x4] sm:$0xf]  ;;  %v1031_v56 = vld [vmem:[%s1556_s3 + $0x8] sm:$0xf0]  ;;  %s324_s28 = scalar_lea.vmem %s1560_s7, %s1459_s27 }
  0x1f   : > { %v327_v53 = vld [vmem:[%s320_s14] sm:$0xf]  ;;  %v1034_v57 = vor.u32 %v1141_v55, %v1031_v56  ;;  %vm558_vm2 = vcmask 64512   ;;  %vm655_vm3 = vcmask 523520   ;;  %vm717_vm4 = vcmask 785920  }
  0x20   : > { %524 = vmatpush.bf16.msra.mxu2 %v1074_v30  ;;  %v423_v58 = vld [vmem:[%s1557_s4] sm:$0x3]  ;;  %vm779_vm5 = vcmask 1048320  }
  0x21   : > { %512 = vmatpush.bf16.msra.mxu1 %v1062_v20  ;;  %v425_v59 = vperm.slane %v423_v58, 0  ;;  %v1496_v60 = vld [vmem:[%s1559_s6] sm:$0xf]  ;;  %v426_v8 = vperm.slane %v423_v58, 1 }
  0x22   : > { %398 = vmatpush.bf16.msra.mxu0 %v1136_v26  ;;  %v345_v63 = vperm.slane %v1496_v60, 0 }
  0x24   : > { %525 = vmatpush.bf16.msra.mxu2 %v1066_v37 }
  0x25   : > { %513 = vmatpush.bf16.msra.mxu1 %v1054_v27 }
  0x26   : > { %399 = vmatpush.bf16.msra.mxu0 %v1135_v33 }
  0x28   : > { %526 = vmatpush.bf16.msra.mxu2 %v1058_v44 }
  0x29   : > { %514 = vmatpush.bf16.msra.mxu1 %v1046_v34 }
  0x2a   : > { %400 = vmatpush.bf16.msra.mxu0 %v1134_v40 }
  0x2c   : > { %527 = vmatpush.bf16.msra.mxu2 %v1050_v49 }
  0x2d   : > { %515 = vmatpush.bf16.msra.mxu1 %v1038_v41 }
  0x2e   : > { %401 = vmatpush.bf16.msra.mxu0 %v1133_v47 }
  0x30   : > { %528 = vmatpush.bf16.msra.mxu2 %v1042_v54 }
  0x31   : > { %516 = vmatpush.bf16.msra.mxu1 %v1030_v48  ;;  %402 = vmatmul.bf16.vlgmr.msra.gmra.mxu0 %v1481_v52 }
  0x34   : > { %517 = vmatmul.bf16.vlgmr.msra.gmra.mxu1 %v327_v53  ;;  %529 = vmatpush.bf16.msra.mxu2 %v1034_v57 }
  0x37   : > { %530 = vmatmul.bf16.vlgmr.msra.gmra.mxu2 %v327_v53 }
  0xae   : > { %v403_v61 = vpop.f32.mrf.mxu0 }
  0xaf   : > { %v404_v2 = vadd.f32 %v403_v61, %v345_v63 }
  0xb1   : > { %v518_v62 = vpop.f32.mrf.mxu1  ;;  %v535_v6 = vpack.c.bf16 %v404_v2, %v404_v2 }
  0xb2   : > { %v519_v0 = vadd.f32 %v518_v62, %v425_v59 }
  0xb4   : > { %v536_v1 = vpack.c.bf16 %v519_v0, %v519_v0 }
  0xb6   : > { %659 = vrot.lane.b32.xlu2 %v536_v1, %s1300_s30  ;;  %596 = vrot.lane.b32.xlu1 %v536_v1, %s1301_s8  ;;  %v543_v3 = vsel %vm538_vm0, %v536_v1, 0  ;;  %v405_v4 = vpop.f32.mrf.mxu0 }
  0xb7   : > { %552 = vmatpush.bf16.xpose.msra.mxu3 %v543_v3 }
  0xb9   : > { %v520_v5 = vpop.f32.mrf.mxu1 }
  0xba   : > { %v531_v7 = vpop.f32.mrf.mxu2 }
  0xbb   : > { %v532_v9 = vadd.f32 %v531_v7, %v426_v8 }
  0xbd   : > { %v1506_v11 = vpack.c.bf16 %v532_v9, %v532_v9 }
  0xbe   : > { %721 = vrot.lane.b32.xlu2 %v536_v1, %s1302_s9  ;;  %593 = vrot.lane.b32.xlu1 %v535_v6, %s1301_s8 }
  0xbf   : > { %1091 = vmatmul.msk.bf16.vlgmr.msra.gmra.mxu3 %vm538_vm0, %v535_v6  ;;  %v576_v12 = vsel %vm574_vm1, %v1506_v11, 0 }
  0xc0   : > { %585 = vmatpush.bf16.msrb.mxu3 %v576_v12 }
  0xc2   : > { %v533_v10 = vpop.f32.mrf.mxu2 }
  0xc6   : > { %719 = vrot.lane.b32.xlu1 %v535_v6, %s1302_s9 }
 0x110   : > { %v660_v13 = vpop.permute.xlu2 %659 }
 0x111   : > { %v665_v14 = vsel %vm538_vm0, %v660_v13, 0 }
 0x112   : > { %674 = vmatpush.bf16.xpose.msrb.mxu2 %v665_v14 }
 0x118   : > { %v722_v28 = vpop.permute.xlu2 %721 }
 0x119   : > { %v727_v30 = vsel %vm538_vm0, %v722_v28, 0 }
 0x128   : > { %v597_v15 = vpop.permute.xlu1 %596 }
 0x129   : > { %v602_v16 = vsel %vm538_vm0, %v597_v15, 0 }
 0x12a   : > { %611 = vmatpush.bf16.xpose.msra.mxu3 %v602_v16 }
 0x130   : > { %v594_v32 = vpop.permute.xlu1 %593 }
 0x138   : > { %v720_v33 = vpop.permute.xlu1 %719 }
 0x142   : > { %v554_v17 = vpop.f32.mrf.mxu3 }
 0x143   : > { %v559_v18 = vsel %vm558_vm2, %v554_v17, -inf }
 0x144   : > { %560 = vmax.xlane.f32.xlu0 %v559_v18 }
 0x14a   : > { %v556_v19 = vpop.f32.mrf.mxu3 }
 0x1b7   : > { %v561_v20 = vpop.xlane.xlu0 %560 }
 0x1b8   : > { %v562_v21 = vsub.f32 %v554_v17, %v561_v20 }
 0x1ba   : > { %v563_v22 = vmul.f32 1.442695, %v562_v21 }
 0x1bc   : > { %1200 = vpow2.f32 %v563_v22  ;;  %v1164_v22 = vld [vmem:[#allocation5 + $0x38] sm:$0xff] }
 0x1bd   : > { %848 = vmatpush.bf16.msrb.mxu1 %v1164_v22 }
 0x1c2   : > { %v1201_v23 = vpop.eup %1200 }
 0x1c3   : > { %v565_v24 = vsel %vm558_vm2, %v1201_v23, 0.0 }
 0x1c4   : > { %566 = vadd.xlane.f32.xlu0 %v565_v24  ;;  %v1162_v24 = vld [vmem:[#allocation5 + $0x28] sm:$0xff] }
 0x1d8   : > { %657 = vrot.lane.b32.xlu0 %v535_v6, %s1300_s30 }
 0x237   : > { %v567_v25 = vpop.xlane.xlu0 %566 }
 0x238   : > { %1202 = vrcp.f32 %v567_v25  ;;  %v1161_v25 = vld [vmem:[#allocation5 + $0x20] sm:$0xff] }
 0x23e   : > { %v1203_v26 = vpop.eup %1202 }
 0x23f   : > { %v569_v27 = vmul.f32 %v1203_v26, %v1201_v23  ;;  %v1163_v23 = vld [vmem:[#allocation5 + $0x30] sm:$0xff]  ;;  %v1160_v26 = vld [vmem:[#allocation5 + $0x18] sm:$0xff] }
 0x240   : > { %849 = vmatpush.bf16.msrb.mxu1 %v1163_v23 }
 0x241   : > { %v570_v29 = vpack.c.bf16 %v569_v27, %v569_v27  ;;  %v1159_v27 = vld [vmem:[#allocation5 + $0x10] sm:$0xff] }
 0x243   : > { %1092 = vmatmul.msk.bf16.vlgmr.msrb.gmra.mxu3 %vm558_vm2, %v570_v29 }
 0x244   : > { %736 = vmatpush.bf16.xpose.msrb.mxu3 %v727_v30  ;;  %850 = vmatpush.bf16.msrb.mxu1 %v1162_v24  ;;  %v1158_v30 = vld [vmem:[#allocation5 + $0x8] sm:$0xff] }
 0x248   : > { %851 = vmatpush.bf16.msrb.mxu1 %v1161_v25 }
 0x24a   : > { %v658_v31 = vpop.permute.xlu0 %657 }
 0x24b   : > { %1095 = vmatmul.msk.bf16.vlgmr.msrb.gmra.mxu2 %vm538_vm0, %v658_v31  ;;  %v1157_v31 = vld [vmem:[#allocation5] sm:$0xff] }
 0x24c   : > { %852 = vmatpush.bf16.msrb.mxu1 %v1160_v26 }
 0x250   : > { %853 = vmatpush.bf16.msrb.mxu1 %v1159_v27 }
 0x253   : > { %1093 = vmatmul.msk.bf16.vlgmr.msra.gmra.mxu3 %vm538_vm0, %v594_v32 }
 0x254   : > { %854 = vmatpush.bf16.msrb.mxu1 %v1158_v30 }
 0x258   : > { %855 = vmatpush.bf16.msrb.mxu1 %v1157_v31 }
 0x263   : > { %1097 = vmatmul.msk.bf16.vlgmr.msrb.gmra.mxu3 %vm538_vm0, %v720_v33 }
 0x2c6   : > { %v587_v34 = vpop.f32.mrf.mxu3 }
 0x2c7   : > { %591 = vst.msk [vmem:[#allocation2] sm:$0xff] %vm538_vm0, %v587_v34 }
 0x2ce   : > { %v589_v35 = vpop.f32.mrf.mxu3  ;;  %v676_v36 = vpop.f32.mrf.mxu2 }
 0x2cf   : > { %v680_v37 = vsel %vm558_vm2, %v676_v36, -inf  ;;  %v799_v35 = vperm.slane %v1496_v60, 1 }
 0x2d0   : > { %681 = vmax.xlane.f32.xlu1 %v680_v37 }
 0x2d6   : > { %v613_v38 = vpop.f32.mrf.mxu3  ;;  %v678_v39 = vpop.f32.mrf.mxu2 }
 0x2d7   : > { %v617_v40 = vsel %vm558_vm2, %v613_v38, -inf }
 0x2d8   : > { %618 = vmax.xlane.f32.xlu2 %v617_v40 }
 0x2de   : > { %v615_v41 = vpop.f32.mrf.mxu3 }
 0x2df   : > { %v1303_v41 = vmov 128.0  }
 0x2e6   : > { %v738_v42 = vpop.f32.mrf.mxu3 }
 0x2e7   : > { %v742_v43 = vsel %vm558_vm2, %v738_v42, -inf }
 0x2e8   : > { %743 = vmax.xlane.f32.xlu0 %v742_v43 }
 0x2ee   : > { %v740_v44 = vpop.f32.mrf.mxu3 }
 0x2fc   : > { %692 = vrot.lane.b32.xlu0 %v1506_v11, %s1300_s30 }
 0x343   : > { %v682_v45 = vpop.xlane.xlu1 %681 }
 0x344   : > { %v683_v46 = vsub.f32 %v676_v36, %v682_v45  ;;  %v861_v36 = vunpack.c.l.bf16 %v1481_v52 }
 0x346   : > { %v684_v47 = vmul.f32 1.442695, %v683_v46 }
 0x348   : > { %1204 = vpow2.f32 %v684_v47 }
 0x34b   : > { %v619_v48 = vpop.xlane.xlu2 %618 }
 0x34c   : > { %v620_v49 = vsub.f32 %v613_v38, %v619_v48 }
 0x34e   : > { %v1205_v50 = vpop.eup %1204  ;;  %v621_v51 = vmul.f32 1.442695, %v620_v49 }
 0x34f   : > { %v686_v53 = vsel %vm558_vm2, %v1205_v50, 0.0 }
 0x350   : > { %1206 = vpow2.f32 %v621_v51  ;;  %687 = vadd.xlane.f32.xlu1 %v686_v53 }
 0x356   : > { %v1207_v54 = vpop.eup %1206 }
 0x357   : > { %v623_v55 = vsel %vm558_vm2, %v1207_v54, 0.0 }
 0x358   : > { %624 = vadd.xlane.f32.xlu2 %v623_v55 }
 0x35b   : > { %v744_v56 = vpop.xlane.xlu0 %743 }
 0x35c   : > { %v745_v57 = vsub.f32 %v738_v42, %v744_v56 }
 0x35e   : > { %v746_v58 = vmul.f32 1.442695, %v745_v57 }
 0x360   : > { %1208 = vpow2.f32 %v746_v58 }
 0x366   : > { %v1209_v59 = vpop.eup %1208 }
 0x367   : > { %v748_v61 = vsel %vm558_vm2, %v1209_v59, 0.0 }
 0x368   : > { %749 = vadd.xlane.f32.xlu1 %v748_v61 }
 0x36e   : > { %v693_v62 = vpop.permute.xlu0 %692 }
 0x36f   : > { %v698_v63 = vsel %vm574_vm1, %v693_v62, 0  ;;  %v890_v62 = vperm.slane %v1496_v60, 2 }
 0x370   : > { %630 = vrot.lane.b32.xlu2 %v1506_v11, %s1301_s8  ;;  %707 = vmatpush.bf16.msra.mxu2 %v698_v63 }
 0x381   : > { %754 = vrot.lane.b32.xlu1 %v1506_v11, %s1302_s9 }
 0x3c3   : > { %v688_v0 = vpop.xlane.xlu1 %687 }
 0x3c4   : > { %1210 = vrcp.f32 %v688_v0  ;;  %v892_v0 = vperm.slane %v1496_v60, 3 }
 0x3ca   : > { %v1211_v1 = vpop.eup %1210 }
 0x3cb   : > { %v690_v2 = vmul.f32 %v1211_v1, %v1205_v50  ;;  %v625_v3 = vpop.xlane.xlu2 %624 }
 0x3cc   : > { %1212 = vrcp.f32 %v625_v3 }
 0x3cd   : > { %v691_v4 = vpack.c.bf16 %v690_v2, %v690_v2 }
 0x3cf   : > { %1096 = vmatmul.msk.bf16.vlgmr.msra.gmra.mxu2 %vm558_vm2, %v691_v4 }
 0x3d2   : > { %v1213_v5 = vpop.eup %1212 }
 0x3d3   : > { %v627_v6 = vmul.f32 %v1213_v5, %v1207_v54  ;;  %v631_v7 = vpop.permute.xlu2 %630 }
 0x3d4   : > { %v636_v8 = vsel %vm574_vm1, %v631_v7, 0 }
 0x3d5   : > { %645 = vmatpush.bf16.msrb.mxu0 %v636_v8  ;;  %v628_v9 = vpack.c.bf16 %v627_v6, %v627_v6 }
 0x3d8   : > { %1094 = vmatmul.msk.bf16.vlgmr.msrb.gmra.mxu0 %vm558_vm2, %v628_v9 }
 0x3db   : > { %v750_v10 = vpop.xlane.xlu1 %749 }
 0x3dc   : > { %1214 = vrcp.f32 %v750_v10 }
 0x3dd   : > { %1216 = vrcp.f32 %v1303_v41 }
 0x3e2   : > { %v1215_v11 = vpop.eup %1214 }
 0x3e3   : > { %v752_v12 = vmul.f32 %v1215_v11, %v1209_v59  ;;  %v1217_v42 = vpop.eup %1216 }
 0x3e4   : > { %v866_v43 = vmul.f32 128.0, %v1217_v42  ;;  %vm870_vm6 = vweird.f32 %v1217_v42 }
 0x3e5   : > { %v753_v15 = vpack.c.bf16 %v752_v12, %v752_v12 }
 0x3e6   : > { %v867_v44 = vsub.f32 1.0, %v866_v43 }
 0x3e8   : > { %v868_v45 = vmul.f32 %v1217_v42, %v867_v44 }
 0x3ea   : > { %v869_v46 = vadd.f32 %v1217_v42, %v868_v45 }
 0x3ec   : > { %v871_v47 = vsel %vm870_vm6, %v1217_v42, %v869_v46 }
 0x3f3   : > { %v755_v13 = vpop.permute.xlu1 %754 }
 0x3f4   : > { %v760_v14 = vsel %vm574_vm1, %v755_v13, 0 }
 0x3f5   : > { %769 = vmatpush.bf16.msra.mxu0 %v760_v14 }
 0x3f8   : > { %1098 = vmatmul.msk.bf16.vlgmr.msra.gmra.mxu0 %vm558_vm2, %v753_v15 }
 0x452   : > { %v709_v16 = vpop.f32.mrf.mxu2 }
 0x455   : > { %v647_v17 = vpop.f32.mrf.mxu0 }
 0x456   : > { %652 = vrot.lane.b32.xlu2 %v647_v17, %s1302_s9 }
 0x45a   : > { %v711_v18 = vpop.f32.mrf.mxu2 }
 0x45d   : > { %v649_v19 = vpop.f32.mrf.mxu0 }
 0x45e   : > { %714 = vrot.lane.b32.xlu2 %v709_v16, %s1300_s30 }
 0x475   : > { %v771_v20 = vpop.f32.mrf.mxu0 }
 0x476   : > { %776 = vrot.lane.b32.xlu0 %v771_v20, %s1301_s8 }
 0x47d   : > { %v773_v21 = vpop.f32.mrf.mxu0 }
 0x4b0   : > { %v653_v28 = vpop.permute.xlu2 %652 }
 0x4b1   : > { %656 = vst.msk [vmem:[#allocation2] sm:$0xff] %vm655_vm3, %v653_v28 }
 0x4b8   : > { %v715_v29 = vpop.permute.xlu2 %714 }
 0x4b9   : > { %718 = vst.msk [vmem:[#allocation2] sm:$0xff] %vm717_vm4, %v715_v29 }
 0x4e8   : > { %v777_v32 = vpop.permute.xlu0 %776 }
 0x4e9   : > { %780 = vst.msk [vmem:[#allocation2] sm:$0xff] %vm779_vm5, %v777_v32 }
 0x4f0   : > { %v781_v33 = vld [vmem:[#allocation2] sm:$0xff] }
 0x4f1   : > { %v782_v34 = vpack.c.bf16 %v781_v33, %v781_v33 }
 0x4f3   : > { %856 = vmatmul.bf16.vlgmr.msrb.gmra.mxu1 %v782_v34 }
 0x570   : > { %v857_v37 = vpop.f32.mrf.mxu1 }
 0x571   : > { %v858_v38 = vadd.f32 %v857_v37, %v799_v35 }
 0x573   : > { %v862_v39 = vadd.f32 %v861_v36, %v858_v38 }
 0x575   : > { %863 = vadd.xlane.f32.xlu2 %v862_v39 }
 0x578   : > { %v859_v40 = vpop.f32.mrf.mxu1 }
 0x5e8   : > { %v864_v48 = vpop.xlane.xlu2 %863 }
 0x5e9   : > { %v872_v49 = vmul.f32 %v871_v47, %v864_v48 }
 0x5eb   : > { %v873_v50 = vsub.f32 %v862_v39, %v872_v49 }
 0x5ed   : > { %v874_v51 = vmul.f32 %v873_v50, %v873_v50 }
 0x5ef   : > { %875 = vadd.xlane.f32.xlu0 %v874_v51 }
 0x662   : > { %v876_v52 = vpop.xlane.xlu0 %875 }
 0x663   : > { %v877_v53 = vmul.f32 %v876_v52, %v871_v47 }
 0x665   : > { %v878_v54 = vadd.f32 1e-05, %v877_v53 }
 0x667   : > { %1218 = vrsqrt.f32 %v878_v54  ;;  %vm885_vm8 = vweird.f32 %v878_v54 }
 0x66d   : > { %v1219_v55 = vpop.eup %1218 }
 0x66e   : > { %v880_v56 = vmul.f32 %v1219_v55, %v878_v54  ;;  %vm886_vm7 = vweird.f32 %v1219_v55 }
 0x66f   : > { %vm887_vm9 = vmor %vm885_vm8, %vm886_vm7 }
 0x670   : > { %v881_v57 = vmul.f32 %v1219_v55, %v880_v56 }
 0x672   : > { %v882_v58 = vmul.f32 0.5, %v881_v57 }
 0x674   : > { %v883_v59 = vsub.f32 1.5, %v882_v58 }
 0x676   : > { %v884_v61 = vmul.f32 %v1219_v55, %v883_v59 }
 0x678   : > { %v888_v63 = vsel %vm887_vm9, %v1219_v55, %v884_v61 }
 0x679   : > { %v889_v1 = vmul.f32 %v888_v63, %v873_v50 }
 0x67b   : > { %v891_v2 = vmul.f32 %v890_v62, %v889_v1 }
 0x67d   : > { %v893_v3 = vadd.f32 %v892_v0, %v891_v2 }
 0x67f   : > { %v894_v4 = vpack.c.bf16 %v893_v3, %v893_v3 }
 0x681   : > { %895 = vst [vmem:[%s324_s28] sm:$0xf] %v894_v4 }
 0x682 PF: > { %s19_s24 = sadd.s32 1, %s1294_s24  }
 0x683   : > { %p16_p7 = scmp.ge.s32.totalorder %s19_s24, 4  }
 0x685   :  { %18 = sbr.rel (!%p16_p7) target bundleno = 2 (0x2), region = 90 }
 0x68a   :  { %915 = vsyncpa [#allocation4], 1 }
 0x68b   :  { %917 = vsyncpa [#allocation4 + $0x1], 1 }
 0x68c   :  { %918 = vsyncpa [#allocation6], 1 }

// kernel: transformer_decoder.8
= control target key start
LH: loop header
LB: loop body
LE: loop exit
PB: predicated region body
PF: predicated region fallthrough
CT: control target
= control target key end

     0   :  { %10 = vsyncpa [#allocation4], 0  ;;  %s738_s0 = inlined_call_operand.vmem [shape: bf16[16,128], index: 0, kind: input, shape index: {}]   ;;  %s739_s1 = inlined_call_operand.hbm [shape: bf16[128,256], index: 1, kind: input, shape index: {}]   ;;  %s740_s2 = inlined_call_operand.vmem [shape: f32[1,256], index: 2, kind: input, shape index: {}]   ;;  %s741_s3 = inlined_call_operand.hbm [shape: bf16[256,128], index: 3, kind: input, shape index: {}]   ;;  %s742_s4 = inlined_call_operand.vmem [shape: f32[3,128], index: 4, kind: input, shape index: {}]   ;;  %s743_s5 = inlined_call_operand.vmem [shape: bf16[16,128], index: 5, kind: output, shape index: {}]  }
   0x1   :  { %s18_s20 = sshll.u32 %s739_s1, 4  ;;  %s19_s20 = int_to_ptr.hbm [resolvable:$true] %s18_s20 }
   0x2   :  { %11 = vsyncpa [#allocation6], 0  ;;  %s675_s21 = smov [#allocation3]   ;;  %s33_s25 = sshll.u32 %s741_s3, 4  ;;  %s34_s25 = int_to_ptr.hbm [resolvable:$true] %s33_s25 }
   0x3   :  { %s20_s22 = sshll.u32 %s675_s21, 4  ;;  %s676_s26 = smov 128   ;;  %s21_s22 = int_to_ptr.vmem [resolvable:$true] %s20_s22 }
   0x4   :  { %s677_s27 = smov 8   ;;  %s678_s28 = smov [#allocation5]  }
   0x5   :  { %26 = dma.hbm_to_vmem [thread:$0]  %s19_s20, 2048, %s21_s22, [#allocation4], %s676_s26, %s676_s26, %s677_s27  }
   0x6   :  { %s35_s29 = sshll.u32 %s678_s28, 4  ;;  %s679_s30 = smov 64   ;;  %s36_s29 = int_to_ptr.vmem [resolvable:$true] %s35_s29 }
   0x7   :  { %s680_s6 = smov 4  }
   0x8   :  { %41 = dma.hbm_to_vmem [thread:$0]  %s34_s25, 2048, %s36_s29, [#allocation6], %s679_s30, %s679_s30, %s680_s6  }
   0x9   :  { %671 = dma.done.wait [#allocation4], 2048  }
   0xa   :  { %672 = vsyncadd [#allocation4], 4294965248 }
   0xb   :  { %673 = dma.done.wait [#allocation6], 2048  }
   0xc   :  { %674 = vsyncadd [#allocation6], 4294965248  ;;  %v502_v0 = vld [vmem:[#allocation3 + $0x70] sm:$0xf]  ;;  %v588_v1 = vld [vmem:[#allocation3 + $0x74] sm:$0xf0] }
   0xd   :  { %v587_v2 = vld [vmem:[#allocation3 + $0x74] sm:$0xf]  ;;  %v503_v3 = vor.u32 %v588_v1, %v502_v0  ;;  %v504_v4 = vld [vmem:[#allocation3 + $0x78] sm:$0xf0]  ;;  %v494_v5 = vld [vmem:[#allocation3 + $0x60] sm:$0xf] }
   0xe   :  { %v586_v6 = vld [vmem:[#allocation3 + $0x64] sm:$0xf0]  ;;  %v507_v7 = vor.u32 %v587_v2, %v504_v4  ;;  %v585_v8 = vld [vmem:[#allocation3 + $0x64] sm:$0xf]  ;;  %v496_v9 = vld [vmem:[#allocation3 + $0x68] sm:$0xf0] }
   0xf   :  { %168 = vmatpush.bf16.msra.mxu0 %v503_v3  ;;  %v495_v10 = vor.u32 %v586_v6, %v494_v5  ;;  %v499_v11 = vor.u32 %v585_v8, %v496_v9  ;;  %v486_v12 = vld [vmem:[#allocation3 + $0x50] sm:$0xf]  ;;  %v584_v13 = vld [vmem:[#allocation3 + $0x54] sm:$0xf0]  ;;  %v583_v14 = vld [vmem:[#allocation3 + $0x54] sm:$0xf] }
  0x10   :  { %182 = vmatpush.bf16.msra.mxu1 %v507_v7  ;;  %v488_v15 = vld [vmem:[#allocation3 + $0x58] sm:$0xf0]  ;;  %v487_v16 = vor.u32 %v584_v13, %v486_v12  ;;  %v478_v18 = vld [vmem:[#allocation3 + $0x40] sm:$0xf]  ;;  %v582_v19 = vld [vmem:[#allocation3 + $0x44] sm:$0xf0] }
  0x11   :  { %v491_v17 = vor.u32 %v583_v14, %v488_v15  ;;  %v581_v20 = vld [vmem:[#allocation3 + $0x44] sm:$0xf]  ;;  %v480_v21 = vld [vmem:[#allocation3 + $0x48] sm:$0xf0]  ;;  %v479_v22 = vor.u32 %v582_v19, %v478_v18  ;;  %v596_v23 = vld [vmem:[#allocation5 + $0x38] sm:$0xff] }
  0x12   :  { %v604_v24 = vld [vmem:[#allocation5 + $0x78] sm:$0xff]  ;;  %v483_v25 = vor.u32 %v581_v20, %v480_v21  ;;  %v470_v26 = vld [vmem:[#allocation3 + $0x30] sm:$0xf]  ;;  %v579_v28 = vld [vmem:[#allocation3 + $0x34] sm:$0xf]  ;;  %332 = vmatpush.bf16.msra.mxu2 %v596_v23 }
  0x13   :  { %169 = vmatpush.bf16.msra.mxu0 %v495_v10  ;;  %v580_v27 = vld [vmem:[#allocation3 + $0x34] sm:$0xf0]  ;;  %v472_v29 = vld [vmem:[#allocation3 + $0x38] sm:$0xf0]  ;;  %346 = vmatpush.bf16.msra.mxu3 %v604_v24  ;;  %v595_v30 = vld [vmem:[#allocation5 + $0x30] sm:$0xff] }
  0x14   :  { %183 = vmatpush.bf16.msra.mxu1 %v499_v11  ;;  %v603_v31 = vld [vmem:[#allocation5 + $0x70] sm:$0xff]  ;;  %v471_v32 = vor.u32 %v580_v27, %v470_v26  ;;  %v475_v33 = vor.u32 %v579_v28, %v472_v29  ;;  %v462_v34 = vld [vmem:[#allocation3 + $0x20] sm:$0xf]  ;;  %v578_v35 = vld [vmem:[#allocation3 + $0x24] sm:$0xf0] }
  0x15   :  { %v577_v36 = vld [vmem:[#allocation3 + $0x24] sm:$0xf]  ;;  %v464_v37 = vld [vmem:[#allocation3 + $0x28] sm:$0xf0]  ;;  %v463_v40 = vor.u32 %v578_v35, %v462_v34  ;;  %v454_v42 = vld [vmem:[#allocation3 + $0x10] sm:$0xf] }
  0x16   :  { %333 = vmatpush.bf16.msra.mxu2 %v595_v30  ;;  %v594_v38 = vld [vmem:[#allocation5 + $0x28] sm:$0xff]  ;;  %v467_v41 = vor.u32 %v577_v36, %v464_v37  ;;  %v576_v43 = vld [vmem:[#allocation3 + $0x14] sm:$0xf0]  ;;  %v575_v44 = vld [vmem:[#allocation3 + $0x14] sm:$0xf] }
  0x17   :  { %170 = vmatpush.bf16.msra.mxu0 %v487_v16  ;;  %347 = vmatpush.bf16.msra.mxu3 %v603_v31  ;;  %v602_v39 = vld [vmem:[#allocation5 + $0x68] sm:$0xff]  ;;  %v456_v45 = vld [vmem:[#allocation3 + $0x18] sm:$0xf0]  ;;  %v593_v46 = vld [vmem:[#allocation5 + $0x20] sm:$0xff]  ;;  %v455_v48 = vor.u32 %v576_v43, %v454_v42 }
  0x18   :  { %184 = vmatpush.bf16.msra.mxu1 %v491_v17  ;;  %v601_v47 = vld [vmem:[#allocation5 + $0x60] sm:$0xff]  ;;  %v459_v49 = vor.u32 %v575_v44, %v456_v45  ;;  %v574_v51 = vld [vmem:[#allocation3 + $0x4] sm:$0xf0]  ;;  %v448_v53 = vld [vmem:[#allocation3 + $0x8] sm:$0xf0] }
  0x19   :  { %v446_v50 = vld [vmem:[#allocation3] sm:$0xf]  ;;  %v573_v52 = vld [vmem:[#allocation3 + $0x4] sm:$0xf]  ;;  %v592_v57 = vld [vmem:[#allocation5 + $0x18] sm:$0xff] }
  0x1a   :  { %334 = vmatpush.bf16.msra.mxu2 %v594_v38  ;;  %v447_v54 = vor.u32 %v574_v51, %v446_v50  ;;  %v451_v55 = vor.u32 %v573_v52, %v448_v53  ;;  %v572_v56 = vld [vmem:[%s738_s0] sm:$0xff]  ;;  %v600_v58 = vld [vmem:[#allocation5 + $0x58] sm:$0xff]  ;;  %v591_v59 = vld [vmem:[#allocation5 + $0x10] sm:$0xff] }
  0x1b   :  { %171 = vmatpush.bf16.msra.mxu0 %v479_v22  ;;  %348 = vmatpush.bf16.msra.mxu3 %v602_v39  ;;  %v599_v60 = vld [vmem:[#allocation5 + $0x50] sm:$0xff]  ;;  %v590_v61 = vld [vmem:[#allocation5 + $0x8] sm:$0xff]  ;;  %v589_v63 = vld [vmem:[#allocation5] sm:$0xff] }
  0x1c   :  { %185 = vmatpush.bf16.msra.mxu1 %v483_v25  ;;  %v598_v62 = vld [vmem:[#allocation5 + $0x48] sm:$0xff]  ;;  %v597_v0 = vld [vmem:[#allocation5 + $0x40] sm:$0xff] }
  0x1d   :  { %v76_v1 = vld [vmem:[%s740_s2] sm:$0x3] }
  0x1e   :  { %335 = vmatpush.bf16.msra.mxu2 %v593_v46  ;;  %v78_v4 = vperm.slane %v76_v1, 0  ;;  %v79_v5 = vperm.slane %v76_v1, 1  ;;  %v727_v18 = vld [vmem:[%s742_s4] sm:$0x7] }
  0x1f   :  { %172 = vmatpush.bf16.msra.mxu0 %v471_v32  ;;  %349 = vmatpush.bf16.msra.mxu3 %v601_v47  ;;  %v58_v19 = vld [vmem:[%s738_s0] sm:$0xff]   ;;  %v370_v21 = vperm.slane %v727_v18, 0 }
  0x20   :  { %186 = vmatpush.bf16.msra.mxu1 %v475_v33  ;;  %v373_v24 = vunpack.c.l.bf16 %v58_v19  ;;  %v374_v30 = vunpack.c.h.bf16 %v58_v19  ;;  %v681_v33 = vmov 128.0  }
  0x21   :  { %617 = vrcp.f32 %v681_v33 }
  0x22   :  { %336 = vmatpush.bf16.msra.mxu2 %v592_v57 }
  0x23   :  { %173 = vmatpush.bf16.msra.mxu0 %v463_v40  ;;  %350 = vmatpush.bf16.msra.mxu3 %v600_v58 }
  0x24   :  { %187 = vmatpush.bf16.msra.mxu1 %v467_v41 }
  0x26   :  { %337 = vmatpush.bf16.msra.mxu2 %v591_v59 }
  0x27   :  { %174 = vmatpush.bf16.msra.mxu0 %v455_v48  ;;  %351 = vmatpush.bf16.msra.mxu3 %v599_v60  ;;  %v618_v34 = vpop.eup %617 }
  0x28   :  { %188 = vmatpush.bf16.msra.mxu1 %v459_v49  ;;  %v382_v35 = vmul.f32 128.0, %v618_v34  ;;  %vm386_vm0 = vweird.f32 %v618_v34 }
  0x2a   :  { %338 = vmatpush.bf16.msra.mxu2 %v590_v61  ;;  %v383_v36 = vsub.f32 1.0, %v382_v35 }
  0x2b   :  { %175 = vmatpush.bf16.msra.mxu0 %v447_v54  ;;  %352 = vmatpush.bf16.msra.mxu3 %v598_v62 }
  0x2c   :  { %189 = vmatpush.bf16.msra.mxu1 %v451_v55  ;;  %v384_v37 = vmul.f32 %v618_v34, %v383_v36 }
  0x2e   :  { %176 = vmatmul.bf16.vlgmr.msra.gmra.mxu0 %v572_v56  ;;  %339 = vmatpush.bf16.msra.mxu2 %v589_v63  ;;  %v385_v38 = vadd.f32 %v618_v34, %v384_v37 }
  0x2f   :  { %190 = vmatmul.bf16.vlgmr.msra.gmra.mxu1 %v572_v56  ;;  %353 = vmatpush.bf16.msra.mxu3 %v597_v0 }
  0x30   :  { %v387_v39 = vsel %vm386_vm0, %v618_v34, %v385_v38 }
  0xab   :  { %v177_v2 = vpop.f32.mrf.mxu0 }
  0xac   :  { %v191_v3 = vpop.f32.mrf.mxu1  ;;  %v178_v6 = vadd.f32 %v177_v2, %v78_v4  ;;  %v424_v2 = vperm.slane %v727_v18, 1 }
  0xad   :  { %v192_v7 = vadd.f32 %v191_v3, %v79_v5 }
  0xae   :  { %v196_v12 = vmax.f32 %v178_v6, 0.0  ;;  %v427_v6 = vperm.slane %v727_v18, 2 }
  0xaf   :  { %v197_v14 = vmax.f32 %v192_v7, 0.0 }
  0xb3   :  { %v179_v8 = vpop.f32.mrf.mxu0 }
  0xb4   :  { %v180_v9 = vadd.f32 %v179_v8, %v78_v4  ;;  %v193_v10 = vpop.f32.mrf.mxu1 }
  0xb5   :  { %v194_v11 = vadd.f32 %v193_v10, %v79_v5 }
  0xb6   :  { %v198_v13 = vmax.f32 %v180_v9, 0.0 }
  0xb7   :  { %v199_v15 = vmax.f32 %v194_v11, 0.0 }
  0xb8   :  { %v202_v16 = vpack.c.bf16 %v198_v13, %v196_v12 }
  0xb9   :  { %v203_v17 = vpack.c.bf16 %v199_v15, %v197_v14 }
  0xba   :  { %340 = vmatmul.bf16.vlgmr.msra.gmra.mxu2 %v202_v16 }
  0xbb   :  { %354 = vmatmul.bf16.vlgmr.msra.gmra.mxu3 %v203_v17 }
 0x13d   :  { %v341_v20 = vpop.f32.mrf.mxu2 }
 0x13e   :  { %v355_v22 = vpop.f32.mrf.mxu3 }
 0x13f   :  { %v356_v23 = vadd.f32 %v355_v22, %v341_v20 }
 0x141   :  { %v371_v25 = vadd.f32 %v370_v21, %v356_v23 }
 0x143   :  { %v375_v26 = vadd.f32 %v373_v24, %v371_v25 }
 0x145   :  { %377 = vadd.xlane.f32.xlu0 %v375_v26  ;;  %v343_v27 = vpop.f32.mrf.mxu2 }
 0x146   :  { %v357_v28 = vpop.f32.mrf.mxu3 }
 0x147   :  { %v358_v29 = vadd.f32 %v357_v28, %v343_v27 }
 0x149   :  { %v372_v31 = vadd.f32 %v370_v21, %v358_v29 }
 0x14b   :  { %v376_v32 = vadd.f32 %v374_v30, %v372_v31 }
 0x14d   :  { %379 = vadd.xlane.f32.xlu0 %v376_v32 }
 0x1b8   :  { %v378_v40 = vpop.xlane.xlu0 %377 }
 0x1b9   :  { %v388_v41 = vmul.f32 %v387_v39, %v378_v40 }
 0x1bb   :  { %v390_v42 = vsub.f32 %v375_v26, %v388_v41 }
 0x1bd   :  { %v392_v43 = vmul.f32 %v390_v42, %v390_v42 }
 0x1bf   :  { %394 = vadd.xlane.f32.xlu1 %v392_v43 }
 0x1c0   :  { %v380_v44 = vpop.xlane.xlu0 %379 }
 0x1c1   :  { %v389_v45 = vmul.f32 %v387_v39, %v380_v44 }
 0x1c3   :  { %v391_v46 = vsub.f32 %v376_v32, %v389_v45 }
 0x1c5   :  { %v393_v47 = vmul.f32 %v391_v46, %v391_v46 }
 0x1c7   :  { %396 = vadd.xlane.f32.xlu1 %v393_v47 }
 0x232   :  { %v395_v48 = vpop.xlane.xlu1 %394 }
 0x233   :  { %v398_v49 = vmul.f32 %v395_v48, %v387_v39 }
 0x235   :  { %v400_v50 = vadd.f32 1e-05, %v398_v49 }
 0x237   :  { %619 = vrsqrt.f32 %v400_v50  ;;  %vm408_vm2 = vweird.f32 %v400_v50 }
 0x23a   :  { %v397_v51 = vpop.xlane.xlu1 %396 }
 0x23b   :  { %v399_v52 = vmul.f32 %v397_v51, %v387_v39 }
 0x23d   :  { %v620_v53 = vpop.eup %619  ;;  %v401_v54 = vadd.f32 1e-05, %v399_v52 }
 0x23e   :  { %v403_v55 = vmul.f32 %v620_v53, %v400_v50  ;;  %vm409_vm1 = vweird.f32 %v620_v53 }
 0x23f   :  { %621 = vrsqrt.f32 %v401_v54  ;;  %vm410_vm3 = vmor %vm408_vm2, %vm409_vm1  ;;  %vm418_vm5 = vweird.f32 %v401_v54 }
 0x240   :  { %v404_v56 = vmul.f32 %v620_v53, %v403_v55 }
 0x242   :  { %v405_v57 = vmul.f32 0.5, %v404_v56 }
 0x244   :  { %v406_v58 = vsub.f32 1.5, %v405_v57 }
 0x245   :  { %v622_v59 = vpop.eup %621 }
 0x246   :  { %v407_v60 = vmul.f32 %v620_v53, %v406_v58  ;;  %v413_v61 = vmul.f32 %v622_v59, %v401_v54  ;;  %vm419_vm4 = vweird.f32 %v622_v59 }
 0x247   :  { %vm420_vm6 = vmor %vm418_vm5, %vm419_vm4 }
 0x248   :  { %v414_v62 = vmul.f32 %v622_v59, %v413_v61  ;;  %v411_v63 = vsel %vm410_vm3, %v620_v53, %v407_v60 }
 0x249   :  { %v422_v3 = vmul.f32 %v411_v63, %v390_v42 }
 0x24a   :  { %v415_v0 = vmul.f32 0.5, %v414_v62 }
 0x24b   :  { %v425_v7 = vmul.f32 %v424_v2, %v422_v3 }
 0x24c   :  { %v416_v1 = vsub.f32 1.5, %v415_v0 }
 0x24d   :  { %v428_v10 = vadd.f32 %v427_v6, %v425_v7 }
 0x24e   :  { %v417_v4 = vmul.f32 %v622_v59, %v416_v1 }
 0x250   :  { %v421_v5 = vsel %vm420_vm6, %v622_v59, %v417_v4 }
 0x251   :  { %v423_v8 = vmul.f32 %v421_v5, %v391_v46 }
 0x253   :  { %v426_v9 = vmul.f32 %v424_v2, %v423_v8 }
 0x255   :  { %v429_v11 = vadd.f32 %v427_v6, %v426_v9 }
 0x257   :  { %v608_v12 = vpack.c.bf16 %v429_v11, %v428_v10 }
 0x259   :  { %609 = vst [vmem:[%s743_s5] sm:$0xff] %v608_v12  }
 0x25a   :  { %438 = vsyncpa [#allocation4], 1 }
 0x25b   :  { %439 = vsyncpa [#allocation6], 1 }

// kernel: transformer_decoder.6
= control target key start
LH: loop header
LB: loop body
LE: loop exit
PB: predicated region body
PF: predicated region fallthrough
CT: control target
= control target key end

     0   :  { %10 = vsyncpa [#allocation4], 0  ;;  %s1375_s0 = inlined_call_operand.vmem [shape: bf16[2,8,128], index: 0, kind: input, shape index: {}]   ;;  %s1376_s1 = inlined_call_operand.hbm [shape: bf16[128,384], index: 1, kind: input, shape index: {}]   ;;  %s1377_s2 = inlined_call_operand.vmem [shape: f32[1,384], index: 2, kind: input, shape index: {}]   ;;  %s1378_s3 = inlined_call_operand.hbm [shape: bf16[128,128], index: 3, kind: input, shape index: {}]   ;;  %s1379_s4 = inlined_call_operand.vmem [shape: f32[3,128], index: 4, kind: input, shape index: {}]   ;;  %s1380_s5 = inlined_call_operand.vmem [shape: bf16[2,8,128], index: 5, kind: output, shape index: {}]  }
   0x1   :  { %11 = vsyncpa [#allocation6], 0  ;;  %s1263_s18 = smov 0  }
   0x2 LB: > { %s169_s21 = sshll.u32 %s1376_s1, 4  ;;  %s1272_s22 = sadd.s32 4294967295, %s1221_s18   ;;  %s1221_s18 = sphi %s1263_s18, %s17_s18   ;;  %s170_s21 = int_to_ptr.hbm [resolvable:$true] %s169_s21 }
   0x3   : > { %p911_p0 = scmp.ge.s32.totalorder %s1221_s18, 1  ;;  %p158_p1 = scmp.lt.s32.totalorder %s1221_s18, 3 }
   0x4   : > { %p1105_p2 = scmp.eq.s32.totalorder %s1272_s22, 0  ;;  %s1223_s24 = smov [#allocation3]  }
   0x5   : > { %p1277_p3 = pnand %p911_p0, %p158_p1  ;;  %s171_s25 = sshll.u32 %s1223_s24, 4  ;;  %s172_s25 = int_to_ptr.vmem [resolvable:$true] %s171_s25 }
   0x6   : > { %s186_s28 = sshll.u32 %s1378_s3, 4  ;;  %s1224_s29 = smov [#allocation5]   ;;  %s187_s28 = int_to_ptr.hbm [resolvable:$true] %s186_s28 }
   0x7   : > { %p1098_p4 = pneg %p1277_p3  ;;  %s188_s30 = sshll.u32 %s1224_s29, 4  ;;  %s189_s30 = int_to_ptr.vmem [resolvable:$true] %s188_s30 }
   0x8   : > { %s1225_s6 = smov 192   ;;  %s1226_s7 = smov 12  }
   0x9   : > { %p1099_p5 = pnand %p1105_p2, %p1098_p4  ;;  %s1227_s8 = smov 64  }
   0xa   : > { %s1228_s9 = smov 4   ;;  %214 = sbr.rel (%p1277_p3) target bundleno = 1669 (0x685), region = 40 }
   0xb   : > { %1101 = dma.hbm_to_vmem [thread:$0]  (!%p1099_p5), %s170_s21, 3072, %s172_s25, [#allocation4], %s1225_s6, %s1225_s6, %s1226_s7  }
   0xc   : > { %1104 = dma.hbm_to_vmem [thread:$0]  (!%p1099_p5), %s187_s28, 1024, %s189_s30, [#allocation6], %s1227_s8, %s1227_s8, %s1228_s9  }
   0xf   : > { %1212 = dma.done.wait (%p1105_p2), [#allocation4], 3072  }
  0x10   : > { %1214 = vsyncadd (%p1105_p2), [#allocation4], 4294964224 }
  0x11   : > { %1216 = dma.done.wait (%p1105_p2), [#allocation6], 1024  }
  0x12   : > { %1218 = vsyncadd (%p1105_p2), [#allocation6], 4294966272  ;;  %v1006_v0 = vld [vmem:[#allocation3 + $0xa8] sm:$0xf]  ;;  %v1080_v1 = vld [vmem:[#allocation3 + $0xb0] sm:$0xf0] }
  0x13   : > { %v1079_v2 = vld [vmem:[#allocation3 + $0xac] sm:$0xf]  ;;  %v1007_v3 = vor.u32 %v1080_v1, %v1006_v0  ;;  %v1008_v4 = vld [vmem:[#allocation3 + $0xb4] sm:$0xf0]  ;;  %v994_v5 = vld [vmem:[#allocation3 + $0x90] sm:$0xf] }
  0x14   : > { %v1077_v6 = vld [vmem:[#allocation3 + $0x98] sm:$0xf0]  ;;  %v1011_v7 = vor.u32 %v1079_v2, %v1008_v4  ;;  %v1076_v8 = vld [vmem:[#allocation3 + $0x94] sm:$0xf]  ;;  %v996_v9 = vld [vmem:[#allocation3 + $0x9c] sm:$0xf0] }
  0x15   : > { %424 = vmatpush.bf16.msra.mxu0 %v1007_v3  ;;  %v995_v10 = vor.u32 %v1077_v6, %v994_v5  ;;  %v999_v11 = vor.u32 %v1076_v8, %v996_v9  ;;  %v982_v12 = vld [vmem:[#allocation3 + $0x78] sm:$0xf]  ;;  %v1074_v13 = vld [vmem:[#allocation3 + $0x80] sm:$0xf0]  ;;  %v1073_v14 = vld [vmem:[#allocation3 + $0x7c] sm:$0xf] }
  0x16   : > { %437 = vmatpush.bf16.msra.mxu1 %v1011_v7  ;;  %v984_v15 = vld [vmem:[#allocation3 + $0x84] sm:$0xf0]  ;;  %v983_v16 = vor.u32 %v1074_v13, %v982_v12  ;;  %v970_v18 = vld [vmem:[#allocation3 + $0x60] sm:$0xf]  ;;  %v1071_v19 = vld [vmem:[#allocation3 + $0x68] sm:$0xf0] }
  0x17   : > { %v987_v17 = vor.u32 %v1073_v14, %v984_v15  ;;  %v1070_v20 = vld [vmem:[#allocation3 + $0x64] sm:$0xf]  ;;  %v972_v21 = vld [vmem:[#allocation3 + $0x6c] sm:$0xf0]  ;;  %v971_v22 = vor.u32 %v1071_v19, %v970_v18  ;;  %v1081_v24 = vld [vmem:[#allocation3 + $0xb8] sm:$0xf0] }
  0x18   : > { %v1014_v23 = vld [vmem:[#allocation3 + $0xb0] sm:$0xf]  ;;  %v1002_v25 = vld [vmem:[#allocation3 + $0x98] sm:$0xf]  ;;  %v975_v26 = vor.u32 %v1070_v20, %v972_v21  ;;  %v958_v27 = vld [vmem:[#allocation3 + $0x48] sm:$0xf] }
  0x19   : > { %425 = vmatpush.bf16.msra.mxu0 %v995_v10  ;;  %v1068_v28 = vld [vmem:[#allocation3 + $0x50] sm:$0xf0]  ;;  %v1015_v29 = vor.u32 %v1081_v24, %v1014_v23  ;;  %v1078_v30 = vld [vmem:[#allocation3 + $0xa0] sm:$0xf0]  ;;  %v1067_v31 = vld [vmem:[#allocation3 + $0x4c] sm:$0xf] }
  0x1a   : > { %438 = vmatpush.bf16.msra.mxu1 %v999_v11  ;;  %v960_v32 = vld [vmem:[#allocation3 + $0x54] sm:$0xf0]  ;;  %v1003_v33 = vor.u32 %v1078_v30, %v1002_v25  ;;  %v959_v34 = vor.u32 %v1068_v28, %v958_v27  ;;  %v990_v35 = vld [vmem:[#allocation3 + $0x80] sm:$0xf]  ;;  %v1075_v36 = vld [vmem:[#allocation3 + $0x88] sm:$0xf0] }
  0x1b   : > { %450 = vmatpush.bf16.msra.mxu2 %v1015_v29  ;;  %v963_v37 = vor.u32 %v1067_v31, %v960_v32  ;;  %v946_v38 = vld [vmem:[#allocation3 + $0x30] sm:$0xf]  ;;  %v1065_v39 = vld [vmem:[#allocation3 + $0x38] sm:$0xf0]  ;;  %v1064_v40 = vld [vmem:[#allocation3 + $0x34] sm:$0xf]  ;;  %v991_v42 = vor.u32 %v1075_v36, %v990_v35  ;;  %v463_v31 = vlaneseq }
  0x1c   : > { %v948_v41 = vld [vmem:[#allocation3 + $0x3c] sm:$0xf0]  ;;  %p246_p6 = scmp.lt.s32.totalorder %s1272_s22, 1  ;;  %v947_v43 = vor.u32 %v1065_v39, %v946_v38  ;;  %v978_v44 = vld [vmem:[#allocation3 + $0x68] sm:$0xf]  ;;  %vm471_vm0 = vcmask 261120  }
  0x1d   : > { %426 = vmatpush.bf16.msra.mxu0 %v983_v16  ;;  %v1072_v45 = vld [vmem:[#allocation3 + $0x70] sm:$0xf0]  ;;  %v951_v46 = vor.u32 %v1064_v40, %v948_v41  ;;  %v934_v47 = vld [vmem:[#allocation3 + $0x18] sm:$0xf]  ;;  %v1062_v48 = vld [vmem:[#allocation3 + $0x20] sm:$0xf0] }
  0x1e   : > { %439 = vmatpush.bf16.msra.mxu1 %v987_v17  ;;  %v1061_v49 = vld [vmem:[#allocation3 + $0x1c] sm:$0xf]  ;;  %v936_v50 = vld [vmem:[#allocation3 + $0x24] sm:$0xf0]  ;;  %s1383_s22 = smov (!%p246_p6, %s1272_s22), 1  ;;  %v979_v51 = vor.u32 %v1072_v45, %v978_v44  ;;  %v935_v52 = vor.u32 %v1062_v48, %v934_v47  ;;  %s1229_s16 = smov 64  }
  0x1f   : > { %451 = vmatpush.bf16.msra.mxu2 %v1003_v33  ;;  %v966_v53 = vld [vmem:[#allocation3 + $0x50] sm:$0xf]  ;;  %v1069_v54 = vld [vmem:[#allocation3 + $0x58] sm:$0xf0]  ;;  %v939_v55 = vor.u32 %v1061_v49, %v936_v50  ;;  %v922_v56 = vld [vmem:[#allocation3] sm:$0xf] }
  0x20   : > { %v1059_v57 = vld [vmem:[#allocation3 + $0x8] sm:$0xf0]  ;;  %v1058_v58 = vld [vmem:[#allocation3 + $0x4] sm:$0xf]  ;;  %v924_v59 = vld [vmem:[#allocation3 + $0xc] sm:$0xf0]  ;;  %v967_v60 = vor.u32 %v1069_v54, %v966_v53 }
  0x21   : > { %427 = vmatpush.bf16.msra.mxu0 %v971_v22  ;;  %s918_s10 = sshll.u32 %s1383_s22, 2  ;;  %v923_v61 = vor.u32 %v1059_v57, %v922_v56  ;;  %v954_v62 = vld [vmem:[#allocation3 + $0x38] sm:$0xf]  ;;  %v1066_v63 = vld [vmem:[#allocation3 + $0x40] sm:$0xf0]  ;;  %v927_v0 = vor.u32 %v1058_v58, %v924_v59  ;;  %s1230_s17 = smov 96  }
  0x22   : > { %440 = vmatpush.bf16.msra.mxu1 %v975_v26  ;;  %s249_s13 = scalar_lea.vmem %s1375_s0, %s918_s10  ;;  %v955_v1 = vor.u32 %v1066_v63, %v954_v62  ;;  %v942_v3 = vld [vmem:[#allocation3 + $0x20] sm:$0xf]  ;;  %v1063_v4 = vld [vmem:[#allocation3 + $0x28] sm:$0xf0]  ;;  %v930_v6 = vld [vmem:[#allocation3 + $0x8] sm:$0xf]  ;;  %s253_s25 = scalar_lea.vmem %s1380_s5, %s918_s10 }
  0x23   : > { %452 = vmatpush.bf16.msra.mxu2 %v991_v42  ;;  %v1308_v2 = vld [vmem:[%s249_s13] sm:$0xf]  ;;  %v943_v5 = vor.u32 %v1063_v4, %v942_v3  ;;  %v1060_v7 = vld [vmem:[#allocation3 + $0x10] sm:$0xf0]  ;;  %s1231_s19 = smov 32   ;;  %vm508_vm1 = vcmask 1043456  }
  0x24   : > { %v931_v8 = vor.u32 %v1060_v7, %v930_v6  ;;  %v288_v9 = vld [vmem:[%s1377_s2] sm:$0x7]  ;;  %v464_v32 = vshrl.u32 %v463_v31, 7  ;;  %v466_v33 = vand.u32 127, %v463_v31  ;;  %vm492_vm3 = vcmask 64512  }
  0x25   : > { %428 = vmatpush.bf16.msra.mxu0 %v959_v34  ;;  %v291_v10 = vperm.slane %v288_v9, 1  ;;  %v290_v13 = vperm.slane %v288_v9, 0  ;;  %v292_v22 = vperm.slane %v288_v9, 2  ;;  %vm590_vm4 = vcmask 523520  }
  0x26   : > { %441 = vmatpush.bf16.msra.mxu1 %v963_v37  ;;  %vm467_vm2 = vcmp.le.s32.totalorder %v466_v33, %v464_v32  ;;  %vm653_vm5 = vcmask 785920   ;;  %vm716_vm6 = vcmask 1048320  }
  0x27   : > { %453 = vmatpush.bf16.msra.mxu2 %v979_v51 }
  0x29   : > { %429 = vmatpush.bf16.msra.mxu0 %v947_v43 }
  0x2a   : > { %442 = vmatpush.bf16.msra.mxu1 %v951_v46 }
  0x2b   : > { %454 = vmatpush.bf16.msra.mxu2 %v967_v60 }
  0x2d   : > { %430 = vmatpush.bf16.msra.mxu0 %v935_v52 }
  0x2e   : > { %443 = vmatpush.bf16.msra.mxu1 %v939_v55 }
  0x2f   : > { %455 = vmatpush.bf16.msra.mxu2 %v955_v1 }
  0x31   : > { %431 = vmatpush.bf16.msra.mxu0 %v923_v61 }
  0x32   : > { %444 = vmatpush.bf16.msra.mxu1 %v927_v0 }
  0x33   : > { %456 = vmatpush.bf16.msra.mxu2 %v943_v5 }
  0x34   : > { %432 = vmatmul.bf16.vlgmr.msra.gmra.mxu0 %v1308_v2 }
  0x35   : > { %445 = vmatmul.bf16.vlgmr.msra.gmra.mxu1 %v1308_v2 }
  0x37   : > { %457 = vmatpush.bf16.msra.mxu2 %v931_v8 }
  0x3a   : > { %458 = vmatmul.bf16.vlgmr.msra.gmra.mxu2 %v1308_v2 }
  0xb1   : > { %v433_v11 = vpop.f32.mrf.mxu0 }
  0xb2   : > { %v446_v12 = vpop.f32.mrf.mxu1  ;;  %v434_v16 = vadd.f32 %v433_v11, %v290_v13 }
  0xb3   : > { %v447_v14 = vadd.f32 %v446_v12, %v291_v10 }
  0xb4   : > { %v468_v20 = vpack.c.bf16 %v434_v16, %v434_v16 }
  0xb5   : > { %v469_v15 = vpack.c.bf16 %v447_v14, %v447_v14 }
  0xb7   : > { %594 = vrot.lane.b32.xlu2 %v469_v15, %s1229_s16  ;;  %530 = vrot.lane.b32.xlu1 %v469_v15, %s1230_s17  ;;  %v476_v17 = vsel %vm471_vm0, %v469_v15, 0 }
  0xb8   : > { %485 = vmatpush.bf16.xpose.msra.mxu3 %v476_v17 }
  0xb9   : > { %v435_v18 = vpop.f32.mrf.mxu0 }
  0xba   : > { %v448_v19 = vpop.f32.mrf.mxu1 }
  0xbd   : > { %v459_v21 = vpop.f32.mrf.mxu2 }
  0xbe   : > { %v460_v23 = vadd.f32 %v459_v21, %v292_v22 }
  0xbf   : > { %657 = vrot.lane.b32.xlu2 %v469_v15, %s1231_s19  ;;  %527 = vrot.lane.b32.xlu1 %v468_v20, %s1230_s17 }
  0xc0   : > { %1016 = vmatmul.msk.bf16.vlgmr.msra.gmra.mxu3 %vm471_vm0, %v468_v20  ;;  %v1323_v25 = vpack.c.bf16 %v460_v23, %v460_v23 }
  0xc2   : > { %v510_v26 = vsel %vm508_vm1, %v1323_v25, 0 }
  0xc3   : > { %519 = vmatpush.bf16.msrb.mxu3 %v510_v26 }
  0xc5   : > { %v461_v24 = vpop.f32.mrf.mxu2 }
  0xc7   : > { %655 = vrot.lane.b32.xlu1 %v468_v20, %s1231_s19 }
 0x111   : > { %v595_v27 = vpop.permute.xlu2 %594 }
 0x112   : > { %v600_v28 = vsel %vm471_vm0, %v595_v27, 0 }
 0x113   : > { %609 = vmatpush.bf16.xpose.msrb.mxu2 %v600_v28 }
 0x119   : > { %v658_v46 = vpop.permute.xlu2 %657 }
 0x11a   : > { %v663_v48 = vsel %vm471_vm0, %v658_v46, 0  ;;  %v1085_v46 = vld [vmem:[#allocation5 + $0x18] sm:$0xff] }
 0x129   : > { %v531_v29 = vpop.permute.xlu1 %530 }
 0x12a   : > { %v536_v30 = vsel %vm471_vm0, %v531_v29, 0 }
 0x12b   : > { %545 = vmatpush.bf16.xpose.msra.mxu3 %v536_v30 }
 0x131   : > { %v528_v50 = vpop.permute.xlu1 %527 }
 0x139   : > { %v656_v51 = vpop.permute.xlu1 %655 }
 0x143   : > { %v487_v34 = vpop.f32.mrf.mxu3 }
 0x144   : > { %v491_v35 = vsel %vm467_vm2, %v487_v34, -1e+09 }
 0x145   : > { %v493_v36 = vsel %vm492_vm3, %v491_v35, -inf }
 0x146   : > { %494 = vmax.xlane.f32.xlu0 %v493_v36 }
 0x14b   : > { %v489_v37 = vpop.f32.mrf.mxu3 }
 0x1b9   : > { %v495_v38 = vpop.xlane.xlu0 %494 }
 0x1ba   : > { %v496_v39 = vsub.f32 %v491_v35, %v495_v38 }
 0x1bc   : > { %v497_v40 = vmul.f32 1.442695, %v496_v39 }
 0x1be   : > { %1127 = vpow2.f32 %v497_v40 }
 0x1c4   : > { %v1128_v41 = vpop.eup %1127 }
 0x1c5   : > { %v499_v42 = vsel %vm492_vm3, %v1128_v41, 0.0 }
 0x1c6   : > { %500 = vadd.xlane.f32.xlu0 %v499_v42  ;;  %v1089_v42 = vld [vmem:[#allocation5 + $0x38] sm:$0xff] }
 0x1c7   : > { %786 = vmatpush.bf16.msrb.mxu1 %v1089_v42 }
 0x1da   : > { %592 = vrot.lane.b32.xlu0 %v468_v20, %s1229_s16 }
 0x239   : > { %v501_v43 = vpop.xlane.xlu0 %500 }
 0x23a   : > { %1129 = vrcp.f32 %v501_v43  ;;  %v1088_v43 = vld [vmem:[#allocation5 + $0x30] sm:$0xff] }
 0x23b   : > { %787 = vmatpush.bf16.msrb.mxu1 %v1088_v43 }
 0x240   : > { %v1130_v44 = vpop.eup %1129 }
 0x241   : > { %v503_v45 = vmul.f32 %v1130_v44, %v1128_v41  ;;  %v1087_v44 = vld [vmem:[#allocation5 + $0x28] sm:$0xff] }
 0x242   : > { %788 = vmatpush.bf16.msrb.mxu1 %v1087_v44 }
 0x243   : > { %v504_v47 = vpack.c.bf16 %v503_v45, %v503_v45  ;;  %v1086_v45 = vld [vmem:[#allocation5 + $0x20] sm:$0xff] }
 0x245   : > { %1017 = vmatmul.msk.bf16.vlgmr.msrb.gmra.mxu3 %vm492_vm3, %v504_v47  ;;  %v1084_v47 = vld [vmem:[#allocation5 + $0x10] sm:$0xff] }
 0x246   : > { %672 = vmatpush.bf16.xpose.msrb.mxu3 %v663_v48  ;;  %789 = vmatpush.bf16.msrb.mxu1 %v1086_v45 }
 0x24a   : > { %790 = vmatpush.bf16.msrb.mxu1 %v1085_v46 }
 0x24c   : > { %v593_v49 = vpop.permute.xlu0 %592 }
 0x24d   : > { %1020 = vmatmul.msk.bf16.vlgmr.msrb.gmra.mxu2 %vm471_vm0, %v593_v49 }
 0x24e   : > { %791 = vmatpush.bf16.msrb.mxu1 %v1084_v47 }
 0x255   : > { %1018 = vmatmul.msk.bf16.vlgmr.msra.gmra.mxu3 %vm471_vm0, %v528_v50  ;;  %v1083_v50 = vld [vmem:[#allocation5 + $0x8] sm:$0xff] }
 0x256   : > { %792 = vmatpush.bf16.msrb.mxu1 %v1083_v50 }
 0x265   : > { %1022 = vmatmul.msk.bf16.vlgmr.msrb.gmra.mxu3 %vm471_vm0, %v656_v51  ;;  %v1082_v51 = vld [vmem:[#allocation5] sm:$0xff] }
 0x266   : > { %793 = vmatpush.bf16.msrb.mxu1 %v1082_v51 }
 0x2c8   : > { %v521_v52 = vpop.f32.mrf.mxu3 }
 0x2c9   : > { %525 = vst.msk [vmem:[#allocation2] sm:$0xff] %vm471_vm0, %v521_v52 }
 0x2d0   : > { %v523_v53 = vpop.f32.mrf.mxu3  ;;  %v611_v54 = vpop.f32.mrf.mxu2 }
 0x2d1   : > { %v615_v55 = vsel %vm467_vm2, %v611_v54, -1e+09 }
 0x2d2   : > { %v616_v56 = vsel %vm492_vm3, %v615_v55, -inf }
 0x2d3   : > { %617 = vmax.xlane.f32.xlu1 %v616_v56 }
 0x2d8   : > { %v547_v57 = vpop.f32.mrf.mxu3  ;;  %v613_v58 = vpop.f32.mrf.mxu2 }
 0x2d9   : > { %v551_v59 = vsel %vm467_vm2, %v547_v57, -1e+09  ;;  %v799_v57 = vunpack.c.l.bf16 %v1308_v2 }
 0x2da   : > { %v552_v60 = vsel %vm492_vm3, %v551_v59, -inf }
 0x2db   : > { %553 = vmax.xlane.f32.xlu2 %v552_v60 }
 0x2e0   : > { %v549_v61 = vpop.f32.mrf.mxu3 }
 0x2e8   : > { %v674_v62 = vpop.f32.mrf.mxu3 }
 0x2e9   : > { %v678_v63 = vsel %vm467_vm2, %v674_v62, -1e+09  ;;  %v1232_v62 = vmov 128.0  }
 0x2ea   : > { %v679_v0 = vsel %vm492_vm3, %v678_v63, -inf }
 0x2eb   : > { %680 = vmax.xlane.f32.xlu0 %v679_v0 }
 0x2f0   : > { %v676_v1 = vpop.f32.mrf.mxu3 }
 0x2ff   : > { %628 = vrot.lane.b32.xlu0 %v1323_v25, %s1229_s16 }
 0x346   : > { %v618_v3 = vpop.xlane.xlu1 %617 }
 0x347   : > { %v619_v4 = vsub.f32 %v615_v55, %v618_v3  ;;  %v718_v55 = vld [vmem:[%s1379_s4] sm:$0x7] }
 0x348   : > { %v737_v56 = vperm.slane %v718_v55, 0 }
 0x349   : > { %v620_v5 = vmul.f32 1.442695, %v619_v4 }
 0x34b   : > { %1131 = vpow2.f32 %v620_v5 }
 0x34e   : > { %v554_v6 = vpop.xlane.xlu2 %553 }
 0x34f   : > { %v555_v7 = vsub.f32 %v551_v59, %v554_v6 }
 0x351   : > { %v1132_v8 = vpop.eup %1131  ;;  %v556_v9 = vmul.f32 1.442695, %v555_v7 }
 0x352   : > { %v622_v10 = vsel %vm492_vm3, %v1132_v8, 0.0 }
 0x353   : > { %1133 = vpow2.f32 %v556_v9  ;;  %623 = vadd.xlane.f32.xlu1 %v622_v10 }
 0x359   : > { %v1134_v11 = vpop.eup %1133 }
 0x35a   : > { %v558_v12 = vsel %vm492_vm3, %v1134_v11, 0.0 }
 0x35b   : > { %559 = vadd.xlane.f32.xlu2 %v558_v12 }
 0x35e   : > { %v681_v13 = vpop.xlane.xlu0 %680 }
 0x35f   : > { %v682_v14 = vsub.f32 %v678_v63, %v681_v13 }
 0x361   : > { %v683_v15 = vmul.f32 1.442695, %v682_v14 }
 0x363   : > { %1135 = vpow2.f32 %v683_v15 }
 0x369   : > { %v1136_v16 = vpop.eup %1135 }
 0x36a   : > { %v685_v17 = vsel %vm492_vm3, %v1136_v16, 0.0 }
 0x36b   : > { %686 = vadd.xlane.f32.xlu1 %v685_v17 }
 0x371   : > { %v629_v18 = vpop.permute.xlu0 %628 }
 0x372   : > { %v634_v19 = vsel %vm508_vm1, %v629_v18, 0  ;;  %v828_v18 = vperm.slane %v718_v55, 1 }
 0x373   : > { %565 = vrot.lane.b32.xlu2 %v1323_v25, %s1230_s17  ;;  %643 = vmatpush.bf16.msra.mxu2 %v634_v19 }
 0x384   : > { %691 = vrot.lane.b32.xlu1 %v1323_v25, %s1231_s19 }
 0x3c6   : > { %v624_v20 = vpop.xlane.xlu1 %623 }
 0x3c7   : > { %1137 = vrcp.f32 %v624_v20  ;;  %v830_v20 = vperm.slane %v718_v55, 2 }
 0x3cd   : > { %v1138_v21 = vpop.eup %1137 }
 0x3ce   : > { %v626_v22 = vmul.f32 %v1138_v21, %v1132_v8  ;;  %v560_v23 = vpop.xlane.xlu2 %559 }
 0x3cf   : > { %1139 = vrcp.f32 %v560_v23 }
 0x3d0   : > { %v627_v24 = vpack.c.bf16 %v626_v22, %v626_v22 }
 0x3d2   : > { %1021 = vmatmul.msk.bf16.vlgmr.msra.gmra.mxu2 %vm492_vm3, %v627_v24 }
 0x3d5   : > { %v1140_v26 = vpop.eup %1139 }
 0x3d6   : > { %v562_v27 = vmul.f32 %v1140_v26, %v1134_v11  ;;  %v566_v28 = vpop.permute.xlu2 %565 }
 0x3d7   : > { %v571_v29 = vsel %vm508_vm1, %v566_v28, 0 }
 0x3d8   : > { %580 = vmatpush.bf16.msrb.mxu0 %v571_v29  ;;  %v563_v30 = vpack.c.bf16 %v562_v27, %v562_v27 }
 0x3db   : > { %1019 = vmatmul.msk.bf16.vlgmr.msrb.gmra.mxu0 %vm492_vm3, %v563_v30 }
 0x3de   : > { %v687_v31 = vpop.xlane.xlu1 %686 }
 0x3df   : > { %1141 = vrcp.f32 %v687_v31 }
 0x3e0   : > { %1143 = vrcp.f32 %v1232_v62 }
 0x3e5   : > { %v1142_v25 = vpop.eup %1141 }
 0x3e6   : > { %v689_v32 = vmul.f32 %v1142_v25, %v1136_v16  ;;  %v1144_v63 = vpop.eup %1143 }
 0x3e7   : > { %v804_v0 = vmul.f32 128.0, %v1144_v63  ;;  %vm808_vm7 = vweird.f32 %v1144_v63 }
 0x3e8   : > { %v690_v35 = vpack.c.bf16 %v689_v32, %v689_v32 }
 0x3e9   : > { %v805_v1 = vsub.f32 1.0, %v804_v0 }
 0x3eb   : > { %v806_v3 = vmul.f32 %v1144_v63, %v805_v1 }
 0x3ed   : > { %v807_v4 = vadd.f32 %v1144_v63, %v806_v3 }
 0x3ef   : > { %v809_v5 = vsel %vm808_vm7, %v1144_v63, %v807_v4 }
 0x3f6   : > { %v692_v33 = vpop.permute.xlu1 %691 }
 0x3f7   : > { %v697_v34 = vsel %vm508_vm1, %v692_v33, 0 }
 0x3f8   : > { %706 = vmatpush.bf16.msra.mxu0 %v697_v34 }
 0x3fb   : > { %1023 = vmatmul.msk.bf16.vlgmr.msra.gmra.mxu0 %vm492_vm3, %v690_v35 }
 0x455   : > { %v645_v36 = vpop.f32.mrf.mxu2 }
 0x458   : > { %v582_v37 = vpop.f32.mrf.mxu0 }
 0x459   : > { %587 = vrot.lane.b32.xlu2 %v582_v37, %s1231_s19 }
 0x45d   : > { %v647_v38 = vpop.f32.mrf.mxu2 }
 0x460   : > { %v584_v39 = vpop.f32.mrf.mxu0 }
 0x461   : > { %650 = vrot.lane.b32.xlu2 %v645_v36, %s1229_s16 }
 0x478   : > { %v708_v40 = vpop.f32.mrf.mxu0 }
 0x479   : > { %713 = vrot.lane.b32.xlu0 %v708_v40, %s1230_s17 }
 0x480   : > { %v710_v41 = vpop.f32.mrf.mxu0 }
 0x4b3   : > { %v588_v48 = vpop.permute.xlu2 %587 }
 0x4b4   : > { %591 = vst.msk [vmem:[#allocation2] sm:$0xff] %vm590_vm4, %v588_v48 }
 0x4bb   : > { %v651_v49 = vpop.permute.xlu2 %650 }
 0x4bc   : > { %654 = vst.msk [vmem:[#allocation2] sm:$0xff] %vm653_vm5, %v651_v49 }
 0x4eb   : > { %v714_v52 = vpop.permute.xlu0 %713 }
 0x4ec   : > { %717 = vst.msk [vmem:[#allocation2] sm:$0xff] %vm716_vm6, %v714_v52 }
 0x4f3   : > { %v719_v53 = vld [vmem:[#allocation2] sm:$0xff] }
 0x4f4   : > { %v720_v54 = vpack.c.bf16 %v719_v53, %v719_v53 }
 0x4f6   : > { %794 = vmatmul.bf16.vlgmr.msrb.gmra.mxu1 %v720_v54 }
 0x573   : > { %v795_v58 = vpop.f32.mrf.mxu1 }
 0x574   : > { %v796_v59 = vadd.f32 %v795_v58, %v737_v56 }
 0x576   : > { %v800_v60 = vadd.f32 %v799_v57, %v796_v59 }
 0x578   : > { %801 = vadd.xlane.f32.xlu2 %v800_v60 }
 0x57b   : > { %v797_v61 = vpop.f32.mrf.mxu1 }
 0x5eb   : > { %v802_v6 = vpop.xlane.xlu2 %801 }
 0x5ec   : > { %v810_v7 = vmul.f32 %v809_v5, %v802_v6 }
 0x5ee   : > { %v811_v8 = vsub.f32 %v800_v60, %v810_v7 }
 0x5f0   : > { %v812_v9 = vmul.f32 %v811_v8, %v811_v8 }
 0x5f2   : > { %813 = vadd.xlane.f32.xlu0 %v812_v9 }
 0x665   : > { %v814_v2 = vpop.xlane.xlu0 %813 }
 0x666   : > { %v815_v10 = vmul.f32 %v814_v2, %v809_v5 }
 0x668   : > { %v816_v11 = vadd.f32 1e-05, %v815_v10 }
 0x66a   : > { %1145 = vrsqrt.f32 %v816_v11  ;;  %vm823_vm9 = vweird.f32 %v816_v11 }
 0x670   : > { %v1146_v12 = vpop.eup %1145 }
 0x671   : > { %v818_v13 = vmul.f32 %v1146_v12, %v816_v11  ;;  %vm824_vm8 = vweird.f32 %v1146_v12 }
 0x672   : > { %vm825_vm10 = vmor %vm823_vm9, %vm824_vm8 }
 0x673   : > { %v819_v14 = vmul.f32 %v1146_v12, %v818_v13 }
 0x675   : > { %v820_v15 = vmul.f32 0.5, %v819_v14 }
 0x677   : > { %v821_v16 = vsub.f32 1.5, %v820_v15 }
 0x679   : > { %v822_v17 = vmul.f32 %v1146_v12, %v821_v16 }
 0x67b   : > { %v826_v19 = vsel %vm825_vm10, %v1146_v12, %v822_v17 }
 0x67c   : > { %v827_v21 = vmul.f32 %v826_v19, %v811_v8 }
 0x67e   : > { %v829_v22 = vmul.f32 %v828_v18, %v827_v21 }
 0x680   : > { %v831_v23 = vadd.f32 %v830_v20, %v829_v22 }
 0x682   : > { %v832_v24 = vpack.c.bf16 %v831_v23, %v831_v23 }
 0x684   : > { %833 = vst [vmem:[%s253_s25] sm:$0xf] %v832_v24 }
 0x685 PF: > { %s17_s18 = sadd.s32 1, %s1221_s18  }
 0x686   : > { %p14_p7 = scmp.ge.s32.totalorder %s17_s18, 4  }
 0x688   :  { %16 = sbr.rel (!%p14_p7) target bundleno = 2 (0x2), region = 79 }
 0x68d   :  { %853 = vsyncpa [#allocation4], 1 }
 0x68e   :  { %855 = vsyncpa [#allocation4 + $0x1], 1 }
 0x68f   :  { %856 = vsyncpa [#allocation6], 1 }

// kernel: transformer_decoder.10
= control target key start
LH: loop header
LB: loop body
LE: loop exit
PB: predicated region body
PF: predicated region fallthrough
CT: control target
= control target key end

     0   :  { %12 = vsyncpa [#allocation4], 0  ;;  %s1542_s0 = inlined_call_operand.vmem [shape: bf16[2,8,128], index: 0, kind: input, shape index: {}]   ;;  %s1543_s1 = inlined_call_operand.vmem [shape: bf16[2,8,128], index: 1, kind: input, shape index: {}]   ;;  %s1544_s2 = inlined_call_operand.hbm [shape: bf16[128,128], index: 2, kind: input, shape index: {}]   ;;  %s1545_s3 = inlined_call_operand.hbm [shape: bf16[128,256], index: 3, kind: input, shape index: {}]   ;;  %s1546_s4 = inlined_call_operand.vmem [shape: f32[1,256], index: 4, kind: input, shape index: {}]   ;;  %s1547_s5 = inlined_call_operand.hbm [shape: bf16[128,128], index: 5, kind: input, shape index: {}]   ;;  %s1548_s6 = inlined_call_operand.vmem [shape: f32[4,128], index: 6, kind: input, shape index: {}]   ;;  %s1549_s7 = inlined_call_operand.vmem [shape: bf16[2,8,128], index: 7, kind: output, shape index: {}]  }
   0x1   :  { %13 = vsyncpa [#allocation6], 0  ;;  %s1416_s24 = smov 0  }
   0x2 LB: > { %s232_s27 = sshll.u32 %s1545_s3, 4  ;;  %s1425_s28 = sadd.s32 4294967295, %s1363_s24   ;;  %s1363_s24 = sphi %s1416_s24, %s19_s24   ;;  %s233_s27 = int_to_ptr.hbm [resolvable:$true] %s232_s27 }
   0x3   : > { %p1010_p0 = scmp.ge.s32.totalorder %s1363_s24, 1  ;;  %p207_p1 = scmp.lt.s32.totalorder %s1363_s24, 3 }
   0x4   : > { %p1214_p2 = scmp.eq.s32.totalorder %s1425_s28, 0  ;;  %s1365_s30 = smov [#allocation5]  }
   0x5   : > { %p1430_p3 = pnand %p1010_p0, %p207_p1  ;;  %s234_s8 = sshll.u32 %s1365_s30, 4  ;;  %s235_s8 = int_to_ptr.vmem [resolvable:$true] %s234_s8 }
   0x6   : > { %s218_s11 = sshll.u32 %s1544_s2, 4  ;;  %s1366_s13 = smov [#allocation3]   ;;  %s219_s11 = int_to_ptr.hbm [resolvable:$true] %s218_s11 }
   0x7   : > { %p1204_p4 = pneg %p1430_p3  ;;  %s220_s14 = sshll.u32 %s1366_s13, 4  ;;  %s221_s14 = int_to_ptr.vmem [resolvable:$true] %s220_s14 }
   0x8   : > { %s1367_s15 = smov 128   ;;  %s1368_s16 = smov 8  }
   0x9   : > { %p1441_p5 = pnand %p1214_p2, %p1204_p4  ;;  %s249_s19 = sshll.u32 %s1547_s5, 4  ;;  %s250_s19 = int_to_ptr.hbm [resolvable:$true] %s249_s19 }
   0xa   : > { %s1369_s20 = smov 64   ;;  %s1370_s21 = smov 4  }
   0xb   : > { %1210 = dma.hbm_to_vmem [thread:$0]  (!%p1441_p5), %s233_s27, 2048, %s235_s8, [#allocation6], %s1367_s15, %s1367_s15, %s1368_s16  }
   0xc   : > { %1207 = dma.hbm_to_vmem [thread:$0]  (!%p1441_p5), %s219_s11, 1024, %s221_s14, [#allocation4], %s1369_s20, %s1369_s20, %s1370_s21  }
   0xd   : > { %s1371_s22 = smov [#allocation7]   ;;  %284 = sbr.rel (%p1430_p3) target bundleno = 1670 (0x686), region = 48 }
   0xe   : > { %s251_s23 = sshll.u32 %s1371_s22, 4  ;;  %s252_s23 = int_to_ptr.vmem [resolvable:$true] %s251_s23 }
   0xf   : > { %1213 = dma.hbm_to_vmem [thread:$0]  (!%p1441_p5), %s250_s19, 1024, %s252_s23, [#allocation6], %s1369_s20, %s1369_s20, %s1370_s21  }
  0x12   : > { %1354 = dma.done.wait (%p1214_p2), [#allocation4], 1024  }
  0x13   : > { %1356 = vsyncadd (%p1214_p2), [#allocation4], 4294966272 }
  0x14   : > { %1358 = dma.done.wait (%p1214_p2), [#allocation6], 3072  }
  0x15   : > { %1360 = vsyncadd (%p1214_p2), [#allocation6], 4294964224  ;;  %v1167_v0 = vld [vmem:[#allocation3 + $0x38] sm:$0xff]  ;;  %v1112_v1 = vld [vmem:[#allocation5 + $0x70] sm:$0xf]  ;;  %p329_p6 = scmp.lt.s32.totalorder %s1425_s28, 1 }
  0x16   : > { %v1183_v2 = vld [vmem:[#allocation5 + $0x74] sm:$0xf0]  ;;  %v1104_v4 = vld [vmem:[#allocation5 + $0x60] sm:$0xf]  ;;  %v1181_v5 = vld [vmem:[#allocation5 + $0x64] sm:$0xf0]  ;;  %410 = vmatpush.bf16.msra.mxu0 %v1167_v0 }
  0x17   : > { %v1113_v3 = vor.u32 %v1183_v2, %v1112_v1  ;;  %v1166_v6 = vld [vmem:[#allocation3 + $0x30] sm:$0xff]  ;;  %v1105_v7 = vor.u32 %v1181_v5, %v1104_v4  ;;  %v1179_v9 = vld [vmem:[#allocation5 + $0x54] sm:$0xf0]  ;;  %v1165_v10 = vld [vmem:[#allocation3 + $0x28] sm:$0xff]  ;;  %s1553_s28 = smov (!%p329_p6, %s1425_s28), 1  ;;  %vm554_vm0 = vcmask 261120  }
  0x18   : > { %v1096_v8 = vld [vmem:[#allocation5 + $0x50] sm:$0xf]  ;;  %v1088_v12 = vld [vmem:[#allocation5 + $0x40] sm:$0xf]  ;;  %v1177_v13 = vld [vmem:[#allocation5 + $0x44] sm:$0xf0] }
  0x19   : > { %525 = vmatpush.bf16.msra.mxu1 %v1113_v3  ;;  %v1097_v11 = vor.u32 %v1179_v9, %v1096_v8  ;;  %v1182_v14 = vld [vmem:[#allocation5 + $0x74] sm:$0xf]  ;;  %v1114_v15 = vld [vmem:[#allocation5 + $0x78] sm:$0xf0]  ;;  %v1180_v16 = vld [vmem:[#allocation5 + $0x64] sm:$0xf]  ;;  %v1089_v20 = vor.u32 %v1177_v13, %v1088_v12 }
  0x1a   : > { %411 = vmatpush.bf16.msra.mxu0 %v1166_v6  ;;  %v1106_v17 = vld [vmem:[#allocation5 + $0x68] sm:$0xf0]  ;;  %v1164_v18 = vld [vmem:[#allocation3 + $0x20] sm:$0xff]  ;;  %v1117_v19 = vor.u32 %v1182_v14, %v1114_v15  ;;  %v1080_v21 = vld [vmem:[#allocation5 + $0x30] sm:$0xf]  ;;  %s1466_s25 = sshll.u32 %s1553_s28, 2 }
  0x1b   : > { %v1175_v22 = vld [vmem:[#allocation5 + $0x34] sm:$0xf0]  ;;  %v1109_v23 = vor.u32 %v1180_v16, %v1106_v17  ;;  %v1178_v24 = vld [vmem:[#allocation5 + $0x54] sm:$0xf]  ;;  %v1098_v25 = vld [vmem:[#allocation5 + $0x58] sm:$0xf0]  ;;  %s332_s29 = scalar_lea.vmem %s1542_s0, %s1466_s25  ;;  %s336_s9 = scalar_lea.vmem %s1543_s1, %s1466_s25 }
  0x1c   : > { %538 = vmatpush.bf16.msra.mxu2 %v1117_v19  ;;  %v1163_v26 = vld [vmem:[#allocation3 + $0x18] sm:$0xff]  ;;  %v1081_v27 = vor.u32 %v1175_v22, %v1080_v21  ;;  %v1072_v28 = vld [vmem:[#allocation5 + $0x20] sm:$0xf]  ;;  %v1173_v29 = vld [vmem:[#allocation5 + $0x24] sm:$0xf0]  ;;  %v1101_v30 = vor.u32 %v1178_v24, %v1098_v25  ;;  %s1372_s13 = smov 64   ;;  %s340_s18 = scalar_lea.vmem %s1549_s7, %s1466_s25 }
  0x1d   : > { %526 = vmatpush.bf16.msra.mxu1 %v1105_v7  ;;  %v1176_v31 = vld [vmem:[#allocation5 + $0x44] sm:$0xf]  ;;  %v1090_v32 = vld [vmem:[#allocation5 + $0x48] sm:$0xf0]  ;;  %v1162_v33 = vld [vmem:[#allocation3 + $0x10] sm:$0xff]  ;;  %v1073_v34 = vor.u32 %v1173_v29, %v1072_v28  ;;  %s1373_s14 = smov 96  }
  0x1e   : > { %412 = vmatpush.bf16.msra.mxu0 %v1165_v10  ;;  %v1064_v35 = vld [vmem:[#allocation5 + $0x10] sm:$0xf]  ;;  %v1171_v36 = vld [vmem:[#allocation5 + $0x14] sm:$0xf0]  ;;  %v1093_v37 = vor.u32 %v1176_v31, %v1090_v32  ;;  %v1174_v38 = vld [vmem:[#allocation5 + $0x34] sm:$0xf] }
  0x1f   : > { %v1082_v39 = vld [vmem:[#allocation5 + $0x38] sm:$0xf0]  ;;  %v1161_v40 = vld [vmem:[#allocation3 + $0x8] sm:$0xff]  ;;  %v1065_v41 = vor.u32 %v1171_v36, %v1064_v35  ;;  %v1056_v42 = vld [vmem:[#allocation5] sm:$0xf]  ;;  %s1374_s15 = smov 32  }
  0x20   : > { %539 = vmatpush.bf16.msra.mxu2 %v1109_v23  ;;  %v1169_v43 = vld [vmem:[#allocation5 + $0x4] sm:$0xf0]  ;;  %v1085_v44 = vor.u32 %v1174_v38, %v1082_v39  ;;  %v1172_v45 = vld [vmem:[#allocation5 + $0x24] sm:$0xf]  ;;  %v1074_v46 = vld [vmem:[#allocation5 + $0x28] sm:$0xf0] }
  0x21   : > { %527 = vmatpush.bf16.msra.mxu1 %v1097_v11  ;;  %v1160_v47 = vld [vmem:[#allocation3] sm:$0xff]  ;;  %v1057_v48 = vor.u32 %v1169_v43, %v1056_v42  ;;  %v1077_v49 = vor.u32 %v1172_v45, %v1074_v46  ;;  %v1170_v50 = vld [vmem:[#allocation5 + $0x14] sm:$0xf]  ;;  %v1066_v51 = vld [vmem:[#allocation5 + $0x18] sm:$0xf0]  ;;  %vm590_vm1 = vcmask 1043456  }
  0x22   : > { %413 = vmatpush.bf16.msra.mxu0 %v1164_v18  ;;  %v1476_v52 = vld [vmem:[%s332_s29] sm:$0xf]  ;;  %v1069_v54 = vor.u32 %v1170_v50, %v1066_v51  ;;  %v1168_v55 = vld [vmem:[#allocation5 + $0x4] sm:$0xf]  ;;  %v1058_v56 = vld [vmem:[#allocation5 + $0x8] sm:$0xf0] }
  0x23   : > { %v343_v53 = vld [vmem:[%s336_s9] sm:$0xf]  ;;  %v1061_v57 = vor.u32 %v1168_v55, %v1058_v56  ;;  %vm574_vm2 = vcmask 64512   ;;  %vm671_vm3 = vcmask 523520   ;;  %vm733_vm4 = vcmask 785920  }
  0x24   : > { %540 = vmatpush.bf16.msra.mxu2 %v1101_v30  ;;  %v439_v58 = vld [vmem:[%s1546_s4] sm:$0x3]  ;;  %vm795_vm5 = vcmask 1048320  }
  0x25   : > { %528 = vmatpush.bf16.msra.mxu1 %v1089_v20  ;;  %v441_v59 = vperm.slane %v439_v58, 0  ;;  %v1485_v60 = vld [vmem:[%s1548_s6] sm:$0xf]  ;;  %v442_v8 = vperm.slane %v439_v58, 1 }
  0x26   : > { %414 = vmatpush.bf16.msra.mxu0 %v1163_v26  ;;  %v361_v63 = vperm.slane %v1485_v60, 0 }
  0x28   : > { %541 = vmatpush.bf16.msra.mxu2 %v1093_v37 }
  0x29   : > { %529 = vmatpush.bf16.msra.mxu1 %v1081_v27 }
  0x2a   : > { %415 = vmatpush.bf16.msra.mxu0 %v1162_v33 }
  0x2c   : > { %542 = vmatpush.bf16.msra.mxu2 %v1085_v44 }
  0x2d   : > { %530 = vmatpush.bf16.msra.mxu1 %v1073_v34 }
  0x2e   : > { %416 = vmatpush.bf16.msra.mxu0 %v1161_v40 }
  0x30   : > { %543 = vmatpush.bf16.msra.mxu2 %v1077_v49 }
  0x31   : > { %531 = vmatpush.bf16.msra.mxu1 %v1065_v41 }
  0x32   : > { %417 = vmatpush.bf16.msra.mxu0 %v1160_v47 }
  0x34   : > { %544 = vmatpush.bf16.msra.mxu2 %v1069_v54 }
  0x35   : > { %532 = vmatpush.bf16.msra.mxu1 %v1057_v48  ;;  %418 = vmatmul.bf16.vlgmr.msra.gmra.mxu0 %v1476_v52 }
  0x38   : > { %533 = vmatmul.bf16.vlgmr.msra.gmra.mxu1 %v343_v53  ;;  %545 = vmatpush.bf16.msra.mxu2 %v1061_v57 }
  0x3b   : > { %546 = vmatmul.bf16.vlgmr.msra.gmra.mxu2 %v343_v53 }
  0xb2   : > { %v419_v61 = vpop.f32.mrf.mxu0 }
  0xb3   : > { %v420_v2 = vadd.f32 %v419_v61, %v361_v63 }
  0xb5   : > { %v534_v62 = vpop.f32.mrf.mxu1  ;;  %v551_v6 = vpack.c.bf16 %v420_v2, %v420_v2 }
  0xb6   : > { %v535_v0 = vadd.f32 %v534_v62, %v441_v59 }
  0xb8   : > { %v552_v1 = vpack.c.bf16 %v535_v0, %v535_v0 }
  0xba   : > { %675 = vrot.lane.b32.xlu2 %v552_v1, %s1372_s13  ;;  %612 = vrot.lane.b32.xlu1 %v552_v1, %s1373_s14  ;;  %v559_v3 = vsel %vm554_vm0, %v552_v1, 0  ;;  %v421_v4 = vpop.f32.mrf.mxu0 }
  0xbb   : > { %568 = vmatpush.bf16.xpose.msra.mxu3 %v559_v3 }
  0xbd   : > { %v536_v5 = vpop.f32.mrf.mxu1 }
  0xbe   : > { %v547_v7 = vpop.f32.mrf.mxu2 }
  0xbf   : > { %v548_v9 = vadd.f32 %v547_v7, %v442_v8 }
  0xc1   : > { %v1495_v11 = vpack.c.bf16 %v548_v9, %v548_v9 }
  0xc2   : > { %737 = vrot.lane.b32.xlu2 %v552_v1, %s1374_s15  ;;  %609 = vrot.lane.b32.xlu1 %v551_v6, %s1373_s14 }
  0xc3   : > { %1118 = vmatmul.msk.bf16.vlgmr.msra.gmra.mxu3 %vm554_vm0, %v551_v6  ;;  %v592_v12 = vsel %vm590_vm1, %v1495_v11, 0 }
  0xc4   : > { %601 = vmatpush.bf16.msrb.mxu3 %v592_v12 }
  0xc6   : > { %v549_v10 = vpop.f32.mrf.mxu2 }
  0xca   : > { %735 = vrot.lane.b32.xlu1 %v551_v6, %s1374_s15 }
 0x114   : > { %v676_v13 = vpop.permute.xlu2 %675 }
 0x115   : > { %v681_v14 = vsel %vm554_vm0, %v676_v13, 0 }
 0x116   : > { %690 = vmatpush.bf16.xpose.msrb.mxu2 %v681_v14 }
 0x11c   : > { %v738_v28 = vpop.permute.xlu2 %737 }
 0x11d   : > { %v743_v30 = vsel %vm554_vm0, %v738_v28, 0 }
 0x12c   : > { %v613_v15 = vpop.permute.xlu1 %612 }
 0x12d   : > { %v618_v16 = vsel %vm554_vm0, %v613_v15, 0 }
 0x12e   : > { %627 = vmatpush.bf16.xpose.msra.mxu3 %v618_v16 }
 0x134   : > { %v610_v32 = vpop.permute.xlu1 %609 }
 0x13c   : > { %v736_v33 = vpop.permute.xlu1 %735 }
 0x146   : > { %v570_v17 = vpop.f32.mrf.mxu3 }
 0x147   : > { %v575_v18 = vsel %vm574_vm2, %v570_v17, -inf }
 0x148   : > { %576 = vmax.xlane.f32.xlu0 %v575_v18 }
 0x14e   : > { %v572_v19 = vpop.f32.mrf.mxu3 }
 0x1bb   : > { %v577_v20 = vpop.xlane.xlu0 %576 }
 0x1bc   : > { %v578_v21 = vsub.f32 %v570_v17, %v577_v20 }
 0x1be   : > { %v579_v22 = vmul.f32 1.442695, %v578_v21 }
 0x1c0   : > { %1239 = vpow2.f32 %v579_v22  ;;  %v1191_v22 = vld [vmem:[#allocation7 + $0x38] sm:$0xff] }
 0x1c1   : > { %864 = vmatpush.bf16.msrb.mxu1 %v1191_v22 }
 0x1c6   : > { %v1240_v23 = vpop.eup %1239 }
 0x1c7   : > { %v581_v24 = vsel %vm574_vm2, %v1240_v23, 0.0 }
 0x1c8   : > { %582 = vadd.xlane.f32.xlu0 %v581_v24  ;;  %v1189_v24 = vld [vmem:[#allocation7 + $0x28] sm:$0xff] }
 0x1dc   : > { %673 = vrot.lane.b32.xlu0 %v551_v6, %s1372_s13 }
 0x23b   : > { %v583_v25 = vpop.xlane.xlu0 %582 }
 0x23c   : > { %1241 = vrcp.f32 %v583_v25  ;;  %v1188_v25 = vld [vmem:[#allocation7 + $0x20] sm:$0xff] }
 0x242   : > { %v1242_v26 = vpop.eup %1241 }
 0x243   : > { %v585_v27 = vmul.f32 %v1242_v26, %v1240_v23  ;;  %v1190_v23 = vld [vmem:[#allocation7 + $0x30] sm:$0xff]  ;;  %v1187_v26 = vld [vmem:[#allocation7 + $0x18] sm:$0xff] }
 0x244   : > { %865 = vmatpush.bf16.msrb.mxu1 %v1190_v23 }
 0x245   : > { %v586_v29 = vpack.c.bf16 %v585_v27, %v585_v27  ;;  %v1186_v27 = vld [vmem:[#allocation7 + $0x10] sm:$0xff] }
 0x247   : > { %1119 = vmatmul.msk.bf16.vlgmr.msrb.gmra.mxu3 %vm574_vm2, %v586_v29 }
 0x248   : > { %752 = vmatpush.bf16.xpose.msrb.mxu3 %v743_v30  ;;  %866 = vmatpush.bf16.msrb.mxu1 %v1189_v24  ;;  %v1185_v30 = vld [vmem:[#allocation7 + $0x8] sm:$0xff] }
 0x24c   : > { %867 = vmatpush.bf16.msrb.mxu1 %v1188_v25 }
 0x24e   : > { %v674_v31 = vpop.permute.xlu0 %673 }
 0x24f   : > { %1122 = vmatmul.msk.bf16.vlgmr.msrb.gmra.mxu2 %vm554_vm0, %v674_v31  ;;  %v1184_v31 = vld [vmem:[#allocation7] sm:$0xff] }
 0x250   : > { %868 = vmatpush.bf16.msrb.mxu1 %v1187_v26 }
 0x254   : > { %869 = vmatpush.bf16.msrb.mxu1 %v1186_v27 }
 0x257   : > { %1120 = vmatmul.msk.bf16.vlgmr.msra.gmra.mxu3 %vm554_vm0, %v610_v32 }
 0x258   : > { %870 = vmatpush.bf16.msrb.mxu1 %v1185_v30 }
 0x25c   : > { %871 = vmatpush.bf16.msrb.mxu1 %v1184_v31 }
 0x267   : > { %1124 = vmatmul.msk.bf16.vlgmr.msrb.gmra.mxu3 %vm554_vm0, %v736_v33 }
 0x2ca   : > { %v603_v34 = vpop.f32.mrf.mxu3 }
 0x2cb   : > { %607 = vst.msk [vmem:[#allocation2] sm:$0xff] %vm554_vm0, %v603_v34 }
 0x2d2   : > { %v605_v35 = vpop.f32.mrf.mxu3  ;;  %v692_v36 = vpop.f32.mrf.mxu2 }
 0x2d3   : > { %v696_v37 = vsel %vm574_vm2, %v692_v36, -inf  ;;  %v815_v35 = vperm.slane %v1485_v60, 1 }
 0x2d4   : > { %697 = vmax.xlane.f32.xlu1 %v696_v37 }
 0x2da   : > { %v629_v38 = vpop.f32.mrf.mxu3  ;;  %v694_v39 = vpop.f32.mrf.mxu2 }
 0x2db   : > { %v633_v40 = vsel %vm574_vm2, %v629_v38, -inf }
 0x2dc   : > { %634 = vmax.xlane.f32.xlu2 %v633_v40 }
 0x2e2   : > { %v631_v41 = vpop.f32.mrf.mxu3 }
 0x2e3   : > { %v1375_v41 = vmov 128.0  }
 0x2ea   : > { %v754_v42 = vpop.f32.mrf.mxu3 }
 0x2eb   : > { %v758_v43 = vsel %vm574_vm2, %v754_v42, -inf }
 0x2ec   : > { %759 = vmax.xlane.f32.xlu0 %v758_v43 }
 0x2f2   : > { %v756_v44 = vpop.f32.mrf.mxu3 }
 0x300   : > { %708 = vrot.lane.b32.xlu0 %v1495_v11, %s1372_s13 }
 0x347   : > { %v698_v45 = vpop.xlane.xlu1 %697 }
 0x348   : > { %v699_v46 = vsub.f32 %v692_v36, %v698_v45  ;;  %v877_v36 = vunpack.c.l.bf16 %v1476_v52 }
 0x34a   : > { %v700_v47 = vmul.f32 1.442695, %v699_v46 }
 0x34c   : > { %1243 = vpow2.f32 %v700_v47 }
 0x34f   : > { %v635_v48 = vpop.xlane.xlu2 %634 }
 0x350   : > { %v636_v49 = vsub.f32 %v629_v38, %v635_v48 }
 0x352   : > { %v1244_v50 = vpop.eup %1243  ;;  %v637_v51 = vmul.f32 1.442695, %v636_v49 }
 0x353   : > { %v702_v53 = vsel %vm574_vm2, %v1244_v50, 0.0 }
 0x354   : > { %1245 = vpow2.f32 %v637_v51  ;;  %703 = vadd.xlane.f32.xlu1 %v702_v53 }
 0x35a   : > { %v1246_v54 = vpop.eup %1245 }
 0x35b   : > { %v639_v55 = vsel %vm574_vm2, %v1246_v54, 0.0 }
 0x35c   : > { %640 = vadd.xlane.f32.xlu2 %v639_v55 }
 0x35f   : > { %v760_v56 = vpop.xlane.xlu0 %759 }
 0x360   : > { %v761_v57 = vsub.f32 %v754_v42, %v760_v56 }
 0x362   : > { %v762_v58 = vmul.f32 1.442695, %v761_v57 }
 0x364   : > { %1247 = vpow2.f32 %v762_v58 }
 0x36a   : > { %v1248_v59 = vpop.eup %1247 }
 0x36b   : > { %v764_v61 = vsel %vm574_vm2, %v1248_v59, 0.0 }
 0x36c   : > { %765 = vadd.xlane.f32.xlu1 %v764_v61 }
 0x372   : > { %v709_v62 = vpop.permute.xlu0 %708 }
 0x373   : > { %v714_v63 = vsel %vm590_vm1, %v709_v62, 0  ;;  %v906_v62 = vperm.slane %v1485_v60, 2 }
 0x374   : > { %646 = vrot.lane.b32.xlu2 %v1495_v11, %s1373_s14  ;;  %723 = vmatpush.bf16.msra.mxu2 %v714_v63 }
 0x385   : > { %770 = vrot.lane.b32.xlu1 %v1495_v11, %s1374_s15 }
 0x3c7   : > { %v704_v0 = vpop.xlane.xlu1 %703 }
 0x3c8   : > { %1249 = vrcp.f32 %v704_v0  ;;  %v908_v0 = vperm.slane %v1485_v60, 3 }
 0x3ce   : > { %v1250_v1 = vpop.eup %1249 }
 0x3cf   : > { %v706_v2 = vmul.f32 %v1250_v1, %v1244_v50  ;;  %v641_v3 = vpop.xlane.xlu2 %640 }
 0x3d0   : > { %1251 = vrcp.f32 %v641_v3 }
 0x3d1   : > { %v707_v4 = vpack.c.bf16 %v706_v2, %v706_v2 }
 0x3d3   : > { %1123 = vmatmul.msk.bf16.vlgmr.msra.gmra.mxu2 %vm574_vm2, %v707_v4 }
 0x3d6   : > { %v1252_v5 = vpop.eup %1251 }
 0x3d7   : > { %v643_v6 = vmul.f32 %v1252_v5, %v1246_v54  ;;  %v647_v7 = vpop.permute.xlu2 %646 }
 0x3d8   : > { %v652_v8 = vsel %vm590_vm1, %v647_v7, 0 }
 0x3d9   : > { %661 = vmatpush.bf16.msrb.mxu0 %v652_v8  ;;  %v644_v9 = vpack.c.bf16 %v643_v6, %v643_v6 }
 0x3dc   : > { %1121 = vmatmul.msk.bf16.vlgmr.msrb.gmra.mxu0 %vm574_vm2, %v644_v9 }
 0x3df   : > { %v766_v10 = vpop.xlane.xlu1 %765 }
 0x3e0   : > { %1253 = vrcp.f32 %v766_v10 }
 0x3e1   : > { %1255 = vrcp.f32 %v1375_v41 }
 0x3e6   : > { %v1254_v11 = vpop.eup %1253 }
 0x3e7   : > { %v768_v12 = vmul.f32 %v1254_v11, %v1248_v59  ;;  %v1256_v42 = vpop.eup %1255 }
 0x3e8   : > { %v882_v43 = vmul.f32 128.0, %v1256_v42  ;;  %vm886_vm6 = vweird.f32 %v1256_v42 }
 0x3e9   : > { %v769_v15 = vpack.c.bf16 %v768_v12, %v768_v12 }
 0x3ea   : > { %v883_v44 = vsub.f32 1.0, %v882_v43 }
 0x3ec   : > { %v884_v45 = vmul.f32 %v1256_v42, %v883_v44 }
 0x3ee   : > { %v885_v46 = vadd.f32 %v1256_v42, %v884_v45 }
 0x3f0   : > { %v887_v47 = vsel %vm886_vm6, %v1256_v42, %v885_v46 }
 0x3f7   : > { %v771_v13 = vpop.permute.xlu1 %770 }
 0x3f8   : > { %v776_v14 = vsel %vm590_vm1, %v771_v13, 0 }
 0x3f9   : > { %785 = vmatpush.bf16.msra.mxu0 %v776_v14 }
 0x3fc   : > { %1125 = vmatmul.msk.bf16.vlgmr.msra.gmra.mxu0 %vm574_vm2, %v769_v15 }
 0x456   : > { %v725_v16 = vpop.f32.mrf.mxu2 }
 0x459   : > { %v663_v17 = vpop.f32.mrf.mxu0 }
 0x45a   : > { %668 = vrot.lane.b32.xlu2 %v663_v17, %s1374_s15 }
 0x45e   : > { %v727_v18 = vpop.f32.mrf.mxu2 }
 0x461   : > { %v665_v19 = vpop.f32.mrf.mxu0 }
 0x462   : > { %730 = vrot.lane.b32.xlu2 %v725_v16, %s1372_s13 }
 0x479   : > { %v787_v20 = vpop.f32.mrf.mxu0 }
 0x47a   : > { %792 = vrot.lane.b32.xlu0 %v787_v20, %s1373_s14 }
 0x481   : > { %v789_v21 = vpop.f32.mrf.mxu0 }
 0x4b4   : > { %v669_v28 = vpop.permute.xlu2 %668 }
 0x4b5   : > { %672 = vst.msk [vmem:[#allocation2] sm:$0xff] %vm671_vm3, %v669_v28 }
 0x4bc   : > { %v731_v29 = vpop.permute.xlu2 %730 }
 0x4bd   : > { %734 = vst.msk [vmem:[#allocation2] sm:$0xff] %vm733_vm4, %v731_v29 }
 0x4ec   : > { %v793_v32 = vpop.permute.xlu0 %792 }
 0x4ed   : > { %796 = vst.msk [vmem:[#allocation2] sm:$0xff] %vm795_vm5, %v793_v32 }
 0x4f4   : > { %v797_v33 = vld [vmem:[#allocation2] sm:$0xff] }
 0x4f5   : > { %v798_v34 = vpack.c.bf16 %v797_v33, %v797_v33 }
 0x4f7   : > { %872 = vmatmul.bf16.vlgmr.msrb.gmra.mxu1 %v798_v34 }
 0x574   : > { %v873_v37 = vpop.f32.mrf.mxu1 }
 0x575   : > { %v874_v38 = vadd.f32 %v873_v37, %v815_v35 }
 0x577   : > { %v878_v39 = vadd.f32 %v877_v36, %v874_v38 }
 0x579   : > { %879 = vadd.xlane.f32.xlu2 %v878_v39 }
 0x57c   : > { %v875_v40 = vpop.f32.mrf.mxu1 }
 0x5ec   : > { %v880_v48 = vpop.xlane.xlu2 %879 }
 0x5ed   : > { %v888_v49 = vmul.f32 %v887_v47, %v880_v48 }
 0x5ef   : > { %v889_v50 = vsub.f32 %v878_v39, %v888_v49 }
 0x5f1   : > { %v890_v51 = vmul.f32 %v889_v50, %v889_v50 }
 0x5f3   : > { %891 = vadd.xlane.f32.xlu0 %v890_v51 }
 0x666   : > { %v892_v52 = vpop.xlane.xlu0 %891 }
 0x667   : > { %v893_v53 = vmul.f32 %v892_v52, %v887_v47 }
 0x669   : > { %v894_v54 = vadd.f32 1e-05, %v893_v53 }
 0x66b   : > { %1257 = vrsqrt.f32 %v894_v54  ;;  %vm901_vm8 = vweird.f32 %v894_v54 }
 0x671   : > { %v1258_v55 = vpop.eup %1257 }
 0x672   : > { %v896_v56 = vmul.f32 %v1258_v55, %v894_v54  ;;  %vm902_vm7 = vweird.f32 %v1258_v55 }
 0x673   : > { %vm903_vm9 = vmor %vm901_vm8, %vm902_vm7 }
 0x674   : > { %v897_v57 = vmul.f32 %v1258_v55, %v896_v56 }
 0x676   : > { %v898_v58 = vmul.f32 0.5, %v897_v57 }
 0x678   : > { %v899_v59 = vsub.f32 1.5, %v898_v58 }
 0x67a   : > { %v900_v61 = vmul.f32 %v1258_v55, %v899_v59 }
 0x67c   : > { %v904_v63 = vsel %vm903_vm9, %v1258_v55, %v900_v61 }
 0x67d   : > { %v905_v1 = vmul.f32 %v904_v63, %v889_v50 }
 0x67f   : > { %v907_v2 = vmul.f32 %v906_v62, %v905_v1 }
 0x681   : > { %v909_v3 = vadd.f32 %v908_v0, %v907_v2 }
 0x683   : > { %v910_v4 = vpack.c.bf16 %v909_v3, %v909_v3 }
 0x685   : > { %911 = vst [vmem:[%s340_s18] sm:$0xf] %v910_v4 }
 0x686 PF: > { %s19_s24 = sadd.s32 1, %s1363_s24  }
 0x687   : > { %p16_p7 = scmp.ge.s32.totalorder %s19_s24, 4  }
 0x689   :  { %18 = sbr.rel (!%p16_p7) target bundleno = 2 (0x2), region = 94 }
 0x68e   :  { %931 = vsyncpa [#allocation4], 1 }
 0x68f   :  { %933 = vsyncpa [#allocation4 + $0x1], 1 }
 0x690   :  { %934 = vsyncpa [#allocation6], 1 }

// kernel: transformer_decoder.11
= control target key start
LH: loop header
LB: loop body
LE: loop exit
PB: predicated region body
PF: predicated region fallthrough
CT: control target
= control target key end

     0   :  { %10 = vsyncpa [#allocation4], 0  ;;  %s780_s0 = inlined_call_operand.vmem [shape: bf16[16,128], index: 0, kind: input, shape index: {}]   ;;  %s781_s1 = inlined_call_operand.hbm [shape: bf16[128,256], index: 1, kind: input, shape index: {}]   ;;  %s782_s2 = inlined_call_operand.vmem [shape: f32[1,256], index: 2, kind: input, shape index: {}]   ;;  %s783_s3 = inlined_call_operand.hbm [shape: bf16[256,128], index: 3, kind: input, shape index: {}]   ;;  %s784_s4 = inlined_call_operand.vmem [shape: f32[3,128], index: 4, kind: input, shape index: {}]   ;;  %s785_s5 = inlined_call_operand.hbm [shape: f32[16,128], index: 5, kind: output, shape index: {}]  }
   0x1   :  { %11 = vsyncpa [#allocation7], 0 }
   0x2   :  { %12 = vsyncpa [#allocation5], 0  ;;  %s19_s20 = sshll.u32 %s781_s1, 4  ;;  %s710_s21 = smov [#allocation3]   ;;  %s20_s20 = int_to_ptr.hbm [resolvable:$true] %s19_s20 }
   0x3   :  { %s21_s22 = sshll.u32 %s710_s21, 4  ;;  %s34_s25 = sshll.u32 %s783_s3, 4  ;;  %s22_s22 = int_to_ptr.vmem [resolvable:$true] %s21_s22  ;;  %s35_s25 = int_to_ptr.hbm [resolvable:$true] %s34_s25 }
   0x4   :  { %s711_s26 = smov 128   ;;  %s712_s27 = smov 8  }
   0x5   :  { %27 = dma.hbm_to_vmem [thread:$0]  %s20_s20, 2048, %s22_s22, [#allocation4], %s711_s26, %s711_s26, %s712_s27  }
   0x6   :  { %s713_s28 = smov [#allocation6]   ;;  %s714_s30 = smov 64  }
   0x7   :  { %s36_s29 = sshll.u32 %s713_s28, 4  ;;  %s715_s1 = smov 4   ;;  %s37_s29 = int_to_ptr.vmem [resolvable:$true] %s36_s29 }
   0x8   :  { %42 = dma.hbm_to_vmem [thread:$0]  %s35_s25, 2048, %s37_s29, [#allocation7], %s714_s30, %s714_s30, %s715_s1  }
   0x9   :  { %704 = dma.done.wait [#allocation4], 2048  }
   0xa   :  { %705 = vsyncadd [#allocation4], 4294965248 }
   0xb   :  { %706 = dma.done.wait [#allocation7], 2048  }
   0xc   :  { %707 = vsyncadd [#allocation7], 4294965248  ;;  %v515_v0 = vld [vmem:[#allocation3 + $0x70] sm:$0xf]  ;;  %v601_v1 = vld [vmem:[#allocation3 + $0x74] sm:$0xf0] }
   0xd   :  { %v600_v2 = vld [vmem:[#allocation3 + $0x74] sm:$0xf]  ;;  %v516_v3 = vor.u32 %v601_v1, %v515_v0  ;;  %v517_v4 = vld [vmem:[#allocation3 + $0x78] sm:$0xf0]  ;;  %v507_v5 = vld [vmem:[#allocation3 + $0x60] sm:$0xf] }
   0xe   :  { %v599_v6 = vld [vmem:[#allocation3 + $0x64] sm:$0xf0]  ;;  %v520_v7 = vor.u32 %v600_v2, %v517_v4  ;;  %v598_v8 = vld [vmem:[#allocation3 + $0x64] sm:$0xf]  ;;  %v509_v9 = vld [vmem:[#allocation3 + $0x68] sm:$0xf0] }
   0xf   :  { %169 = vmatpush.bf16.msra.mxu0 %v516_v3  ;;  %v508_v10 = vor.u32 %v599_v6, %v507_v5  ;;  %v512_v11 = vor.u32 %v598_v8, %v509_v9  ;;  %v499_v12 = vld [vmem:[#allocation3 + $0x50] sm:$0xf]  ;;  %v597_v13 = vld [vmem:[#allocation3 + $0x54] sm:$0xf0]  ;;  %v596_v14 = vld [vmem:[#allocation3 + $0x54] sm:$0xf] }
  0x10   :  { %183 = vmatpush.bf16.msra.mxu1 %v520_v7  ;;  %v501_v15 = vld [vmem:[#allocation3 + $0x58] sm:$0xf0]  ;;  %v500_v16 = vor.u32 %v597_v13, %v499_v12  ;;  %v491_v18 = vld [vmem:[#allocation3 + $0x40] sm:$0xf]  ;;  %v595_v19 = vld [vmem:[#allocation3 + $0x44] sm:$0xf0] }
  0x11   :  { %v504_v17 = vor.u32 %v596_v14, %v501_v15  ;;  %v594_v20 = vld [vmem:[#allocation3 + $0x44] sm:$0xf]  ;;  %v493_v21 = vld [vmem:[#allocation3 + $0x48] sm:$0xf0]  ;;  %v492_v22 = vor.u32 %v595_v19, %v491_v18  ;;  %v609_v23 = vld [vmem:[#allocation6 + $0x38] sm:$0xff]  ;;  %s439_s14 = sshll.u32 %s785_s5, 4  ;;  %s440_s14 = int_to_ptr.hbm [resolvable:$true] %s439_s14 }
  0x12   :  { %v617_v24 = vld [vmem:[#allocation6 + $0x78] sm:$0xff]  ;;  %v496_v25 = vor.u32 %v594_v20, %v493_v21  ;;  %v483_v26 = vld [vmem:[#allocation3 + $0x30] sm:$0xf]  ;;  %v592_v28 = vld [vmem:[#allocation3 + $0x34] sm:$0xf]  ;;  %333 = vmatpush.bf16.msra.mxu2 %v609_v23 }
  0x13   :  { %170 = vmatpush.bf16.msra.mxu0 %v508_v10  ;;  %v593_v27 = vld [vmem:[#allocation3 + $0x34] sm:$0xf0]  ;;  %v485_v29 = vld [vmem:[#allocation3 + $0x38] sm:$0xf0]  ;;  %347 = vmatpush.bf16.msra.mxu3 %v617_v24  ;;  %v608_v30 = vld [vmem:[#allocation6 + $0x30] sm:$0xff] }
  0x14   :  { %184 = vmatpush.bf16.msra.mxu1 %v512_v11  ;;  %v616_v31 = vld [vmem:[#allocation6 + $0x70] sm:$0xff]  ;;  %v484_v32 = vor.u32 %v593_v27, %v483_v26  ;;  %v488_v33 = vor.u32 %v592_v28, %v485_v29  ;;  %v475_v34 = vld [vmem:[#allocation3 + $0x20] sm:$0xf]  ;;  %v591_v35 = vld [vmem:[#allocation3 + $0x24] sm:$0xf0] }
  0x15   :  { %v590_v36 = vld [vmem:[#allocation3 + $0x24] sm:$0xf]  ;;  %v477_v37 = vld [vmem:[#allocation3 + $0x28] sm:$0xf0]  ;;  %v476_v40 = vor.u32 %v591_v35, %v475_v34  ;;  %v467_v42 = vld [vmem:[#allocation3 + $0x10] sm:$0xf] }
  0x16   :  { %334 = vmatpush.bf16.msra.mxu2 %v608_v30  ;;  %v607_v38 = vld [vmem:[#allocation6 + $0x28] sm:$0xff]  ;;  %v480_v41 = vor.u32 %v590_v36, %v477_v37  ;;  %v589_v43 = vld [vmem:[#allocation3 + $0x14] sm:$0xf0]  ;;  %v588_v44 = vld [vmem:[#allocation3 + $0x14] sm:$0xf] }
  0x17   :  { %171 = vmatpush.bf16.msra.mxu0 %v500_v16  ;;  %348 = vmatpush.bf16.msra.mxu3 %v616_v31  ;;  %v615_v39 = vld [vmem:[#allocation6 + $0x68] sm:$0xff]  ;;  %v469_v45 = vld [vmem:[#allocation3 + $0x18] sm:$0xf0]  ;;  %v606_v46 = vld [vmem:[#allocation6 + $0x20] sm:$0xff]  ;;  %v468_v48 = vor.u32 %v589_v43, %v467_v42 }
  0x18   :  { %185 = vmatpush.bf16.msra.mxu1 %v504_v17  ;;  %v614_v47 = vld [vmem:[#allocation6 + $0x60] sm:$0xff]  ;;  %v472_v49 = vor.u32 %v588_v44, %v469_v45  ;;  %v587_v51 = vld [vmem:[#allocation3 + $0x4] sm:$0xf0]  ;;  %v461_v53 = vld [vmem:[#allocation3 + $0x8] sm:$0xf0] }
  0x19   :  { %v459_v50 = vld [vmem:[#allocation3] sm:$0xf]  ;;  %v586_v52 = vld [vmem:[#allocation3 + $0x4] sm:$0xf]  ;;  %v605_v57 = vld [vmem:[#allocation6 + $0x18] sm:$0xff] }
  0x1a   :  { %335 = vmatpush.bf16.msra.mxu2 %v607_v38  ;;  %v460_v54 = vor.u32 %v587_v51, %v459_v50  ;;  %v464_v55 = vor.u32 %v586_v52, %v461_v53  ;;  %v585_v56 = vld [vmem:[%s780_s0] sm:$0xff]  ;;  %v613_v58 = vld [vmem:[#allocation6 + $0x58] sm:$0xff]  ;;  %v604_v59 = vld [vmem:[#allocation6 + $0x10] sm:$0xff] }
  0x1b   :  { %172 = vmatpush.bf16.msra.mxu0 %v492_v22  ;;  %349 = vmatpush.bf16.msra.mxu3 %v615_v39  ;;  %v612_v60 = vld [vmem:[#allocation6 + $0x50] sm:$0xff]  ;;  %v603_v61 = vld [vmem:[#allocation6 + $0x8] sm:$0xff]  ;;  %v602_v63 = vld [vmem:[#allocation6] sm:$0xff] }
  0x1c   :  { %186 = vmatpush.bf16.msra.mxu1 %v496_v25  ;;  %v611_v62 = vld [vmem:[#allocation6 + $0x48] sm:$0xff]  ;;  %v610_v0 = vld [vmem:[#allocation6 + $0x40] sm:$0xff] }
  0x1d   :  { %v77_v1 = vld [vmem:[%s782_s2] sm:$0x3] }
  0x1e   :  { %336 = vmatpush.bf16.msra.mxu2 %v606_v46  ;;  %v79_v4 = vperm.slane %v77_v1, 0  ;;  %v80_v5 = vperm.slane %v77_v1, 1  ;;  %v766_v18 = vld [vmem:[%s784_s4] sm:$0x7] }
  0x1f   :  { %173 = vmatpush.bf16.msra.mxu0 %v484_v32  ;;  %350 = vmatpush.bf16.msra.mxu3 %v614_v47  ;;  %v59_v19 = vld [vmem:[%s780_s0] sm:$0xff]   ;;  %v371_v21 = vperm.slane %v766_v18, 0  ;;  %v428_v1 = vperm.slane %v766_v18, 2  ;;  %s717_s0 = smov [#allocation8]  }
  0x20   :  { %187 = vmatpush.bf16.msra.mxu1 %v488_v33  ;;  %v374_v24 = vunpack.c.l.bf16 %v59_v19  ;;  %v375_v30 = vunpack.c.h.bf16 %v59_v19  ;;  %v716_v33 = vmov 128.0   ;;  %s437_s4 = sshll.u32 %s717_s0, 4  ;;  %s438_s4 = int_to_ptr.vmem [resolvable:$true] %s437_s4 }
  0x21   :  { %626 = vrcp.f32 %v716_v33 }
  0x22   :  { %337 = vmatpush.bf16.msra.mxu2 %v605_v57 }
  0x23   :  { %174 = vmatpush.bf16.msra.mxu0 %v476_v40  ;;  %351 = vmatpush.bf16.msra.mxu3 %v613_v58 }
  0x24   :  { %188 = vmatpush.bf16.msra.mxu1 %v480_v41 }
  0x26   :  { %338 = vmatpush.bf16.msra.mxu2 %v604_v59 }
  0x27   :  { %175 = vmatpush.bf16.msra.mxu0 %v468_v48  ;;  %352 = vmatpush.bf16.msra.mxu3 %v612_v60  ;;  %v627_v34 = vpop.eup %626 }
  0x28   :  { %189 = vmatpush.bf16.msra.mxu1 %v472_v49  ;;  %v383_v35 = vmul.f32 128.0, %v627_v34  ;;  %vm387_vm0 = vweird.f32 %v627_v34 }
  0x2a   :  { %339 = vmatpush.bf16.msra.mxu2 %v603_v61  ;;  %v384_v36 = vsub.f32 1.0, %v383_v35 }
  0x2b   :  { %176 = vmatpush.bf16.msra.mxu0 %v460_v54  ;;  %353 = vmatpush.bf16.msra.mxu3 %v611_v62  ;;  %v425_v62 = vperm.slane %v766_v18, 1 }
  0x2c   :  { %190 = vmatpush.bf16.msra.mxu1 %v464_v55  ;;  %v385_v37 = vmul.f32 %v627_v34, %v384_v36 }
  0x2e   :  { %177 = vmatmul.bf16.vlgmr.msra.gmra.mxu0 %v585_v56  ;;  %340 = vmatpush.bf16.msra.mxu2 %v602_v63  ;;  %v386_v38 = vadd.f32 %v627_v34, %v385_v37 }
  0x2f   :  { %191 = vmatmul.bf16.vlgmr.msra.gmra.mxu1 %v585_v56  ;;  %354 = vmatpush.bf16.msra.mxu3 %v610_v0 }
  0x30   :  { %v388_v39 = vsel %vm387_vm0, %v627_v34, %v386_v38 }
  0xab   :  { %v178_v2 = vpop.f32.mrf.mxu0 }
  0xac   :  { %v192_v3 = vpop.f32.mrf.mxu1  ;;  %v179_v6 = vadd.f32 %v178_v2, %v79_v4 }
  0xad   :  { %v193_v7 = vadd.f32 %v192_v3, %v80_v5 }
  0xae   :  { %v197_v12 = vmax.f32 %v179_v6, 0.0 }
  0xaf   :  { %v198_v14 = vmax.f32 %v193_v7, 0.0 }
  0xb3   :  { %v180_v8 = vpop.f32.mrf.mxu0 }
  0xb4   :  { %v181_v9 = vadd.f32 %v180_v8, %v79_v4  ;;  %v194_v10 = vpop.f32.mrf.mxu1 }
  0xb5   :  { %v195_v11 = vadd.f32 %v194_v10, %v80_v5 }
  0xb6   :  { %v199_v13 = vmax.f32 %v181_v9, 0.0 }
  0xb7   :  { %v200_v15 = vmax.f32 %v195_v11, 0.0 }
  0xb8   :  { %v203_v16 = vpack.c.bf16 %v199_v13, %v197_v12 }
  0xb9   :  { %v204_v17 = vpack.c.bf16 %v200_v15, %v198_v14 }
  0xba   :  { %341 = vmatmul.bf16.vlgmr.msra.gmra.mxu2 %v203_v16 }
  0xbb   :  { %355 = vmatmul.bf16.vlgmr.msra.gmra.mxu3 %v204_v17 }
 0x13d   :  { %v342_v20 = vpop.f32.mrf.mxu2 }
 0x13e   :  { %v356_v22 = vpop.f32.mrf.mxu3 }
 0x13f   :  { %v357_v23 = vadd.f32 %v356_v22, %v342_v20 }
 0x141   :  { %v372_v25 = vadd.f32 %v371_v21, %v357_v23 }
 0x143   :  { %v376_v26 = vadd.f32 %v374_v24, %v372_v25 }
 0x145   :  { %378 = vadd.xlane.f32.xlu0 %v376_v26  ;;  %v344_v27 = vpop.f32.mrf.mxu2 }
 0x146   :  { %v358_v28 = vpop.f32.mrf.mxu3 }
 0x147   :  { %v359_v29 = vadd.f32 %v358_v28, %v344_v27 }
 0x149   :  { %v373_v31 = vadd.f32 %v371_v21, %v359_v29 }
 0x14b   :  { %v377_v32 = vadd.f32 %v375_v30, %v373_v31 }
 0x14d   :  { %380 = vadd.xlane.f32.xlu0 %v377_v32 }
 0x1b8   :  { %v379_v40 = vpop.xlane.xlu0 %378 }
 0x1b9   :  { %v389_v41 = vmul.f32 %v388_v39, %v379_v40 }
 0x1bb   :  { %v391_v42 = vsub.f32 %v376_v26, %v389_v41 }
 0x1bd   :  { %v393_v43 = vmul.f32 %v391_v42, %v391_v42 }
 0x1bf   :  { %395 = vadd.xlane.f32.xlu1 %v393_v43 }
 0x1c0   :  { %v381_v44 = vpop.xlane.xlu0 %380 }
 0x1c1   :  { %v390_v45 = vmul.f32 %v388_v39, %v381_v44 }
 0x1c3   :  { %v392_v46 = vsub.f32 %v377_v32, %v390_v45 }
 0x1c5   :  { %v394_v47 = vmul.f32 %v392_v46, %v392_v46 }
 0x1c7   :  { %397 = vadd.xlane.f32.xlu1 %v394_v47 }
 0x232   :  { %v396_v48 = vpop.xlane.xlu1 %395 }
 0x233   :  { %v399_v49 = vmul.f32 %v396_v48, %v388_v39 }
 0x235   :  { %v401_v50 = vadd.f32 1e-05, %v399_v49 }
 0x237   :  { %628 = vrsqrt.f32 %v401_v50  ;;  %vm409_vm2 = vweird.f32 %v401_v50 }
 0x23a   :  { %v398_v51 = vpop.xlane.xlu1 %397 }
 0x23b   :  { %v400_v52 = vmul.f32 %v398_v51, %v388_v39 }
 0x23d   :  { %v629_v53 = vpop.eup %628  ;;  %v402_v54 = vadd.f32 1e-05, %v400_v52 }
 0x23e   :  { %v404_v55 = vmul.f32 %v629_v53, %v401_v50  ;;  %vm410_vm1 = vweird.f32 %v629_v53 }
 0x23f   :  { %630 = vrsqrt.f32 %v402_v54  ;;  %vm411_vm3 = vmor %vm409_vm2, %vm410_vm1  ;;  %vm419_vm5 = vweird.f32 %v402_v54 }
 0x240   :  { %v405_v56 = vmul.f32 %v629_v53, %v404_v55 }
 0x242   :  { %v406_v57 = vmul.f32 0.5, %v405_v56 }
 0x244   :  { %v407_v58 = vsub.f32 1.5, %v406_v57 }
 0x245   :  { %v631_v59 = vpop.eup %630 }
 0x246   :  { %v408_v60 = vmul.f32 %v629_v53, %v407_v58  ;;  %v414_v61 = vmul.f32 %v631_v59, %v402_v54  ;;  %vm420_vm4 = vweird.f32 %v631_v59 }
 0x247   :  { %vm421_vm6 = vmor %vm419_vm5, %vm420_vm4 }
 0x248   :  { %v412_v63 = vsel %vm411_vm3, %v629_v53, %v408_v60  ;;  %v415_v0 = vmul.f32 %v631_v59, %v414_v61 }
 0x249   :  { %v423_v2 = vmul.f32 %v412_v63, %v391_v42 }
 0x24a   :  { %v416_v3 = vmul.f32 0.5, %v415_v0 }
 0x24b   :  { %v426_v4 = vmul.f32 %v425_v62, %v423_v2 }
 0x24c   :  { %v417_v5 = vsub.f32 1.5, %v416_v3 }
 0x24d   :  { %v429_v6 = vadd.f32 %v428_v1, %v426_v4 }
 0x24e   :  { %v418_v7 = vmul.f32 %v631_v59, %v417_v5 }
 0x24f   :  { %431 = vst [vmem:[#allocation8] sm:$0xff] %v429_v6 }
 0x250   :  { %v422_v8 = vsel %vm421_vm6, %v631_v59, %v418_v7 }
 0x251   :  { %v424_v9 = vmul.f32 %v422_v8, %v392_v46 }
 0x253   :  { %v427_v10 = vmul.f32 %v425_v62, %v424_v9 }
 0x255   :  { %v430_v11 = vadd.f32 %v428_v1, %v427_v10 }
 0x257   :  { %432 = vst [vmem:[#allocation8 + $0x8] sm:$0xff] %v430_v11 }
 0x258   :  { %445 = dma.vmem_to_hbm [thread:$0]  %s438_s4, 256, %s440_s14, [#allocation5], %s711_s26, %s711_s26, %s712_s27  }
 0x259   :  { %708 = dma.done.wait [#allocation5], 256  }
 0x25a   :  { %709 = vsyncadd [#allocation5], 4294967040 }
 0x25b   :  { %450 = vsyncpa [#allocation4], 1 }
 0x25c   :  { %451 = vsyncpa [#allocation7], 1 }
 0x25d   :  { %452 = vsyncpa [#allocation5], 1 }

</bundles_post_ra>
